<compile_context>
chip_gen: v5e
topology: v5e:2x2
jax: 0.10.0
libtpu: 0.0.40
codegen_flags: <defaults>
</compile_context>

<pallas_src>
import jax
import jax.numpy as jnp
from jax.experimental import pallas as pl
from jax.experimental.pallas import tpu as pltpu

EPS = 1e-5
LANE = 128
_VMEM_LIMIT = 48 * 1024 * 1024


def _round_up(x, m):
    return (x + m - 1) // m * m


# ------------------------------------------------------------------ kernels
def _make_conv_stats_kernel(taps, stride, wc, ho, wo):
    """Conv (accumulated shifted matmuls) + per-channel partial BN stats.

    `ph_ref` holds stride*stride spatial phases of the zero-padded input,
    each flattened to rows of width `wc`.  Output row index q = i*wc + j;
    columns j >= wo are garbage, masked out of the statistics and dropped by
    the caller.
    """
    mg = ho * wc
    offs = [((dy % stride) * stride + (dx % stride),
             (dy // stride) * wc + (dx // stride)) for (dy, dx) in taps]

    def kernel(ph_ref, w_ref, raw_ref, stats_ref):
        p0, o0 = offs[0]
        acc = jnp.dot(ph_ref[p0, 0, o0:o0 + mg, :], w_ref[0],
                      preferred_element_type=jnp.float32)
        for t, (p, o) in enumerate(offs[1:], start=1):
            acc = acc + jnp.dot(ph_ref[p, 0, o:o + mg, :], w_ref[t],
                                preferred_element_type=jnp.float32)
        raw_ref[0] = acc
        # one-pass per-channel sum / sum-of-squares over the valid columns
        col = jax.lax.broadcasted_iota(jnp.int32, (mg, 1), 0) % wc
        m = (col < wo).astype(jnp.float32)
        stats_ref[0, 0:1, :] = jnp.sum(acc * m, axis=0, keepdims=True)
        stats_ref[0, 1:2, :] = jnp.sum(acc * acc * m, axis=0, keepdims=True)

    return kernel


def _bn_relu_kernel(raw_ref, scale_ref, shift_ref, o_ref):
    # y1 = relu(conv1 * scale + shift), written in the compute dtype (bf16)
    y = raw_ref[...] * scale_ref[...] + shift_ref[...]
    o_ref[...] = jnp.maximum(y, 0.0).astype(o_ref.dtype)


def _bn_add_bn_relu_kernel(c2_ref, sc_ref, s2_ref, t2_ref, ssc_ref, tsc_ref,
                           o_ref):
    # out = relu(bn2(conv2) + shortcut);  identity shortcut uses scale=1,shift=0
    main = c2_ref[...] * s2_ref[...] + t2_ref[...]
    scut = sc_ref[...].astype(jnp.float32) * ssc_ref[...] + tsc_ref[...]
    o_ref[...] = jnp.maximum(main + scut, 0.0).astype(o_ref.dtype)


# ------------------------------------------------------------ pallas wrappers
def _conv_stats(phases, weights, taps, stride, wc, ho, wo):
    s2, n, r, cin_p = phases.shape
    ntaps, _, cout_p = weights.shape
    mg = ho * wc
    kernel = _make_conv_stats_kernel(taps, stride, wc, ho, wo)
    raw, stats = pl.pallas_call(
        kernel,
        grid=(n,),
        in_specs=[
            pl.BlockSpec((s2, 1, r, cin_p), lambda b: (0, b, 0, 0)),
            # weights: full-array block, constant index -> fetched once, resident
            pl.BlockSpec((ntaps, cin_p, cout_p), lambda b: (0, 0, 0)),
        ],
        out_specs=[
            pl.BlockSpec((1, mg, cout_p), lambda b: (b, 0, 0)),
            pl.BlockSpec((1, 2, cout_p), lambda b: (b, 0, 0)),
        ],
        out_shape=[
            jax.ShapeDtypeStruct((n, mg, cout_p), jnp.float32),
            jax.ShapeDtypeStruct((n, 2, cout_p), jnp.float32),
        ],
        compiler_params=pltpu.CompilerParams(
            dimension_semantics=("parallel",),
            vmem_limit_bytes=_VMEM_LIMIT),
    )(phases, weights)
    return raw, stats


def _row_tiled_call(kernel, row_inputs, vec_inputs, out_dtype):
    """Elementwise pass tiled over rows (lane-dense channels, parallel grid)."""
    m, cp = row_inputs[0].shape
    tm = min(512, _round_up(m, 8))
    mp = _round_up(m, tm)
    padded = [jnp.pad(a, ((0, mp - m), (0, 0))) for a in row_inputs]
    row_specs = [pl.BlockSpec((tm, cp), lambda i: (i, 0)) for _ in row_inputs]
    vec_specs = [pl.BlockSpec((1, cp), lambda i: (0, 0)) for _ in vec_inputs]
    out = pl.pallas_call(
        kernel,
        grid=(mp // tm,),
        in_specs=row_specs + vec_specs,
        out_specs=pl.BlockSpec((tm, cp), lambda i: (i, 0)),
        out_shape=jax.ShapeDtypeStruct((mp, cp), out_dtype),
        compiler_params=pltpu.CompilerParams(
            dimension_semantics=("parallel",),
            vmem_limit_bytes=_VMEM_LIMIT),
    )(*padded, *vec_inputs)
    return out[:m]


# ------------------------------------------------------------ plain-JAX glue
def _prep_phases(x, stride, wc, r):
    """x: (N,H,W,C).  Zero-pad spatially by 1, split into stride*stride phases,
    flatten each phase to rows of width `wc` (zero right-pad), pad to r rows.
    Returns (stride*stride, N, r, C).  Total traffic ~1x the input."""
    n, _, _, c = x.shape
    xp = jnp.pad(x, ((0, 0), (1, 1), (1, 1), (0, 0)))
    phases = []
    for py in range(stride):
        for px in range(stride):
            ph = xp[:, py::stride, px::stride, :]
            ph = jnp.pad(ph, ((0, 0), (0, 0), (0, wc - ph.shape[2]), (0, 0)))
            ph = ph.reshape(n, -1, c)
            ph = jnp.pad(ph, ((0, 0), (0, r - ph.shape[1]), (0, 0)))
            phases.append(ph)
    return jnp.stack(phases, axis=0)


def _pad_w(w, cin_p, cout_p):
    kh, kw, cin, cout = w.shape
    w = w.reshape(kh * kw, cin, cout)
    return jnp.pad(w, ((0, 0), (0, cin_p - cin), (0, cout_p - cout)))


def _pad_vec(v, cp):
    return jnp.pad(v.astype(jnp.float32), (0, cp - v.shape[0]))


def _bn_scale_shift(stats, count, gamma_p, beta_p):
    # stats: (N, 2, Cp) per-batch partial (sum, sumsq) -> global scale/shift.
    total = jnp.sum(stats, axis=0)                       # (2, Cp)
    mean = total[0] / count
    var = jnp.maximum(total[1] / count - mean * mean, 0.0)   # biased, f32
    scale = gamma_p * jax.lax.rsqrt(var + EPS)
    shift = beta_p - mean * scale
    return scale.reshape(1, -1), shift.reshape(1, -1)


def _basic_block_impl(x_nchw, params, stride, compute_dtype):
    x = jnp.transpose(x_nchw, (0, 2, 3, 1)).astype(jnp.float32)   # NHWC
    n, h, w, cin = x.shape
    planes = params["w1"].shape[-1]
    s = stride
    has_proj = (s != 1) or (cin != planes)

    cin_p = _round_up(cin, LANE)
    cpl = _round_up(planes, LANE)

    ho = (h - 1) // s + 1
    wo = (w - 1) // s + 1
    wc = max(-(-(w + 2) // s), wo + 2)     # common flattened row width
    mg = ho * wc                           # rows / image (incl. garbage cols)
    r1 = (ho + 2 // s + 1) * wc
    r2 = (ho + 3) * wc
    count = n * ho * wo                    # valid elements per channel (BN)
    taps3 = [(dy, dx) for dy in range(3) for dx in range(3)]

    xc = jnp.pad(x, ((0, 0), (0, 0), (0, 0),
                     (0, cin_p - cin))).astype(compute_dtype)
    phases1 = _prep_phases(xc, s, wc, r1)

    # conv1 + bn1 + relu
    w1 = _pad_w(params["w1"], cin_p, cpl).astype(compute_dtype)
    c1_raw, c1_stats = _conv_stats(phases1, w1, taps3, s, wc, ho, wo)
    sc1, sh1 = _bn_scale_shift(c1_stats, count, _pad_vec(params["g1"], cpl),
                               _pad_vec(params["b1"], cpl))
    y1 = _row_tiled_call(_bn_relu_kernel, [c1_raw.reshape(n * mg, cpl)],
                         [sc1, sh1], compute_dtype)

    # conv2 + bn2
    y1_img = y1.reshape(n, ho, wc, cpl)[:, :, :wo, :]
    phases2 = _prep_phases(y1_img, 1, wc, r2)
    w2 = _pad_w(params["w2"], cpl, cpl).astype(compute_dtype)
    c2_raw, c2_stats = _conv_stats(phases2, w2, taps3, 1, wc, ho, wo)
    sc2, sh2 = _bn_scale_shift(c2_stats, count, _pad_vec(params["g2"], cpl),
                               _pad_vec(params["b2"], cpl))

    # shortcut
    if has_proj:
        # 1x1 stride-s conv == the (dy=1,dx=1) tap of the 3x3 geometry, so it
        # reuses phases1 directly (no extra HBM prep).
        wsc = _pad_w(params["wsc"], cin_p, cpl).astype(compute_dtype)
        scut_raw, scut_stats = _conv_stats(phases1, wsc, [(1, 1)], s, wc, ho, wo)
        scs, shs = _bn_scale_shift(scut_stats, count,
                                   _pad_vec(params["gsc"], cpl),
                                   _pad_vec(params["bsc"], cpl))
        scut = scut_raw.reshape(n * mg, cpl)
    else:
        # identity shortcut: x itself in the same flattened layout; row q of
        # image b is phases1[0, b, q + wc + 1] (skip the 1-pixel border).
        scut = phases1[0, :, wc + 1:wc + 1 + mg, :].reshape(n * mg, cpl)
        scs = jnp.ones((1, cpl), jnp.float32)
        shs = jnp.zeros((1, cpl), jnp.float32)

    out_flat = _row_tiled_call(
        _bn_add_bn_relu_kernel,
        [c2_raw.reshape(n * mg, cpl), scut],
        [sc2, sh2, scs, shs], jnp.float32)

    out = out_flat.reshape(n, ho, wc, cpl)[:, :, :wo, :planes]
    return jnp.transpose(out, (0, 3, 1, 2))                      # NCHW


basic_block = jax.jit(_basic_block_impl, static_argnums=(2, 3))


# ---------------------------------------------------- deterministic params
def init_params(key, in_planes, planes, stride):
    ks = jax.random.split(key, 9)
    p = dict(
        w1=0.2 * jax.random.normal(ks[0], (3, 3, in_planes, planes), jnp.float32),
        g1=1.0 + 0.1 * jax.random.normal(ks[1], (planes,), jnp.float32),
        b1=0.1 * jax.random.normal(ks[2], (planes,), jnp.float32),
        w2=0.2 * jax.random.normal(ks[3], (3, 3, planes, planes), jnp.float32),
        g2=1.0 + 0.1 * jax.random.normal(ks[4], (planes,), jnp.float32),
        b2=0.1 * jax.random.normal(ks[5], (planes,), jnp.float32),
    )
    if stride != 1 or in_planes != planes:
        p.update(
            wsc=0.2 * jax.random.normal(ks[6], (1, 1, in_planes, planes), jnp.float32),
            gsc=1.0 + 0.1 * jax.random.normal(ks[7], (planes,), jnp.float32),
            bsc=0.1 * jax.random.normal(ks[8], (planes,), jnp.float32),
        )
    return p


# ---------------------------------------------- pure-JAX reference (checker)
def ref_block(x_nchw, p, stride, compute_dtype):
    """Reference at matched compute precision (conv operands rounded to
    compute_dtype, f32 accumulation) so the check can be tight."""
    x = jnp.transpose(x_nchw, (0, 2, 3, 1)).astype(jnp.float32)
    cin = x.shape[-1]
    planes = p["w1"].shape[-1]
    has_proj = (stride != 1) or (cin != planes)
    cd = compute_dtype

    def conv(xx, w, s, pad):
        return jax.lax.conv_general_dilated(
            xx.astype(cd).astype(jnp.float32), w.astype(cd).astype(jnp.float32),
            (s, s), pad, dimension_numbers=("NHWC", "HWIO", "NHWC"),
            precision=jax.lax.Precision.HIGHEST)

    def bn(xx, g, b):
        mean = jnp.mean(xx, axis=(0, 1, 2), keepdims=True)
        var = jnp.mean(jnp.square(xx - mean), axis=(0, 1, 2), keepdims=True)
        return (xx - mean) * jax.lax.rsqrt(var + EPS) * g + b

    out = jax.nn.relu(bn(conv(x, p["w1"], stride, ((1, 1), (1, 1))),
                         p["g1"], p["b1"]))
    out = bn(conv(out, p["w2"], 1, ((1, 1), (1, 1))), p["g2"], p["b2"])
    if has_proj:
        sc = bn(conv(x, p["wsc"], stride, "VALID"), p["gsc"], p["bsc"])
    else:
        sc = x.astype(cd).astype(jnp.float32)
    return jnp.transpose(jax.nn.relu(out + sc), (0, 3, 1, 2))


if __name__ == "__main__":
    key = jax.random.PRNGKey(0)
    x = jax.random.normal(key, (2, 4, 16, 16), jnp.float32)   # NCHW like PyTorch
    cd = jnp.bfloat16   # MXU compute dtype (f32 accumulation everywhere)

    # Config A: projection shortcut (in_planes=4, planes=8, stride=2)
    params_a = init_params(jax.random.fold_in(key, 1), 4, 8, stride=2)
    out_a = jax.block_until_ready(basic_block(x, params_a, 2, cd))
    assert out_a.shape == (2, 8, 8, 8)
    ref_a = ref_block(x, params_a, 2, cd)
    err_a = float(jnp.max(jnp.abs(out_a - ref_a)))
    assert jnp.allclose(out_a, ref_a, atol=3e-2, rtol=3e-2), err_a

    # Config B: identity shortcut (in_planes=planes=4, stride=1)
    params_b = init_params(jax.random.fold_in(key, 2), 4, 4, stride=1)
    out_b = jax.block_until_ready(basic_block(x, params_b, 1, cd))
    assert out_b.shape == (2, 4, 16, 16)
    ref_b = ref_block(x, params_b, 1, cd)
    err_b = float(jnp.max(jnp.abs(out_b - ref_b)))
    assert jnp.allclose(out_b, ref_b, atol=3e-2, rtol=3e-2), err_b

    print("KERNEL_OK")
</pallas_src>

<mosaic_0001>
module attributes {stable_mosaic.version = 11 : i64} {
  func.func @kernel(%arg0: i32, %arg1: memref<4x1x100x128xbf16, #tpu.memory_space<vmem>>, %arg2: memref<9x128x128xbf16, #tpu.memory_space<vmem>>, %arg3: memref<1x80x128xf32, #tpu.memory_space<vmem>>, %arg4: memref<1x2x128xf32, #tpu.memory_space<vmem>>) attributes {dimension_semantics = [#tpu.dimension_semantics<parallel>], iteration_bounds = array<i64: 2>, scalar_prefetch = 0 : i64, scratch_operands = 0 : i64, tpu.core_type = #tpu.core_type<tc>, window_params = [{transform_indices = @transform_0, window_bounds = array<i64: 4, 1, 100, 128>}, {pipeline_mode = #tpu.pipeline_mode<synchronous>, transform_indices = @transform_1, window_bounds = array<i64: 9, 128, 128>}, {transform_indices = @transform_2, window_bounds = array<i64: 1, 80, 128>}, {transform_indices = @transform_3, window_bounds = array<i64: 1, 2, 128>}]} {
    %c0 = arith.constant 0 : index
    %c0_0 = arith.constant 0 : index
    %c0_1 = arith.constant 0 : index
    %c0_2 = arith.constant 0 : index
    %0 = vector.load %arg1[%c0, %c0_0, %c0_1, %c0_2] : memref<4x1x100x128xbf16, #tpu.memory_space<vmem>>, vector<1x1x80x128xbf16>
    %1 = vector.shape_cast %0 : vector<1x1x80x128xbf16> to vector<80x128xbf16>
    %c0_3 = arith.constant 0 : index
    %c0_4 = arith.constant 0 : index
    %c0_5 = arith.constant 0 : index
    %2 = vector.load %arg2[%c0_3, %c0_4, %c0_5] : memref<9x128x128xbf16, #tpu.memory_space<vmem>>, vector<1x128x128xbf16>
    %3 = vector.shape_cast %2 : vector<1x128x128xbf16> to vector<128x128xbf16>
    %cst = arith.constant dense<0.000000e+00> : vector<80x128xf32>
    %4 = tpu.matmul %1, %3, %cst {dimension_numbers = #tpu.dot_dimension_numbers<[1], [0], [0], [1], [0, 0, 1, 1], [], []>} : vector<80x128xbf16>, vector<128x128xbf16>, vector<80x128xf32> -> vector<80x128xf32>
    %c1 = arith.constant 1 : index
    %c0_6 = arith.constant 0 : index
    %c0_7 = arith.constant 0 : index
    %c0_8 = arith.constant 0 : index
    %5 = vector.load %arg1[%c1, %c0_6, %c0_7, %c0_8] : memref<4x1x100x128xbf16, #tpu.memory_space<vmem>>, vector<1x1x80x128xbf16>
    %6 = vector.shape_cast %5 : vector<1x1x80x128xbf16> to vector<80x128xbf16>
    %c1_9 = arith.constant 1 : index
    %c0_10 = arith.constant 0 : index
    %c0_11 = arith.constant 0 : index
    %7 = vector.load %arg2[%c1_9, %c0_10, %c0_11] : memref<9x128x128xbf16, #tpu.memory_space<vmem>>, vector<1x128x128xbf16>
    %8 = vector.shape_cast %7 : vector<1x128x128xbf16> to vector<128x128xbf16>
    %cst_12 = arith.constant dense<0.000000e+00> : vector<80x128xf32>
    %9 = tpu.matmul %6, %8, %cst_12 {dimension_numbers = #tpu.dot_dimension_numbers<[1], [0], [0], [1], [0, 0, 1, 1], [], []>} : vector<80x128xbf16>, vector<128x128xbf16>, vector<80x128xf32> -> vector<80x128xf32>
    %10 = arith.addf %4, %9 : vector<80x128xf32>
    %c0_13 = arith.constant 0 : index
    %c0_14 = arith.constant 0 : index
    %c1_15 = arith.constant 1 : index
    %c0_16 = arith.constant 0 : index
    %11 = vector.load %arg1[%c0_13, %c0_14, %c1_15, %c0_16] : memref<4x1x100x128xbf16, #tpu.memory_space<vmem>>, vector<1x1x80x128xbf16>
    %12 = vector.shape_cast %11 : vector<1x1x80x128xbf16> to vector<80x128xbf16>
    %c2 = arith.constant 2 : index
    %c0_17 = arith.constant 0 : index
    %c0_18 = arith.constant 0 : index
    %13 = vector.load %arg2[%c2, %c0_17, %c0_18] : memref<9x128x128xbf16, #tpu.memory_space<vmem>>, vector<1x128x128xbf16>
    %14 = vector.shape_cast %13 : vector<1x128x128xbf16> to vector<128x128xbf16>
    %cst_19 = arith.constant dense<0.000000e+00> : vector<80x128xf32>
    %15 = tpu.matmul %12, %14, %cst_19 {dimension_numbers = #tpu.dot_dimension_numbers<[1], [0], [0], [1], [0, 0, 1, 1], [], []>} : vector<80x128xbf16>, vector<128x128xbf16>, vector<80x128xf32> -> vector<80x128xf32>
    %16 = arith.addf %10, %15 : vector<80x128xf32>
    %c2_20 = arith.constant 2 : index
    %c0_21 = arith.constant 0 : index
    %c0_22 = arith.constant 0 : index
    %c0_23 = arith.constant 0 : index
    %17 = vector.load %arg1[%c2_20, %c0_21, %c0_22, %c0_23] : memref<4x1x100x128xbf16, #tpu.memory_space<vmem>>, vector<1x1x80x128xbf16>
    %18 = vector.shape_cast %17 : vector<1x1x80x128xbf16> to vector<80x128xbf16>
    %c3 = arith.constant 3 : index
    %c0_24 = arith.constant 0 : index
    %c0_25 = arith.constant 0 : index
    %19 = vector.load %arg2[%c3, %c0_24, %c0_25] : memref<9x128x128xbf16, #tpu.memory_space<vmem>>, vector<1x128x128xbf16>
    %20 = vector.shape_cast %19 : vector<1x128x128xbf16> to vector<128x128xbf16>
    %cst_26 = arith.constant dense<0.000000e+00> : vector<80x128xf32>
    %21 = tpu.matmul %18, %20, %cst_26 {dimension_numbers = #tpu.dot_dimension_numbers<[1], [0], [0], [1], [0, 0, 1, 1], [], []>} : vector<80x128xbf16>, vector<128x128xbf16>, vector<80x128xf32> -> vector<80x128xf32>
    %22 = arith.addf %16, %21 : vector<80x128xf32>
    %c3_27 = arith.constant 3 : index
    %c0_28 = arith.constant 0 : index
    %c0_29 = arith.constant 0 : index
    %c0_30 = arith.constant 0 : index
    %23 = vector.load %arg1[%c3_27, %c0_28, %c0_29, %c0_30] : memref<4x1x100x128xbf16, #tpu.memory_space<vmem>>, vector<1x1x80x128xbf16>
    %24 = vector.shape_cast %23 : vector<1x1x80x128xbf16> to vector<80x128xbf16>
    %c4 = arith.constant 4 : index
    %c0_31 = arith.constant 0 : index
    %c0_32 = arith.constant 0 : index
    %25 = vector.load %arg2[%c4, %c0_31, %c0_32] : memref<9x128x128xbf16, #tpu.memory_space<vmem>>, vector<1x128x128xbf16>
    %26 = vector.shape_cast %25 : vector<1x128x128xbf16> to vector<128x128xbf16>
    %cst_33 = arith.constant dense<0.000000e+00> : vector<80x128xf32>
    %27 = tpu.matmul %24, %26, %cst_33 {dimension_numbers = #tpu.dot_dimension_numbers<[1], [0], [0], [1], [0, 0, 1, 1], [], []>} : vector<80x128xbf16>, vector<128x128xbf16>, vector<80x128xf32> -> vector<80x128xf32>
    %28 = arith.addf %22, %27 : vector<80x128xf32>
    %c2_34 = arith.constant 2 : index
    %c0_35 = arith.constant 0 : index
    %c1_36 = arith.constant 1 : index
    %c0_37 = arith.constant 0 : index
    %29 = vector.load %arg1[%c2_34, %c0_35, %c1_36, %c0_37] : memref<4x1x100x128xbf16, #tpu.memory_space<vmem>>, vector<1x1x80x128xbf16>
    %30 = vector.shape_cast %29 : vector<1x1x80x128xbf16> to vector<80x128xbf16>
    %c5 = arith.constant 5 : index
    %c0_38 = arith.constant 0 : index
    %c0_39 = arith.constant 0 : index
    %31 = vector.load %arg2[%c5, %c0_38, %c0_39] : memref<9x128x128xbf16, #tpu.memory_space<vmem>>, vector<1x128x128xbf16>
    %32 = vector.shape_cast %31 : vector<1x128x128xbf16> to vector<128x128xbf16>
    %cst_40 = arith.constant dense<0.000000e+00> : vector<80x128xf32>
    %33 = tpu.matmul %30, %32, %cst_40 {dimension_numbers = #tpu.dot_dimension_numbers<[1], [0], [0], [1], [0, 0, 1, 1], [], []>} : vector<80x128xbf16>, vector<128x128xbf16>, vector<80x128xf32> -> vector<80x128xf32>
    %34 = arith.addf %28, %33 : vector<80x128xf32>
    %c0_41 = arith.constant 0 : index
    %c0_42 = arith.constant 0 : index
    %c10 = arith.constant 10 : index
    %c0_43 = arith.constant 0 : index
    %35 = vector.load %arg1[%c0_41, %c0_42, %c10, %c0_43] : memref<4x1x100x128xbf16, #tpu.memory_space<vmem>>, vector<1x1x80x128xbf16>
    %36 = vector.shape_cast %35 : vector<1x1x80x128xbf16> to vector<80x128xbf16>
    %c6 = arith.constant 6 : index
    %c0_44 = arith.constant 0 : index
    %c0_45 = arith.constant 0 : index
    %37 = vector.load %arg2[%c6, %c0_44, %c0_45] : memref<9x128x128xbf16, #tpu.memory_space<vmem>>, vector<1x128x128xbf16>
    %38 = vector.shape_cast %37 : vector<1x128x128xbf16> to vector<128x128xbf16>
    %cst_46 = arith.constant dense<0.000000e+00> : vector<80x128xf32>
    %39 = tpu.matmul %36, %38, %cst_46 {dimension_numbers = #tpu.dot_dimension_numbers<[1], [0], [0], [1], [0, 0, 1, 1], [], []>} : vector<80x128xbf16>, vector<128x128xbf16>, vector<80x128xf32> -> vector<80x128xf32>
    %40 = arith.addf %34, %39 : vector<80x128xf32>
    %c1_47 = arith.constant 1 : index
    %c0_48 = arith.constant 0 : index
    %c10_49 = arith.constant 10 : index
    %c0_50 = arith.constant 0 : index
    %41 = vector.load %arg1[%c1_47, %c0_48, %c10_49, %c0_50] : memref<4x1x100x128xbf16, #tpu.memory_space<vmem>>, vector<1x1x80x128xbf16>
    %42 = vector.shape_cast %41 : vector<1x1x80x128xbf16> to vector<80x128xbf16>
    %c7 = arith.constant 7 : index
    %c0_51 = arith.constant 0 : index
    %c0_52 = arith.constant 0 : index
    %43 = vector.load %arg2[%c7, %c0_51, %c0_52] : memref<9x128x128xbf16, #tpu.memory_space<vmem>>, vector<1x128x128xbf16>
    %44 = vector.shape_cast %43 : vector<1x128x128xbf16> to vector<128x128xbf16>
    %cst_53 = arith.constant dense<0.000000e+00> : vector<80x128xf32>
    %45 = tpu.matmul %42, %44, %cst_53 {dimension_numbers = #tpu.dot_dimension_numbers<[1], [0], [0], [1], [0, 0, 1, 1], [], []>} : vector<80x128xbf16>, vector<128x128xbf16>, vector<80x128xf32> -> vector<80x128xf32>
    %46 = arith.addf %40, %45 : vector<80x128xf32>
    %c0_54 = arith.constant 0 : index
    %c0_55 = arith.constant 0 : index
    %c11 = arith.constant 11 : index
    %c0_56 = arith.constant 0 : index
    %47 = vector.load %arg1[%c0_54, %c0_55, %c11, %c0_56] : memref<4x1x100x128xbf16, #tpu.memory_space<vmem>>, vector<1x1x80x128xbf16>
    %48 = vector.shape_cast %47 : vector<1x1x80x128xbf16> to vector<80x128xbf16>
    %c8 = arith.constant 8 : index
    %c0_57 = arith.constant 0 : index
    %c0_58 = arith.constant 0 : index
    %49 = vector.load %arg2[%c8, %c0_57, %c0_58] : memref<9x128x128xbf16, #tpu.memory_space<vmem>>, vector<1x128x128xbf16>
    %50 = vector.shape_cast %49 : vector<1x128x128xbf16> to vector<128x128xbf16>
    %cst_59 = arith.constant dense<0.000000e+00> : vector<80x128xf32>
    %51 = tpu.matmul %48, %50, %cst_59 {dimension_numbers = #tpu.dot_dimension_numbers<[1], [0], [0], [1], [0, 0, 1, 1], [], []>} : vector<80x128xbf16>, vector<128x128xbf16>, vector<80x128xf32> -> vector<80x128xf32>
    %52 = arith.addf %46, %51 : vector<80x128xf32>
    %c0_60 = arith.constant 0 : index
    %c0_61 = arith.constant 0 : index
    %c0_62 = arith.constant 0 : index
    %53 = vector.load %arg3[%c0_60, %c0_61, %c0_62] : memref<1x80x128xf32, #tpu.memory_space<vmem>>, vector<1x80x128xf32>
    %54 = vector.shape_cast %53 : vector<1x80x128xf32> to vector<80x128xf32>
    %55 = vector.shape_cast %52 : vector<80x128xf32> to vector<1x80x128xf32>
    tpu.vector_store %arg3[%c0_60, %c0_61, %c0_62], %55 {strides = array<i32>} : memref<1x80x128xf32, #tpu.memory_space<vmem>>, vector<1x80x128xf32>,
    %56 = tpu.iota {dimensions = array<i32: 0>} : vector<80x1xi32>
    %c10_i32 = arith.constant 10 : i32
    %c0_i32 = arith.constant 0 : i32
    %57 = arith.cmpi eq, %c10_i32, %c0_i32 : i32
    %c1_i32 = arith.constant 1 : i32
    %58 = arith.select %57, %c1_i32, %c10_i32 : i32
    %59 = vector.broadcast %58 : i32 to vector<80x1xi32>
    %60 = arith.remsi %56, %59 : vector<80x1xi32>
    %c0_i32_63 = arith.constant 0 : i32
    %61 = vector.broadcast %c0_i32_63 : i32 to vector<80x1xi32>
    %62 = arith.cmpi ne, %60, %61 : vector<80x1xi32>
    %c0_i32_64 = arith.constant 0 : i32
    %63 = vector.broadcast %c0_i32_64 : i32 to vector<80x1xi32>
    %64 = arith.cmpi slt, %60, %63 : vector<80x1xi32>
    %c0_i32_65 = arith.constant 0 : i32
    %65 = arith.cmpi slt, %58, %c0_i32_65 : i32
    %66 = vector.broadcast %65 : i1 to vector<80x1xi1>
    %67 = vector.broadcast %66 : vector<80x1xi1> to vector<80x1xi1>
    %68 = arith.xori %64, %67 : vector<80x1xi1>
    %69 = arith.andi %68, %62 : vector<80x1xi1>
    %70 = vector.broadcast %58 : i32 to vector<80x1xi32>
    %71 = arith.addi %60, %70 : vector<80x1xi32>
    %72 = arith.select %69, %71, %60 : vector<80x1xi1>, vector<80x1xi32>
    %c8_i32 = arith.constant 8 : i32
    %73 = vector.broadcast %c8_i32 : i32 to vector<80x1xi32>
    %74 = arith.cmpi slt, %72, %73 : vector<80x1xi32>
    %75 = arith.extui %74 : vector<80x1xi1> to vector<80x1xi32>
    %76 = arith.sitofp %75 : vector<80x1xi32> to vector<80x1xf32>
    %77 = vector.broadcast %76 : vector<80x1xf32> to vector<80x128xf32>
    %78 = arith.mulf %52, %77 : vector<80x128xf32>
    %cst_66 = arith.constant dense<0.000000e+00> : vector<128xf32>
    %79 = vector.multi_reduction <add>, %78, %cst_66 [0] : vector<80x128xf32> to vector<128xf32>
    %80 = vector.shape_cast %79 : vector<128xf32> to vector<1x128xf32>
    %c0_67 = arith.constant 0 : index
    %c0_68 = arith.constant 0 : index
    %c0_69 = arith.constant 0 : index
    %81 = vector.load %arg4[%c0_67, %c0_68, %c0_69] : memref<1x2x128xf32, #tpu.memory_space<vmem>>, vector<1x1x128xf32>
    %82 = vector.shape_cast %81 : vector<1x1x128xf32> to vector<1x128xf32>
    %83 = vector.shape_cast %80 : vector<1x128xf32> to vector<1x1x128xf32>
    tpu.vector_store %arg4[%c0_67, %c0_68, %c0_69], %83 {strides = array<i32>} : memref<1x2x128xf32, #tpu.memory_space<vmem>>, vector<1x1x128xf32>,
    %84 = arith.mulf %52, %52 : vector<80x128xf32>
    %85 = vector.broadcast %76 : vector<80x1xf32> to vector<80x128xf32>
    %86 = arith.mulf %84, %85 : vector<80x128xf32>
    %cst_70 = arith.constant dense<0.000000e+00> : vector<128xf32>
    %87 = vector.multi_reduction <add>, %86, %cst_70 [0] : vector<80x128xf32> to vector<128xf32>
    %88 = vector.shape_cast %87 : vector<128xf32> to vector<1x128xf32>
    %c0_71 = arith.constant 0 : index
    %c1_72 = arith.constant 1 : index
    %c0_73 = arith.constant 0 : index
    %89 = vector.load %arg4[%c0_71, %c1_72, %c0_73] : memref<1x2x128xf32, #tpu.memory_space<vmem>>, vector<1x1x128xf32>
    %90 = vector.shape_cast %89 : vector<1x1x128xf32> to vector<1x128xf32>
    %91 = vector.shape_cast %88 : vector<1x128xf32> to vector<1x1x128xf32>
    tpu.vector_store %arg4[%c0_71, %c1_72, %c0_73], %91 {strides = array<i32>} : memref<1x2x128xf32, #tpu.memory_space<vmem>>, vector<1x1x128xf32>,
    return
  }
  func.func @transform_0(%arg0: i32) -> (i32, i32, i32, i32) {
    %c0_i32 = arith.constant 0 : i32
    %c0_i32_0 = arith.constant 0 : i32
    %c0_i32_1 = arith.constant 0 : i32
    %c0_i32_2 = arith.constant 0 : i32
    return %c0_i32, %arg0, %c0_i32_0, %c0_i32_1 : i32, i32, i32, i32
  }
  func.func @transform_1(%arg0: i32) -> (i32, i32, i32) {
    %c0_i32 = arith.constant 0 : i32
    %c0_i32_0 = arith.constant 0 : i32
    %c0_i32_1 = arith.constant 0 : i32
    %c0_i32_2 = arith.constant 0 : i32
    return %c0_i32, %c0_i32_0, %c0_i32_1 : i32, i32, i32
  }
  func.func @transform_2(%arg0: i32) -> (i32, i32, i32) {
    %c0_i32 = arith.constant 0 : i32
    %c0_i32_0 = arith.constant 0 : i32
    %c0_i32_1 = arith.constant 0 : i32
    return %arg0, %c0_i32, %c0_i32_0 : i32, i32, i32
  }
  func.func @transform_3(%arg0: i32) -> (i32, i32, i32) {
    %c0_i32 = arith.constant 0 : i32
    %c0_i32_0 = arith.constant 0 : i32
    %c0_i32_1 = arith.constant 0 : i32
    return %arg0, %c0_i32, %c0_i32_0 : i32, i32, i32
  }
}

module attributes {stable_mosaic.version = 11 : i64} {
  func.func @_bn_relu_kernel(%arg0: i32, %arg1: memref<160x128xf32, #tpu.memory_space<vmem>>, %arg2: memref<1x128xf32, #tpu.memory_space<vmem>>, %arg3: memref<1x128xf32, #tpu.memory_space<vmem>>, %arg4: memref<160x128xbf16, #tpu.memory_space<vmem>>) attributes {dimension_semantics = [#tpu.dimension_semantics<parallel>], iteration_bounds = array<i64: 1>, scalar_prefetch = 0 : i64, scratch_operands = 0 : i64, tpu.core_type = #tpu.core_type<tc>, window_params = [{transform_indices = @transform_0, window_bounds = array<i64: 160, 128>}, {pipeline_mode = #tpu.pipeline_mode<synchronous>, transform_indices = @transform_1, window_bounds = array<i64: 1, 128>}, {pipeline_mode = #tpu.pipeline_mode<synchronous>, transform_indices = @transform_2, window_bounds = array<i64: 1, 128>}, {transform_indices = @transform_3, window_bounds = array<i64: 160, 128>}]} {
    %c0 = arith.constant 0 : index
    %c0_0 = arith.constant 0 : index
    %0 = vector.load %arg1[%c0, %c0_0] : memref<160x128xf32, #tpu.memory_space<vmem>>, vector<160x128xf32>
    %c0_1 = arith.constant 0 : index
    %c0_2 = arith.constant 0 : index
    %1 = vector.load %arg2[%c0_1, %c0_2] : memref<1x128xf32, #tpu.memory_space<vmem>>, vector<1x128xf32>
    %2 = vector.broadcast %1 : vector<1x128xf32> to vector<160x128xf32>
    %3 = arith.mulf %0, %2 : vector<160x128xf32>
    %c0_3 = arith.constant 0 : index
    %c0_4 = arith.constant 0 : index
    %4 = vector.load %arg3[%c0_3, %c0_4] : memref<1x128xf32, #tpu.memory_space<vmem>>, vector<1x128xf32>
    %5 = vector.broadcast %4 : vector<1x128xf32> to vector<160x128xf32>
    %6 = arith.addf %3, %5 : vector<160x128xf32>
    %cst = arith.constant 0.000000e+00 : f32
    %7 = vector.broadcast %cst : f32 to vector<160x128xf32>
    %8 = arith.maximumf %6, %7 : vector<160x128xf32>
    %9 = arith.truncf %8 : vector<160x128xf32> to vector<160x128xbf16>
    %c0_5 = arith.constant 0 : index
    %c0_6 = arith.constant 0 : index
    %10 = vector.load %arg4[%c0_5, %c0_6] : memref<160x128xbf16, #tpu.memory_space<vmem>>, vector<160x128xbf16>
    tpu.vector_store %arg4[%c0_5, %c0_6], %9 {strides = array<i32>} : memref<160x128xbf16, #tpu.memory_space<vmem>>, vector<160x128xbf16>,
    return
  }
  func.func @transform_0(%arg0: i32) -> (i32, i32) {
    %c0_i32 = arith.constant 0 : i32
    %c0_i32_0 = arith.constant 0 : i32
    return %arg0, %c0_i32 : i32, i32
  }
  func.func @transform_1(%arg0: i32) -> (i32, i32) {
    %c0_i32 = arith.constant 0 : i32
    %c0_i32_0 = arith.constant 0 : i32
    %c0_i32_1 = arith.constant 0 : i32
    return %c0_i32, %c0_i32_0 : i32, i32
  }
  func.func @transform_2(%arg0: i32) -> (i32, i32) {
    %c0_i32 = arith.constant 0 : i32
    %c0_i32_0 = arith.constant 0 : i32
    %c0_i32_1 = arith.constant 0 : i32
    return %c0_i32, %c0_i32_0 : i32, i32
  }
  func.func @transform_3(%arg0: i32) -> (i32, i32) {
    %c0_i32 = arith.constant 0 : i32
    %c0_i32_0 = arith.constant 0 : i32
    return %arg0, %c0_i32 : i32, i32
  }
}

module attributes {stable_mosaic.version = 11 : i64} {
  func.func @kernel(%arg0: i32, %arg1: memref<1x1x110x128xbf16, #tpu.memory_space<vmem>>, %arg2: memref<9x128x128xbf16, #tpu.memory_space<vmem>>, %arg3: memref<1x80x128xf32, #tpu.memory_space<vmem>>, %arg4: memref<1x2x128xf32, #tpu.memory_space<vmem>>) attributes {dimension_semantics = [#tpu.dimension_semantics<parallel>], iteration_bounds = array<i64: 2>, scalar_prefetch = 0 : i64, scratch_operands = 0 : i64, tpu.core_type = #tpu.core_type<tc>, window_params = [{transform_indices = @transform_0, window_bounds = array<i64: 1, 1, 110, 128>}, {pipeline_mode = #tpu.pipeline_mode<synchronous>, transform_indices = @transform_1, window_bounds = array<i64: 9, 128, 128>}, {transform_indices = @transform_2, window_bounds = array<i64: 1, 80, 128>}, {transform_indices = @transform_3, window_bounds = array<i64: 1, 2, 128>}]} {
    %c0 = arith.constant 0 : index
    %c0_0 = arith.constant 0 : index
    %c0_1 = arith.constant 0 : index
    %c0_2 = arith.constant 0 : index
    %0 = vector.load %arg1[%c0, %c0_0, %c0_1, %c0_2] : memref<1x1x110x128xbf16, #tpu.memory_space<vmem>>, vector<1x1x80x128xbf16>
    %1 = vector.shape_cast %0 : vector<1x1x80x128xbf16> to vector<80x128xbf16>
    %c0_3 = arith.constant 0 : index
    %c0_4 = arith.constant 0 : index
    %c0_5 = arith.constant 0 : index
    %2 = vector.load %arg2[%c0_3, %c0_4, %c0_5] : memref<9x128x128xbf16, #tpu.memory_space<vmem>>, vector<1x128x128xbf16>
    %3 = vector.shape_cast %2 : vector<1x128x128xbf16> to vector<128x128xbf16>
    %cst = arith.constant dense<0.000000e+00> : vector<80x128xf32>
    %4 = tpu.matmul %1, %3, %cst {dimension_numbers = #tpu.dot_dimension_numbers<[1], [0], [0], [1], [0, 0, 1, 1], [], []>} : vector<80x128xbf16>, vector<128x128xbf16>, vector<80x128xf32> -> vector<80x128xf32>
    %c0_6 = arith.constant 0 : index
    %c0_7 = arith.constant 0 : index
    %c1 = arith.constant 1 : index
    %c0_8 = arith.constant 0 : index
    %5 = vector.load %arg1[%c0_6, %c0_7, %c1, %c0_8] : memref<1x1x110x128xbf16, #tpu.memory_space<vmem>>, vector<1x1x80x128xbf16>
    %6 = vector.shape_cast %5 : vector<1x1x80x128xbf16> to vector<80x128xbf16>
    %c1_9 = arith.constant 1 : index
    %c0_10 = arith.constant 0 : index
    %c0_11 = arith.constant 0 : index
    %7 = vector.load %arg2[%c1_9, %c0_10, %c0_11] : memref<9x128x128xbf16, #tpu.memory_space<vmem>>, vector<1x128x128xbf16>
    %8 = vector.shape_cast %7 : vector<1x128x128xbf16> to vector<128x128xbf16>
    %cst_12 = arith.constant dense<0.000000e+00> : vector<80x128xf32>
    %9 = tpu.matmul %6, %8, %cst_12 {dimension_numbers = #tpu.dot_dimension_numbers<[1], [0], [0], [1], [0, 0, 1, 1], [], []>} : vector<80x128xbf16>, vector<128x128xbf16>, vector<80x128xf32> -> vector<80x128xf32>
    %10 = arith.addf %4, %9 : vector<80x128xf32>
    %c0_13 = arith.constant 0 : index
    %c0_14 = arith.constant 0 : index
    %c2 = arith.constant 2 : index
    %c0_15 = arith.constant 0 : index
    %11 = vector.load %arg1[%c0_13, %c0_14, %c2, %c0_15] : memref<1x1x110x128xbf16, #tpu.memory_space<vmem>>, vector<1x1x80x128xbf16>
    %12 = vector.shape_cast %11 : vector<1x1x80x128xbf16> to vector<80x128xbf16>
    %c2_16 = arith.constant 2 : index
    %c0_17 = arith.constant 0 : index
    %c0_18 = arith.constant 0 : index
    %13 = vector.load %arg2[%c2_16, %c0_17, %c0_18] : memref<9x128x128xbf16, #tpu.memory_space<vmem>>, vector<1x128x128xbf16>
    %14 = vector.shape_cast %13 : vector<1x128x128xbf16> to vector<128x128xbf16>
    %cst_19 = arith.constant dense<0.000000e+00> : vector<80x128xf32>
    %15 = tpu.matmul %12, %14, %cst_19 {dimension_numbers = #tpu.dot_dimension_numbers<[1], [0], [0], [1], [0, 0, 1, 1], [], []>} : vector<80x128xbf16>, vector<128x128xbf16>, vector<80x128xf32> -> vector<80x128xf32>
    %16 = arith.addf %10, %15 : vector<80x128xf32>
    %c0_20 = arith.constant 0 : index
    %c0_21 = arith.constant 0 : index
    %c10 = arith.constant 10 : index
    %c0_22 = arith.constant 0 : index
    %17 = vector.load %arg1[%c0_20, %c0_21, %c10, %c0_22] : memref<1x1x110x128xbf16, #tpu.memory_space<vmem>>, vector<1x1x80x128xbf16>
    %18 = vector.shape_cast %17 : vector<1x1x80x128xbf16> to vector<80x128xbf16>
    %c3 = arith.constant 3 : index
    %c0_23 = arith.constant 0 : index
    %c0_24 = arith.constant 0 : index
    %19 = vector.load %arg2[%c3, %c0_23, %c0_24] : memref<9x128x128xbf16, #tpu.memory_space<vmem>>, vector<1x128x128xbf16>
    %20 = vector.shape_cast %19 : vector<1x128x128xbf16> to vector<128x128xbf16>
    %cst_25 = arith.constant dense<0.000000e+00> : vector<80x128xf32>
    %21 = tpu.matmul %18, %20, %cst_25 {dimension_numbers = #tpu.dot_dimension_numbers<[1], [0], [0], [1], [0, 0, 1, 1], [], []>} : vector<80x128xbf16>, vector<128x128xbf16>, vector<80x128xf32> -> vector<80x128xf32>
    %22 = arith.addf %16, %21 : vector<80x128xf32>
    %c0_26 = arith.constant 0 : index
    %c0_27 = arith.constant 0 : index
    %c11 = arith.constant 11 : index
    %c0_28 = arith.constant 0 : index
    %23 = vector.load %arg1[%c0_26, %c0_27, %c11, %c0_28] : memref<1x1x110x128xbf16, #tpu.memory_space<vmem>>, vector<1x1x80x128xbf16>
    %24 = vector.shape_cast %23 : vector<1x1x80x128xbf16> to vector<80x128xbf16>
    %c4 = arith.constant 4 : index
    %c0_29 = arith.constant 0 : index
    %c0_30 = arith.constant 0 : index
    %25 = vector.load %arg2[%c4, %c0_29, %c0_30] : memref<9x128x128xbf16, #tpu.memory_space<vmem>>, vector<1x128x128xbf16>
    %26 = vector.shape_cast %25 : vector<1x128x128xbf16> to vector<128x128xbf16>
    %cst_31 = arith.constant dense<0.000000e+00> : vector<80x128xf32>
    %27 = tpu.matmul %24, %26, %cst_31 {dimension_numbers = #tpu.dot_dimension_numbers<[1], [0], [0], [1], [0, 0, 1, 1], [], []>} : vector<80x128xbf16>, vector<128x128xbf16>, vector<80x128xf32> -> vector<80x128xf32>
    %28 = arith.addf %22, %27 : vector<80x128xf32>
    %c0_32 = arith.constant 0 : index
    %c0_33 = arith.constant 0 : index
    %c12 = arith.constant 12 : index
    %c0_34 = arith.constant 0 : index
    %29 = vector.load %arg1[%c0_32, %c0_33, %c12, %c0_34] : memref<1x1x110x128xbf16, #tpu.memory_space<vmem>>, vector<1x1x80x128xbf16>
    %30 = vector.shape_cast %29 : vector<1x1x80x128xbf16> to vector<80x128xbf16>
    %c5 = arith.constant 5 : index
    %c0_35 = arith.constant 0 : index
    %c0_36 = arith.constant 0 : index
    %31 = vector.load %arg2[%c5, %c0_35, %c0_36] : memref<9x128x128xbf16, #tpu.memory_space<vmem>>, vector<1x128x128xbf16>
    %32 = vector.shape_cast %31 : vector<1x128x128xbf16> to vector<128x128xbf16>
    %cst_37 = arith.constant dense<0.000000e+00> : vector<80x128xf32>
    %33 = tpu.matmul %30, %32, %cst_37 {dimension_numbers = #tpu.dot_dimension_numbers<[1], [0], [0], [1], [0, 0, 1, 1], [], []>} : vector<80x128xbf16>, vector<128x128xbf16>, vector<80x128xf32> -> vector<80x128xf32>
    %34 = arith.addf %28, %33 : vector<80x128xf32>
    %c0_38 = arith.constant 0 : index
    %c0_39 = arith.constant 0 : index
    %c20 = arith.constant 20 : index
    %c0_40 = arith.constant 0 : index
    %35 = vector.load %arg1[%c0_38, %c0_39, %c20, %c0_40] : memref<1x1x110x128xbf16, #tpu.memory_space<vmem>>, vector<1x1x80x128xbf16>
    %36 = vector.shape_cast %35 : vector<1x1x80x128xbf16> to vector<80x128xbf16>
    %c6 = arith.constant 6 : index
    %c0_41 = arith.constant 0 : index
    %c0_42 = arith.constant 0 : index
    %37 = vector.load %arg2[%c6, %c0_41, %c0_42] : memref<9x128x128xbf16, #tpu.memory_space<vmem>>, vector<1x128x128xbf16>
    %38 = vector.shape_cast %37 : vector<1x128x128xbf16> to vector<128x128xbf16>
    %cst_43 = arith.constant dense<0.000000e+00> : vector<80x128xf32>
    %39 = tpu.matmul %36, %38, %cst_43 {dimension_numbers = #tpu.dot_dimension_numbers<[1], [0], [0], [1], [0, 0, 1, 1], [], []>} : vector<80x128xbf16>, vector<128x128xbf16>, vector<80x128xf32> -> vector<80x128xf32>
    %40 = arith.addf %34, %39 : vector<80x128xf32>
    %c0_44 = arith.constant 0 : index
    %c0_45 = arith.constant 0 : index
    %c21 = arith.constant 21 : index
    %c0_46 = arith.constant 0 : index
    %41 = vector.load %arg1[%c0_44, %c0_45, %c21, %c0_46] : memref<1x1x110x128xbf16, #tpu.memory_space<vmem>>, vector<1x1x80x128xbf16>
    %42 = vector.shape_cast %41 : vector<1x1x80x128xbf16> to vector<80x128xbf16>
    %c7 = arith.constant 7 : index
    %c0_47 = arith.constant 0 : index
    %c0_48 = arith.constant 0 : index
    %43 = vector.load %arg2[%c7, %c0_47, %c0_48] : memref<9x128x128xbf16, #tpu.memory_space<vmem>>, vector<1x128x128xbf16>
    %44 = vector.shape_cast %43 : vector<1x128x128xbf16> to vector<128x128xbf16>
    %cst_49 = arith.constant dense<0.000000e+00> : vector<80x128xf32>
    %45 = tpu.matmul %42, %44, %cst_49 {dimension_numbers = #tpu.dot_dimension_numbers<[1], [0], [0], [1], [0, 0, 1, 1], [], []>} : vector<80x128xbf16>, vector<128x128xbf16>, vector<80x128xf32> -> vector<80x128xf32>
    %46 = arith.addf %40, %45 : vector<80x128xf32>
    %c0_50 = arith.constant 0 : index
    %c0_51 = arith.constant 0 : index
    %c22 = arith.constant 22 : index
    %c0_52 = arith.constant 0 : index
    %47 = vector.load %arg1[%c0_50, %c0_51, %c22, %c0_52] : memref<1x1x110x128xbf16, #tpu.memory_space<vmem>>, vector<1x1x80x128xbf16>
    %48 = vector.shape_cast %47 : vector<1x1x80x128xbf16> to vector<80x128xbf16>
    %c8 = arith.constant 8 : index
    %c0_53 = arith.constant 0 : index
    %c0_54 = arith.constant 0 : index
    %49 = vector.load %arg2[%c8, %c0_53, %c0_54] : memref<9x128x128xbf16, #tpu.memory_space<vmem>>, vector<1x128x128xbf16>
    %50 = vector.shape_cast %49 : vector<1x128x128xbf16> to vector<128x128xbf16>
    %cst_55 = arith.constant dense<0.000000e+00> : vector<80x128xf32>
    %51 = tpu.matmul %48, %50, %cst_55 {dimension_numbers = #tpu.dot_dimension_numbers<[1], [0], [0], [1], [0, 0, 1, 1], [], []>} : vector<80x128xbf16>, vector<128x128xbf16>, vector<80x128xf32> -> vector<80x128xf32>
    %52 = arith.addf %46, %51 : vector<80x128xf32>
    %c0_56 = arith.constant 0 : index
    %c0_57 = arith.constant 0 : index
    %c0_58 = arith.constant 0 : index
    %53 = vector.load %arg3[%c0_56, %c0_57, %c0_58] : memref<1x80x128xf32, #tpu.memory_space<vmem>>, vector<1x80x128xf32>
    %54 = vector.shape_cast %53 : vector<1x80x128xf32> to vector<80x128xf32>
    %55 = vector.shape_cast %52 : vector<80x128xf32> to vector<1x80x128xf32>
    tpu.vector_store %arg3[%c0_56, %c0_57, %c0_58], %55 {strides = array<i32>} : memref<1x80x128xf32, #tpu.memory_space<vmem>>, vector<1x80x128xf32>,
    %56 = tpu.iota {dimensions = array<i32: 0>} : vector<80x1xi32>
    %c10_i32 = arith.constant 10 : i32
    %c0_i32 = arith.constant 0 : i32
    %57 = arith.cmpi eq, %c10_i32, %c0_i32 : i32
    %c1_i32 = arith.constant 1 : i32
    %58 = arith.select %57, %c1_i32, %c10_i32 : i32
    %59 = vector.broadcast %58 : i32 to vector<80x1xi32>
    %60 = arith.remsi %56, %59 : vector<80x1xi32>
    %c0_i32_59 = arith.constant 0 : i32
    %61 = vector.broadcast %c0_i32_59 : i32 to vector<80x1xi32>
    %62 = arith.cmpi ne, %60, %61 : vector<80x1xi32>
    %c0_i32_60 = arith.constant 0 : i32
    %63 = vector.broadcast %c0_i32_60 : i32 to vector<80x1xi32>
    %64 = arith.cmpi slt, %60, %63 : vector<80x1xi32>
    %c0_i32_61 = arith.constant 0 : i32
    %65 = arith.cmpi slt, %58, %c0_i32_61 : i32
    %66 = vector.broadcast %65 : i1 to vector<80x1xi1>
    %67 = vector.broadcast %66 : vector<80x1xi1> to vector<80x1xi1>
    %68 = arith.xori %64, %67 : vector<80x1xi1>
    %69 = arith.andi %68, %62 : vector<80x1xi1>
    %70 = vector.broadcast %58 : i32 to vector<80x1xi32>
    %71 = arith.addi %60, %70 : vector<80x1xi32>
    %72 = arith.select %69, %71, %60 : vector<80x1xi1>, vector<80x1xi32>
    %c8_i32 = arith.constant 8 : i32
    %73 = vector.broadcast %c8_i32 : i32 to vector<80x1xi32>
    %74 = arith.cmpi slt, %72, %73 : vector<80x1xi32>
    %75 = arith.extui %74 : vector<80x1xi1> to vector<80x1xi32>
    %76 = arith.sitofp %75 : vector<80x1xi32> to vector<80x1xf32>
    %77 = vector.broadcast %76 : vector<80x1xf32> to vector<80x128xf32>
    %78 = arith.mulf %52, %77 : vector<80x128xf32>
    %cst_62 = arith.constant dense<0.000000e+00> : vector<128xf32>
    %79 = vector.multi_reduction <add>, %78, %cst_62 [0] : vector<80x128xf32> to vector<128xf32>
    %80 = vector.shape_cast %79 : vector<128xf32> to vector<1x128xf32>
    %c0_63 = arith.constant 0 : index
    %c0_64 = arith.constant 0 : index
    %c0_65 = arith.constant 0 : index
    %81 = vector.load %arg4[%c0_63, %c0_64, %c0_65] : memref<1x2x128xf32, #tpu.memory_space<vmem>>, vector<1x1x128xf32>
    %82 = vector.shape_cast %81 : vector<1x1x128xf32> to vector<1x128xf32>
    %83 = vector.shape_cast %80 : vector<1x128xf32> to vector<1x1x128xf32>
    tpu.vector_store %arg4[%c0_63, %c0_64, %c0_65], %83 {strides = array<i32>} : memref<1x2x128xf32, #tpu.memory_space<vmem>>, vector<1x1x128xf32>,
    %84 = arith.mulf %52, %52 : vector<80x128xf32>
    %85 = vector.broadcast %76 : vector<80x1xf32> to vector<80x128xf32>
    %86 = arith.mulf %84, %85 : vector<80x128xf32>
    %cst_66 = arith.constant dense<0.000000e+00> : vector<128xf32>
    %87 = vector.multi_reduction <add>, %86, %cst_66 [0] : vector<80x128xf32> to vector<128xf32>
    %88 = vector.shape_cast %87 : vector<128xf32> to vector<1x128xf32>
    %c0_67 = arith.constant 0 : index
    %c1_68 = arith.constant 1 : index
    %c0_69 = arith.constant 0 : index
    %89 = vector.load %arg4[%c0_67, %c1_68, %c0_69] : memref<1x2x128xf32, #tpu.memory_space<vmem>>, vector<1x1x128xf32>
    %90 = vector.shape_cast %89 : vector<1x1x128xf32> to vector<1x128xf32>
    %91 = vector.shape_cast %88 : vector<1x128xf32> to vector<1x1x128xf32>
    tpu.vector_store %arg4[%c0_67, %c1_68, %c0_69], %91 {strides = array<i32>} : memref<1x2x128xf32, #tpu.memory_space<vmem>>, vector<1x1x128xf32>,
    return
  }
  func.func @transform_0(%arg0: i32) -> (i32, i32, i32, i32) {
    %c0_i32 = arith.constant 0 : i32
    %c0_i32_0 = arith.constant 0 : i32
    %c0_i32_1 = arith.constant 0 : i32
    %c0_i32_2 = arith.constant 0 : i32
    return %c0_i32, %arg0, %c0_i32_0, %c0_i32_1 : i32, i32, i32, i32
  }
  func.func @transform_1(%arg0: i32) -> (i32, i32, i32) {
    %c0_i32 = arith.constant 0 : i32
    %c0_i32_0 = arith.constant 0 : i32
    %c0_i32_1 = arith.constant 0 : i32
    %c0_i32_2 = arith.constant 0 : i32
    return %c0_i32, %c0_i32_0, %c0_i32_1 : i32, i32, i32
  }
  func.func @transform_2(%arg0: i32) -> (i32, i32, i32) {
    %c0_i32 = arith.constant 0 : i32
    %c0_i32_0 = arith.constant 0 : i32
    %c0_i32_1 = arith.constant 0 : i32
    return %arg0, %c0_i32, %c0_i32_0 : i32, i32, i32
  }
  func.func @transform_3(%arg0: i32) -> (i32, i32, i32) {
    %c0_i32 = arith.constant 0 : i32
    %c0_i32_0 = arith.constant 0 : i32
    %c0_i32_1 = arith.constant 0 : i32
    return %arg0, %c0_i32, %c0_i32_0 : i32, i32, i32
  }
}

module attributes {stable_mosaic.version = 11 : i64} {
  func.func @kernel(%arg0: i32, %arg1: memref<4x1x100x128xbf16, #tpu.memory_space<vmem>>, %arg2: memref<1x128x128xbf16, #tpu.memory_space<vmem>>, %arg3: memref<1x80x128xf32, #tpu.memory_space<vmem>>, %arg4: memref<1x2x128xf32, #tpu.memory_space<vmem>>) attributes {dimension_semantics = [#tpu.dimension_semantics<parallel>], iteration_bounds = array<i64: 2>, scalar_prefetch = 0 : i64, scratch_operands = 0 : i64, tpu.core_type = #tpu.core_type<tc>, window_params = [{transform_indices = @transform_0, window_bounds = array<i64: 4, 1, 100, 128>}, {pipeline_mode = #tpu.pipeline_mode<synchronous>, transform_indices = @transform_1, window_bounds = array<i64: 1, 128, 128>}, {transform_indices = @transform_2, window_bounds = array<i64: 1, 80, 128>}, {transform_indices = @transform_3, window_bounds = array<i64: 1, 2, 128>}]} {
    %c3 = arith.constant 3 : index
    %c0 = arith.constant 0 : index
    %c0_0 = arith.constant 0 : index
    %c0_1 = arith.constant 0 : index
    %0 = vector.load %arg1[%c3, %c0, %c0_0, %c0_1] : memref<4x1x100x128xbf16, #tpu.memory_space<vmem>>, vector<1x1x80x128xbf16>
    %1 = vector.shape_cast %0 : vector<1x1x80x128xbf16> to vector<80x128xbf16>
    %c0_2 = arith.constant 0 : index
    %c0_3 = arith.constant 0 : index
    %c0_4 = arith.constant 0 : index
    %2 = vector.load %arg2[%c0_2, %c0_3, %c0_4] : memref<1x128x128xbf16, #tpu.memory_space<vmem>>, vector<1x128x128xbf16>
    %3 = vector.shape_cast %2 : vector<1x128x128xbf16> to vector<128x128xbf16>
    %cst = arith.constant dense<0.000000e+00> : vector<80x128xf32>
    %4 = tpu.matmul %1, %3, %cst {dimension_numbers = #tpu.dot_dimension_numbers<[1], [0], [0], [1], [0, 0, 1, 1], [], []>} : vector<80x128xbf16>, vector<128x128xbf16>, vector<80x128xf32> -> vector<80x128xf32>
    %c0_5 = arith.constant 0 : index
    %c0_6 = arith.constant 0 : index
    %c0_7 = arith.constant 0 : index
    %5 = vector.load %arg3[%c0_5, %c0_6, %c0_7] : memref<1x80x128xf32, #tpu.memory_space<vmem>>, vector<1x80x128xf32>
    %6 = vector.shape_cast %5 : vector<1x80x128xf32> to vector<80x128xf32>
    %7 = vector.shape_cast %4 : vector<80x128xf32> to vector<1x80x128xf32>
    tpu.vector_store %arg3[%c0_5, %c0_6, %c0_7], %7 {strides = array<i32>} : memref<1x80x128xf32, #tpu.memory_space<vmem>>, vector<1x80x128xf32>,
    %8 = tpu.iota {dimensions = array<i32: 0>} : vector<80x1xi32>
    %c10_i32 = arith.constant 10 : i32
    %c0_i32 = arith.constant 0 : i32
    %9 = arith.cmpi eq, %c10_i32, %c0_i32 : i32
    %c1_i32 = arith.constant 1 : i32
    %10 = arith.select %9, %c1_i32, %c10_i32 : i32
    %11 = vector.broadcast %10 : i32 to vector<80x1xi32>
    %12 = arith.remsi %8, %11 : vector<80x1xi32>
    %c0_i32_8 = arith.constant 0 : i32
    %13 = vector.broadcast %c0_i32_8 : i32 to vector<80x1xi32>
    %14 = arith.cmpi ne, %12, %13 : vector<80x1xi32>
    %c0_i32_9 = arith.constant 0 : i32
    %15 = vector.broadcast %c0_i32_9 : i32 to vector<80x1xi32>
    %16 = arith.cmpi slt, %12, %15 : vector<80x1xi32>
    %c0_i32_10 = arith.constant 0 : i32
    %17 = arith.cmpi slt, %10, %c0_i32_10 : i32
    %18 = vector.broadcast %17 : i1 to vector<80x1xi1>
    %19 = vector.broadcast %18 : vector<80x1xi1> to vector<80x1xi1>
    %20 = arith.xori %16, %19 : vector<80x1xi1>
    %21 = arith.andi %20, %14 : vector<80x1xi1>
    %22 = vector.broadcast %10 : i32 to vector<80x1xi32>
    %23 = arith.addi %12, %22 : vector<80x1xi32>
    %24 = arith.select %21, %23, %12 : vector<80x1xi1>, vector<80x1xi32>
    %c8_i32 = arith.constant 8 : i32
    %25 = vector.broadcast %c8_i32 : i32 to vector<80x1xi32>
    %26 = arith.cmpi slt, %24, %25 : vector<80x1xi32>
    %27 = arith.extui %26 : vector<80x1xi1> to vector<80x1xi32>
    %28 = arith.sitofp %27 : vector<80x1xi32> to vector<80x1xf32>
    %29 = vector.broadcast %28 : vector<80x1xf32> to vector<80x128xf32>
    %30 = arith.mulf %4, %29 : vector<80x128xf32>
    %cst_11 = arith.constant dense<0.000000e+00> : vector<128xf32>
    %31 = vector.multi_reduction <add>, %30, %cst_11 [0] : vector<80x128xf32> to vector<128xf32>
    %32 = vector.shape_cast %31 : vector<128xf32> to vector<1x128xf32>
    %c0_12 = arith.constant 0 : index
    %c0_13 = arith.constant 0 : index
    %c0_14 = arith.constant 0 : index
    %33 = vector.load %arg4[%c0_12, %c0_13, %c0_14] : memref<1x2x128xf32, #tpu.memory_space<vmem>>, vector<1x1x128xf32>
    %34 = vector.shape_cast %33 : vector<1x1x128xf32> to vector<1x128xf32>
    %35 = vector.shape_cast %32 : vector<1x128xf32> to vector<1x1x128xf32>
    tpu.vector_store %arg4[%c0_12, %c0_13, %c0_14], %35 {strides = array<i32>} : memref<1x2x128xf32, #tpu.memory_space<vmem>>, vector<1x1x128xf32>,
    %36 = arith.mulf %4, %4 : vector<80x128xf32>
    %37 = vector.broadcast %28 : vector<80x1xf32> to vector<80x128xf32>
    %38 = arith.mulf %36, %37 : vector<80x128xf32>
    %cst_15 = arith.constant dense<0.000000e+00> : vector<128xf32>
    %39 = vector.multi_reduction <add>, %38, %cst_15 [0] : vector<80x128xf32> to vector<128xf32>
    %40 = vector.shape_cast %39 : vector<128xf32> to vector<1x128xf32>
    %c0_16 = arith.constant 0 : index
    %c1 = arith.constant 1 : index
    %c0_17 = arith.constant 0 : index
    %41 = vector.load %arg4[%c0_16, %c1, %c0_17] : memref<1x2x128xf32, #tpu.memory_space<vmem>>, vector<1x1x128xf32>
    %42 = vector.shape_cast %41 : vector<1x1x128xf32> to vector<1x128xf32>
    %43 = vector.shape_cast %40 : vector<1x128xf32> to vector<1x1x128xf32>
    tpu.vector_store %arg4[%c0_16, %c1, %c0_17], %43 {strides = array<i32>} : memref<1x2x128xf32, #tpu.memory_space<vmem>>, vector<1x1x128xf32>,
    return
  }
  func.func @transform_0(%arg0: i32) -> (i32, i32, i32, i32) {
    %c0_i32 = arith.constant 0 : i32
    %c0_i32_0 = arith.constant 0 : i32
    %c0_i32_1 = arith.constant 0 : i32
    %c0_i32_2 = arith.constant 0 : i32
    return %c0_i32, %arg0, %c0_i32_0, %c0_i32_1 : i32, i32, i32, i32
  }
  func.func @transform_1(%arg0: i32) -> (i32, i32, i32) {
    %c0_i32 = arith.constant 0 : i32
    %c0_i32_0 = arith.constant 0 : i32
    %c0_i32_1 = arith.constant 0 : i32
    %c0_i32_2 = arith.constant 0 : i32
    return %c0_i32, %c0_i32_0, %c0_i32_1 : i32, i32, i32
  }
  func.func @transform_2(%arg0: i32) -> (i32, i32, i32) {
    %c0_i32 = arith.constant 0 : i32
    %c0_i32_0 = arith.constant 0 : i32
    %c0_i32_1 = arith.constant 0 : i32
    return %arg0, %c0_i32, %c0_i32_0 : i32, i32, i32
  }
  func.func @transform_3(%arg0: i32) -> (i32, i32, i32) {
    %c0_i32 = arith.constant 0 : i32
    %c0_i32_0 = arith.constant 0 : i32
    %c0_i32_1 = arith.constant 0 : i32
    return %arg0, %c0_i32, %c0_i32_0 : i32, i32, i32
  }
}

module attributes {stable_mosaic.version = 11 : i64} {
  func.func @_bn_add_bn_relu_kernel(%arg0: i32, %arg1: memref<160x128xf32, #tpu.memory_space<vmem>>, %arg2: memref<160x128xf32, #tpu.memory_space<vmem>>, %arg3: memref<1x128xf32, #tpu.memory_space<vmem>>, %arg4: memref<1x128xf32, #tpu.memory_space<vmem>>, %arg5: memref<1x128xf32, #tpu.memory_space<vmem>>, %arg6: memref<1x128xf32, #tpu.memory_space<vmem>>, %arg7: memref<160x128xf32, #tpu.memory_space<vmem>>) attributes {dimension_semantics = [#tpu.dimension_semantics<parallel>], iteration_bounds = array<i64: 1>, scalar_prefetch = 0 : i64, scratch_operands = 0 : i64, tpu.core_type = #tpu.core_type<tc>, window_params = [{transform_indices = @transform_0, window_bounds = array<i64: 160, 128>}, {transform_indices = @transform_1, window_bounds = array<i64: 160, 128>}, {pipeline_mode = #tpu.pipeline_mode<synchronous>, transform_indices = @transform_2, window_bounds = array<i64: 1, 128>}, {pipeline_mode = #tpu.pipeline_mode<synchronous>, transform_indices = @transform_3, window_bounds = array<i64: 1, 128>}, {pipeline_mode = #tpu.pipeline_mode<synchronous>, transform_indices = @transform_4, window_bounds = array<i64: 1, 128>}, {pipeline_mode = #tpu.pipeline_mode<synchronous>, transform_indices = @transform_5, window_bounds = array<i64: 1, 128>}, {transform_indices = @transform_6, window_bounds = array<i64: 160, 128>}]} {
    %c0 = arith.constant 0 : index
    %c0_0 = arith.constant 0 : index
    %0 = vector.load %arg1[%c0, %c0_0] : memref<160x128xf32, #tpu.memory_space<vmem>>, vector<160x128xf32>
    %c0_1 = arith.constant 0 : index
    %c0_2 = arith.constant 0 : index
    %1 = vector.load %arg3[%c0_1, %c0_2] : memref<1x128xf32, #tpu.memory_space<vmem>>, vector<1x128xf32>
    %2 = vector.broadcast %1 : vector<1x128xf32> to vector<160x128xf32>
    %3 = arith.mulf %0, %2 : vector<160x128xf32>
    %c0_3 = arith.constant 0 : index
    %c0_4 = arith.constant 0 : index
    %4 = vector.load %arg4[%c0_3, %c0_4] : memref<1x128xf32, #tpu.memory_space<vmem>>, vector<1x128xf32>
    %5 = vector.broadcast %4 : vector<1x128xf32> to vector<160x128xf32>
    %6 = arith.addf %3, %5 : vector<160x128xf32>
    %c0_5 = arith.constant 0 : index
    %c0_6 = arith.constant 0 : index
    %7 = vector.load %arg2[%c0_5, %c0_6] : memref<160x128xf32, #tpu.memory_space<vmem>>, vector<160x128xf32>
    %c0_7 = arith.constant 0 : index
    %c0_8 = arith.constant 0 : index
    %8 = vector.load %arg5[%c0_7, %c0_8] : memref<1x128xf32, #tpu.memory_space<vmem>>, vector<1x128xf32>
    %9 = vector.broadcast %8 : vector<1x128xf32> to vector<160x128xf32>
    %10 = arith.mulf %7, %9 : vector<160x128xf32>
    %c0_9 = arith.constant 0 : index
    %c0_10 = arith.constant 0 : index
    %11 = vector.load %arg6[%c0_9, %c0_10] : memref<1x128xf32, #tpu.memory_space<vmem>>, vector<1x128xf32>
    %12 = vector.broadcast %11 : vector<1x128xf32> to vector<160x128xf32>
    %13 = arith.addf %10, %12 : vector<160x128xf32>
    %14 = arith.addf %6, %13 : vector<160x128xf32>
    %cst = arith.constant 0.000000e+00 : f32
    %15 = vector.broadcast %cst : f32 to vector<160x128xf32>
    %16 = arith.maximumf %14, %15 : vector<160x128xf32>
    %c0_11 = arith.constant 0 : index
    %c0_12 = arith.constant 0 : index
    %17 = vector.load %arg7[%c0_11, %c0_12] : memref<160x128xf32, #tpu.memory_space<vmem>>, vector<160x128xf32>
    tpu.vector_store %arg7[%c0_11, %c0_12], %16 {strides = array<i32>} : memref<160x128xf32, #tpu.memory_space<vmem>>, vector<160x128xf32>,
    return
  }
  func.func @transform_0(%arg0: i32) -> (i32, i32) {
    %c0_i32 = arith.constant 0 : i32
    %c0_i32_0 = arith.constant 0 : i32
    return %arg0, %c0_i32 : i32, i32
  }
  func.func @transform_1(%arg0: i32) -> (i32, i32) {
    %c0_i32 = arith.constant 0 : i32
    %c0_i32_0 = arith.constant 0 : i32
    return %arg0, %c0_i32 : i32, i32
  }
  func.func @transform_2(%arg0: i32) -> (i32, i32) {
    %c0_i32 = arith.constant 0 : i32
    %c0_i32_0 = arith.constant 0 : i32
    %c0_i32_1 = arith.constant 0 : i32
    return %c0_i32, %c0_i32_0 : i32, i32
  }
  func.func @transform_3(%arg0: i32) -> (i32, i32) {
    %c0_i32 = arith.constant 0 : i32
    %c0_i32_0 = arith.constant 0 : i32
    %c0_i32_1 = arith.constant 0 : i32
    return %c0_i32, %c0_i32_0 : i32, i32
  }
  func.func @transform_4(%arg0: i32) -> (i32, i32) {
    %c0_i32 = arith.constant 0 : i32
    %c0_i32_0 = arith.constant 0 : i32
    %c0_i32_1 = arith.constant 0 : i32
    return %c0_i32, %c0_i32_0 : i32, i32
  }
  func.func @transform_5(%arg0: i32) -> (i32, i32) {
    %c0_i32 = arith.constant 0 : i32
    %c0_i32_0 = arith.constant 0 : i32
    %c0_i32_1 = arith.constant 0 : i32
    return %c0_i32, %c0_i32_0 : i32, i32
  }
  func.func @transform_6(%arg0: i32) -> (i32, i32) {
    %c0_i32 = arith.constant 0 : i32
    %c0_i32_0 = arith.constant 0 : i32
    return %arg0, %c0_i32 : i32, i32
  }
}

</mosaic_0001>

<bundles_post_ra>
// kernel: _basic_block_impl.6
= control target key start
LH: loop header
LB: loop body
LE: loop exit
PB: predicated region body
PF: predicated region fallthrough
CT: control target
= control target key end

     0   :  { %s367_s0 = inlined_call_operand.vmem [shape: f32[160,128], index: 0, kind: input, shape index: {}]   ;;  %s368_s1 = inlined_call_operand.vmem [shape: f32[1,128], index: 1, kind: input, shape index: {}]   ;;  %s369_s2 = inlined_call_operand.vmem [shape: f32[1,128], index: 2, kind: input, shape index: {}]   ;;  %s370_s3 = inlined_call_operand.vmem [shape: bf16[160,128], index: 3, kind: output, shape index: {}]  }
   0x1   :  { %v14_v0 = vld [vmem:[%s367_s0] sm:$0xff]  ;;  %v15_v1 = vld [vmem:[%s367_s0 + $0x8] sm:$0xff]  ;;  %v16_v4 = vld [vmem:[%s367_s0 + $0x10] sm:$0xff] }
   0x2   :  { %v236_v2 = vld [vmem:[%s368_s1] ss:$0 sm:$0xff]  ;;  %v17_v5 = vld [vmem:[%s367_s0 + $0x18] sm:$0xff]  ;;  %v19_v11 = vld [vmem:[%s367_s0 + $0x28] sm:$0xff] }
   0x3   :  { %v241_v3 = vld [vmem:[%s369_s2] ss:$0 sm:$0xff]  ;;  %v38_v7 = vmul.f32 %v236_v2, %v14_v0  ;;  %v39_v8 = vmul.f32 %v236_v2, %v15_v1  ;;  %v40_v9 = vmul.f32 %v236_v2, %v16_v4  ;;  %v41_v10 = vmul.f32 %v236_v2, %v17_v5  ;;  %v20_v12 = vld [vmem:[%s367_s0 + $0x30] sm:$0xff]  ;;  %v21_v13 = vld [vmem:[%s367_s0 + $0x38] sm:$0xff] }
   0x4   :  { %v18_v6 = vld [vmem:[%s367_s0 + $0x20] sm:$0xff]  ;;  %v43_v15 = vmul.f32 %v236_v2, %v19_v11  ;;  %v44_v16 = vmul.f32 %v236_v2, %v20_v12  ;;  %v45_v17 = vmul.f32 %v236_v2, %v21_v13  ;;  %v23_v27 = vld [vmem:[%s367_s0 + $0x48] sm:$0xff]  ;;  %v24_v32 = vld [vmem:[%s367_s0 + $0x50] sm:$0xff] }
   0x5   :  { %v42_v14 = vmul.f32 %v236_v2, %v18_v6  ;;  %v62_v18 = vadd.f32 %v241_v3, %v38_v7  ;;  %v63_v19 = vadd.f32 %v241_v3, %v39_v8  ;;  %v64_v20 = vadd.f32 %v241_v3, %v40_v9  ;;  %v22_v26 = vld [vmem:[%s367_s0 + $0x40] sm:$0xff]  ;;  %v25_v33 = vld [vmem:[%s367_s0 + $0x58] sm:$0xff]  ;;  %v27_v39 = vld [vmem:[%s367_s0 + $0x68] sm:$0xff] }
   0x6   :  { %v65_v21 = vadd.f32 %v241_v3, %v41_v10  ;;  %v67_v23 = vadd.f32 %v241_v3, %v43_v15  ;;  %v68_v24 = vadd.f32 %v241_v3, %v44_v16  ;;  %v69_v25 = vadd.f32 %v241_v3, %v45_v17  ;;  %v26_v38 = vld [vmem:[%s367_s0 + $0x60] sm:$0xff]  ;;  %v28_v44 = vld [vmem:[%s367_s0 + $0x70] sm:$0xff]  ;;  %v29_v45 = vld [vmem:[%s367_s0 + $0x78] sm:$0xff] }
   0x7   :  { %v66_v22 = vadd.f32 %v241_v3, %v42_v14  ;;  %v82_v28 = vmax.f32 %v62_v18, 0.0  ;;  %v83_v29 = vmax.f32 %v63_v19, 0.0  ;;  %v84_v30 = vmax.f32 %v64_v20, 0.0  ;;  %v30_v58 = vld [vmem:[%s367_s0 + $0x80] sm:$0xff]  ;;  %v31_v63 = vld [vmem:[%s367_s0 + $0x88] sm:$0xff]  ;;  %v32_v6 = vld [vmem:[%s367_s0 + $0x90] sm:$0xff] }
   0x8   :  { %v85_v31 = vmax.f32 %v65_v21, 0.0  ;;  %v87_v35 = vmax.f32 %v67_v23, 0.0  ;;  %v88_v36 = vmax.f32 %v68_v24, 0.0  ;;  %v89_v37 = vmax.f32 %v69_v25, 0.0  ;;  %v33_v7 = vld [vmem:[%s367_s0 + $0x98] sm:$0xff] }
   0x9   :  { %v86_v34 = vmax.f32 %v66_v22, 0.0  ;;  %v149_v40 = vpack.c.bf16 %v83_v29, %v82_v28  ;;  %v46_v42 = vmul.f32 %v236_v2, %v22_v26  ;;  %v47_v43 = vmul.f32 %v236_v2, %v23_v27 }
   0xa   :  { %v154_v41 = vpack.c.bf16 %v85_v31, %v84_v30  ;;  %v164_v47 = vpack.c.bf16 %v89_v37, %v88_v36  ;;  %v48_v48 = vmul.f32 %v236_v2, %v24_v32  ;;  %v49_v49 = vmul.f32 %v236_v2, %v25_v33 }
   0xb   :  { %v159_v46 = vpack.c.bf16 %v87_v35, %v86_v34  ;;  %150 = vst [vmem:[%s370_s3] sm:$0xff] %v149_v40   ;;  %v70_v50 = vadd.f32 %v241_v3, %v46_v42  ;;  %v71_v51 = vadd.f32 %v241_v3, %v47_v43  ;;  %v50_v52 = vmul.f32 %v236_v2, %v26_v38 }
   0xc   :  { %v51_v53 = vmul.f32 %v236_v2, %v27_v39  ;;  %196 = vst [vmem:[%s370_s3 + $0x8] sm:$0xff] %v154_v41   ;;  %v72_v54 = vadd.f32 %v241_v3, %v48_v48  ;;  %v73_v55 = vadd.f32 %v241_v3, %v49_v49  ;;  %v52_v56 = vmul.f32 %v236_v2, %v28_v44 }
   0xd   :  { %v53_v57 = vmul.f32 %v236_v2, %v29_v45  ;;  %197 = vst [vmem:[%s370_s3 + $0x10] sm:$0xff] %v159_v46   ;;  %v90_v59 = vmax.f32 %v70_v50, 0.0  ;;  %v91_v60 = vmax.f32 %v71_v51, 0.0  ;;  %v74_v61 = vadd.f32 %v241_v3, %v50_v52 }
   0xe   :  { %v75_v62 = vadd.f32 %v241_v3, %v51_v53  ;;  %198 = vst [vmem:[%s370_s3 + $0x18] sm:$0xff] %v164_v47   ;;  %v92_v0 = vmax.f32 %v72_v54, 0.0  ;;  %v93_v1 = vmax.f32 %v73_v55, 0.0  ;;  %v76_v4 = vadd.f32 %v241_v3, %v52_v56 }
   0xf   :  { %v77_v5 = vadd.f32 %v241_v3, %v53_v57  ;;  %v169_v8 = vpack.c.bf16 %v91_v60, %v90_v59  ;;  %v94_v9 = vmax.f32 %v74_v61, 0.0  ;;  %v54_v11 = vmul.f32 %v236_v2, %v30_v58 }
  0x10   :  { %v95_v10 = vmax.f32 %v75_v62, 0.0  ;;  %v174_v12 = vpack.c.bf16 %v93_v1, %v92_v0  ;;  %v96_v13 = vmax.f32 %v76_v4, 0.0  ;;  %v55_v15 = vmul.f32 %v236_v2, %v31_v63 }
  0x11   :  { %v97_v14 = vmax.f32 %v77_v5, 0.0  ;;  %199 = vst [vmem:[%s370_s3 + $0x20] sm:$0xff] %v169_v8   ;;  %v78_v17 = vadd.f32 %v241_v3, %v54_v11  ;;  %v56_v18 = vmul.f32 %v236_v2, %v32_v6  ;;  %v57_v19 = vmul.f32 %v236_v2, %v33_v7 }
  0x12   :  { %v179_v16 = vpack.c.bf16 %v95_v10, %v94_v9  ;;  %200 = vst [vmem:[%s370_s3 + $0x28] sm:$0xff] %v174_v12   ;;  %v79_v21 = vadd.f32 %v241_v3, %v55_v15 }
  0x13   :  { %v184_v20 = vpack.c.bf16 %v97_v14, %v96_v13  ;;  %v98_v22 = vmax.f32 %v78_v17, 0.0  ;;  %v80_v23 = vadd.f32 %v241_v3, %v56_v18  ;;  %v81_v24 = vadd.f32 %v241_v3, %v57_v19 }
  0x14   :  { %201 = vst [vmem:[%s370_s3 + $0x30] sm:$0xff] %v179_v16   ;;  %v99_v2 = vmax.f32 %v79_v21, 0.0 }
  0x15   :  { %202 = vst [vmem:[%s370_s3 + $0x38] sm:$0xff] %v184_v20   ;;  %v100_v25 = vmax.f32 %v80_v23, 0.0  ;;  %v101_v26 = vmax.f32 %v81_v24, 0.0 }
  0x16   :  { %v189_v27 = vpack.c.bf16 %v99_v2, %v98_v22 }
  0x17   :  { %v194_v28 = vpack.c.bf16 %v101_v26, %v100_v25 }
  0x18   :  { %203 = vst [vmem:[%s370_s3 + $0x40] sm:$0xff] %v189_v27  }
  0x19   :  { %204 = vst [vmem:[%s370_s3 + $0x48] sm:$0xff] %v194_v28  }

// kernel: _basic_block_impl.5
= control target key start
LH: loop header
LB: loop body
LE: loop exit
PB: predicated region body
PF: predicated region fallthrough
CT: control target
= control target key end

     0   :  { %s3301_s12 = smov 0   ;;  %s3303_s13 = smov 0   ;;  %s4074_s0 = inlined_call_operand.vmem [shape: bf16[4,2,100,128], index: 0, kind: input, shape index: {}]   ;;  %s4075_s1 = inlined_call_operand.vmem [shape: bf16[9,128,128], index: 1, kind: input, shape index: {}]   ;;  %s4076_s2 = inlined_call_operand.vmem [shape: f32[2,80,128], index: 2, kind: output, shape index: {0}]   ;;  %s4077_s3 = inlined_call_operand.vmem [shape: f32[2,2,128], index: 3, kind: output, shape index: {1}]  }
   0x1   :  { %s3305_s14 = smov 0  }
   0x2 LB: > { %s2449_s15 = sadd.s32 4294967295, %s3277_s14   ;;  %s3318_s16 = sadd.s32 1, %s3277_s14   ;;  %s3277_s14 = sphi %s3305_s14, %s4111_s14   ;;  %s3273_s13 = sphi %s3303_s13, %s4110_s13   ;;  %s3269_s12 = sphi %s3301_s12, %s4109_s12  }
   0x3   : > { %s18_s17 = ssub.s32 %s3277_s14, %s3318_s16  ;;  %s21_s18 = sadd.s32 1, %s3273_s13 }
   0x4   : > { %p19_p0 = scmp.eq.s32.totalorder %s18_s17, 0  ;;  %p28_p1 = scmp.ne.s32.totalorder %s3273_s13, %s3269_s12 }
   0x5   : > { %p29_p2 = scmp.eq.s32.totalorder %s3277_s14, 0  ;;  %p2452_p4 = scmp.ge.s32.totalorder %s3277_s14, 2 }
   0x6   : > { %s3327_s19 = scalar_select %p19_p0, %s3273_s13, %s21_s18  }
   0x7   : > { %p30_p3 = por %p29_p2, %p28_p1  ;;  %130 = sbr.rel (%p2452_p4) target bundleno = 45 (0x2d), region = 20 }
   0xc   : > { %133 = sbr.rel (!%p30_p3) target bundleno = 45 (0x2d), region = 24  ;;  %s135_s20 = sand.u32 (%p30_p3), 1, %s3273_s13  }
   0xd   : > { %s3226_s21 = smul.u32 (%p30_p3), 52, %s3277_s14 }
   0xe   : > { %s3225_s22 = smul.u32 (%p30_p3), 208, %s135_s20 }
   0xf   : > { %s3335_s25 = scalar_lea.vmem (%p30_p3), %s4074_s0, %s3226_s21 }
  0x10   : > { %v157_v0 = vld [vmem:[%s3335_s25] sm:$0xff] (%p30_p3)   ;;  %v161_v1 = vld [vmem:[%s3335_s25 + $0x8] sm:$0xff] (%p30_p3)   ;;  %v165_v2 = vld [vmem:[%s3335_s25 + $0x10] sm:$0xff] (%p30_p3)   ;;  %s3340_s26 = scalar_lea.vmem (%p30_p3), [#allocation2], %s3225_s22 }
  0x11   : > { %158 = vst [vmem:[%s3340_s26] sm:$0xff] %v157_v0   ;;  %v169_v3 = vld [vmem:[%s3335_s25 + $0x18] sm:$0xff]   ;;  %v173_v4 = vld [vmem:[%s3335_s25 + $0x20] sm:$0xff]   ;;  %v177_v5 = vld [vmem:[%s3335_s25 + $0x28] sm:$0xff]  }
  0x12   : > { %162 = vst [vmem:[%s3340_s26 + $0x8] sm:$0xff] %v161_v1   ;;  %v181_v6 = vld [vmem:[%s3335_s25 + $0x30] sm:$0xf]  ;;  %v183_v7 = vld [vmem:[%s3335_s25 + $0x68] sm:$0xff]   ;;  %v191_v9 = vld [vmem:[%s3335_s25 + $0x78] sm:$0xff]  }
  0x13   : > { %166 = vst [vmem:[%s3340_s26 + $0x10] sm:$0xff] %v165_v2   ;;  %v187_v8 = vld [vmem:[%s3335_s25 + $0x70] sm:$0xff]   ;;  %v195_v10 = vld [vmem:[%s3335_s25 + $0x80] sm:$0xff]   ;;  %v199_v11 = vld [vmem:[%s3335_s25 + $0x88] sm:$0xff]  }
  0x14   : > { %170 = vst [vmem:[%s3340_s26 + $0x18] sm:$0xff] %v169_v3   ;;  %v203_v12 = vld [vmem:[%s3335_s25 + $0x90] sm:$0xff]   ;;  %v207_v13 = vld [vmem:[%s3335_s25 + $0x98] sm:$0xf]  ;;  %v217_v16 = vld [vmem:[%s3335_s25 + $0xe0] sm:$0xff]  }
  0x15   : > { %174 = vst [vmem:[%s3340_s26 + $0x20] sm:$0xff] %v173_v4   ;;  %v209_v14 = vld [vmem:[%s3335_s25 + $0xd0] sm:$0xff]   ;;  %v213_v15 = vld [vmem:[%s3335_s25 + $0xd8] sm:$0xff]   ;;  %v221_v17 = vld [vmem:[%s3335_s25 + $0xe8] sm:$0xff]  }
  0x16   : > { %178 = vst [vmem:[%s3340_s26 + $0x28] sm:$0xff] %v177_v5   ;;  %v225_v18 = vld [vmem:[%s3335_s25 + $0xf0] sm:$0xff]   ;;  %v229_v19 = vld [vmem:[%s3335_s25 + $0xf8] sm:$0xff]   ;;  %v233_v20 = vld [vmem:[%s3335_s25 + $0x100] sm:$0xf] }
  0x17   : > { %182 = vst [vmem:[%s3340_s26 + $0x30] sm:$0xf] %v181_v6  ;;  %v235_v21 = vld [vmem:[%s3335_s25 + $0x138] sm:$0xff]   ;;  %v239_v22 = vld [vmem:[%s3335_s25 + $0x140] sm:$0xff]   ;;  %v243_v23 = vld [vmem:[%s3335_s25 + $0x148] sm:$0xff]  }
  0x18   : > { %184 = vst [vmem:[%s3340_s26 + $0x34] sm:$0xff] %v183_v7   ;;  %v247_v24 = vld [vmem:[%s3335_s25 + $0x150] sm:$0xff]   ;;  %v251_v25 = vld [vmem:[%s3335_s25 + $0x158] sm:$0xff]   ;;  %v255_v26 = vld [vmem:[%s3335_s25 + $0x160] sm:$0xff]  }
  0x19   : > { %188 = vst [vmem:[%s3340_s26 + $0x3c] sm:$0xff] %v187_v8   ;;  %v259_v27 = vld [vmem:[%s3335_s25 + $0x168] sm:$0xf] }
  0x1a   : > { %192 = vst [vmem:[%s3340_s26 + $0x44] sm:$0xff] %v191_v9  }
  0x1b   : > { %196 = vst [vmem:[%s3340_s26 + $0x4c] sm:$0xff] %v195_v10  }
  0x1c   : > { %200 = vst [vmem:[%s3340_s26 + $0x54] sm:$0xff] %v199_v11  }
  0x1d   : > { %204 = vst [vmem:[%s3340_s26 + $0x5c] sm:$0xff] %v203_v12  }
  0x1e   : > { %208 = vst [vmem:[%s3340_s26 + $0x64] sm:$0xf] %v207_v13 }
  0x1f   : > { %210 = vst [vmem:[%s3340_s26 + $0x68] sm:$0xff] %v209_v14  }
  0x20   : > { %214 = vst [vmem:[%s3340_s26 + $0x70] sm:$0xff] %v213_v15  }
  0x21   : > { %218 = vst [vmem:[%s3340_s26 + $0x78] sm:$0xff] %v217_v16  }
  0x22   : > { %222 = vst [vmem:[%s3340_s26 + $0x80] sm:$0xff] %v221_v17  }
  0x23   : > { %226 = vst [vmem:[%s3340_s26 + $0x88] sm:$0xff] %v225_v18  }
  0x24   : > { %230 = vst [vmem:[%s3340_s26 + $0x90] sm:$0xff] %v229_v19  }
  0x25   : > { %234 = vst [vmem:[%s3340_s26 + $0x98] sm:$0xf] %v233_v20 }
  0x26   : > { %236 = vst [vmem:[%s3340_s26 + $0x9c] sm:$0xff] %v235_v21  }
  0x27   : > { %240 = vst [vmem:[%s3340_s26 + $0xa4] sm:$0xff] %v239_v22  }
  0x28   : > { %244 = vst [vmem:[%s3340_s26 + $0xac] sm:$0xff] %v243_v23  }
  0x29   : > { %248 = vst [vmem:[%s3340_s26 + $0xb4] sm:$0xff] %v247_v24  }
  0x2a   : > { %252 = vst [vmem:[%s3340_s26 + $0xbc] sm:$0xff] %v251_v25  }
  0x2b   : > { %256 = vst [vmem:[%s3340_s26 + $0xc4] sm:$0xff] %v255_v26  }
  0x2c   : > { %260 = vst [vmem:[%s3340_s26 + $0xcc] sm:$0xf] %v259_v27 }
  0x2d PF: > { %p2454_p5 = scmp.ge.s32.totalorder %s3277_s14, 1  ;;  %p387_p6 = scmp.lt.s32.totalorder %s3277_s14, 3 }
  0x2f   : > { %p388_p7 = pnand %p2454_p5, %p387_p6 }
  0x30   : > { %s394_s28 = sand.u32 (!%p388_p7), 1, %s3269_s12   ;;  %p3816_p8 = scmp.lt.s32.totalorder (!%p388_p7), %s2449_s15, 1 }
  0x31   : > { %391 = sbr.rel (%p388_p7) target bundleno = 430 (0x1ae), region = 65 }
  0x32   : > { %s3227_s6 = smul.u32 (!%p388_p7), 208, %s394_s28 }
  0x34   : > { %s3452_s22 = scalar_lea.vmem (!%p388_p7), [#allocation2], %s3227_s6 }
  0x36   : > { %v3122_v28 = vld [vmem:[%s4075_s1 + $0x78] sm:$0xff]  ;;  %v3121_v29 = vld [vmem:[%s4075_s1 + $0x70] sm:$0xff]  ;;  %v3120_v32 = vld [vmem:[%s4075_s1 + $0x68] sm:$0xff]  ;;  %vm764_vm0 = vsmask.f32 7424  ;;  %vm1459_vm1 = vcmask 1046528  }
  0x37   : > { %562 = vmatpush.bf16.msra.mxu0 %v3122_v28  ;;  %3209 = vmatpush.bf16.msra.mxu1 %v3122_v28  ;;  %v3148_v30 = vld [vmem:[%s4075_s1 + $0xf8] sm:$0xff]  ;;  %v3147_v31 = vld [vmem:[%s4075_s1 + $0xf0] sm:$0xff]  ;;  %v3146_v33 = vld [vmem:[%s4075_s1 + $0xe8] sm:$0xff]  ;;  %vm1753_vm2 = vsmask.f32 6400  ;;  %s4113_s15 = smov (!%p3816_p8, %s2449_s15), 1 }
  0x38   : > { %3210 = vmatpush.bf16.msra.mxu2 %v3122_v28  ;;  %1012 = vmatpush.bf16.msra.mxu3 %v3148_v30  ;;  %v3119_v34 = vld [vmem:[%s4075_s1 + $0x60] sm:$0xff]  ;;  %v3118_v36 = vld [vmem:[%s4075_s1 + $0x58] sm:$0xff]  ;;  %v3117_v38 = vld [vmem:[%s4075_s1 + $0x50] sm:$0xff]  ;;  %s3228_s14 = smul.u32 80, %s4113_s15  ;;  %s2456_s29 = sshll.u32 %s4113_s15, 1 }
  0x39   : > { %v3145_v35 = vld [vmem:[%s4075_s1 + $0xe0] sm:$0xff]  ;;  %v3144_v37 = vld [vmem:[%s4075_s1 + $0xd8] sm:$0xff]  ;;  %v3143_v39 = vld [vmem:[%s4075_s1 + $0xd0] sm:$0xff]  ;;  %s429_s5 = scalar_lea.vmem %s4077_s3, %s2456_s29 }
  0x3a   : > { %v3116_v40 = vld [vmem:[%s4075_s1 + $0x48] sm:$0xff]  ;;  %v3115_v42 = vld [vmem:[%s4075_s1 + $0x40] sm:$0xff]  ;;  %v3109_v43 = vld [vmem:[%s4075_s1 + $0x38] sm:$0xff]  ;;  %s3874_s28 = scalar_lea.vmem %s4076_s2, %s3228_s14 }
  0x3b   : > { %563 = vmatpush.bf16.msra.mxu0 %v3121_v29  ;;  %3211 = vmatpush.bf16.msra.mxu1 %v3121_v29  ;;  %v3142_v41 = vld [vmem:[%s4075_s1 + $0xc8] sm:$0xff]  ;;  %v3135_v44 = vld [vmem:[%s4075_s1 + $0xb8] sm:$0xff]  ;;  %v3141_v49 = vld [vmem:[%s4075_s1 + $0xc0] sm:$0xff] }
  0x3c   : > { %3212 = vmatpush.bf16.msra.mxu2 %v3121_v29  ;;  %1013 = vmatpush.bf16.msra.mxu3 %v3147_v31  ;;  %v3161_v45 = vld [vmem:[%s4075_s1 + $0x138] sm:$0xff]  ;;  %v3108_v50 = vld [vmem:[%s4075_s1 + $0x30] sm:$0xff]  ;;  %v3107_v55 = vld [vmem:[%s4075_s1 + $0x28] sm:$0xff] }
  0x3d   : > { %v3110_v46 = vld [vmem:[%s3452_s22 + $0x34] sm:$0xff]  ;;  %v3112_v47 = vld [vmem:[%s3452_s22 + $0x44] sm:$0xff]  ;;  %v3111_v2 = vld [vmem:[%s3452_s22 + $0x3c] sm:$0xff] }
  0x3e   : > { %v3114_v48 = vld [vmem:[%s3452_s22 + $0x54] sm:$0xff]  ;;  %v3136_v54 = vld [vmem:[%s3452_s22 + $0x68] sm:$0xff]  ;;  %v3123_v1 = vld [vmem:[%s3452_s22] sm:$0xff] }
  0x3f   : > { %564 = vmatpush.bf16.msra.mxu0 %v3120_v32  ;;  %3213 = vmatpush.bf16.msra.mxu1 %v3120_v32  ;;  %v3200_v51 = vld [vmem:[%s4075_s1 + $0x1f8] sm:$0xff]  ;;  %v3134_v52 = vld [vmem:[%s4075_s1 + $0xb0] sm:$0xff]  ;;  %v3133_v57 = vld [vmem:[%s4075_s1 + $0xa8] sm:$0xff]  ;;  %v768_v8 = vshll.u32 %v3123_v1, 16  ;;  %v766_v14 = vshrl.u32 %v3123_v1, 16 }
  0x40   : > { %3214 = vmatpush.bf16.msra.mxu2 %v3120_v32  ;;  %1014 = vmatpush.bf16.msra.mxu3 %v3146_v33  ;;  %v3160_v53 = vld [vmem:[%s4075_s1 + $0x130] sm:$0xff]  ;;  %v3159_v58 = vld [vmem:[%s4075_s1 + $0x128] sm:$0xff]  ;;  %v3106_v59 = vld [vmem:[%s4075_s1 + $0x20] sm:$0xff] }
  0x41   : > { %v3199_v56 = vld [vmem:[%s4075_s1 + $0x1f0] sm:$0xff]  ;;  %v3132_v60 = vld [vmem:[%s4075_s1 + $0xa0] sm:$0xff]  ;;  %v3105_v62 = vld [vmem:[%s4075_s1 + $0x18] sm:$0xff]  ;;  %v770_v15 = vrot.slane %v768_v8, 1 }
  0x42   : > { %v3158_v61 = vld [vmem:[%s4075_s1 + $0x120] sm:$0xff]  ;;  %v3131_v63 = vld [vmem:[%s4075_s1 + $0x98] sm:$0xff]  ;;  %v3104_v4 = vld [vmem:[%s4075_s1 + $0x10] sm:$0xff] }
  0x43   : > { %565 = vmatpush.bf16.msra.mxu0 %v3119_v34  ;;  %3215 = vmatpush.bf16.msra.mxu1 %v3119_v34  ;;  %v3157_v0 = vld [vmem:[%s4075_s1 + $0x118] sm:$0xff]  ;;  %v3130_v5 = vld [vmem:[%s4075_s1 + $0x90] sm:$0xff]  ;;  %v3198_v10 = vld [vmem:[%s4075_s1 + $0x1e8] sm:$0xff]  ;;  %v771_v19 = vor.u32 %v770_v15, %v766_v14 }
  0x44   : > { %3216 = vmatpush.bf16.msra.mxu2 %v3119_v34  ;;  %1015 = vmatpush.bf16.msra.mxu3 %v3145_v35  ;;  %v3113_v3 = vld [vmem:[%s3452_s22 + $0x4c] sm:$0xff]  ;;  %v3097_v26 = vld [vmem:[%s3452_s22] sm:$0xff]  ;;  %v3138_v33 = vld [vmem:[%s3452_s22 + $0x78] sm:$0xff] }
  0x45   : > { %v3156_v6 = vld [vmem:[%s4075_s1 + $0x110] sm:$0xff]  ;;  %v3516_v7 = vld [vmem:[%s3452_s22 + $0x8] sm:$0xff]  ;;  %v3102_v17 = vld [vmem:[%s4075_s1] sm:$0xff] }
  0x46   : > { %v3137_v9 = vld [vmem:[%s3452_s22 + $0x70] sm:$0xff]  ;;  %v3103_v11 = vld [vmem:[%s4075_s1 + $0x8] sm:$0xff]  ;;  %v773_v16 = vshll.u32 %v3516_v7, 16  ;;  %v3187_v22 = vld [vmem:[%s4075_s1 + $0x1b8] sm:$0xff] }
  0x47   : > { %566 = vmatpush.bf16.msra.mxu0 %v3118_v36  ;;  %3217 = vmatpush.bf16.msra.mxu1 %v3118_v36  ;;  %v3129_v12 = vld [vmem:[%s4075_s1 + $0x88] sm:$0xff]  ;;  %v3128_v18 = vld [vmem:[%s4075_s1 + $0x80] sm:$0xff]  ;;  %v3174_v23 = vld [vmem:[%s4075_s1 + $0x178] sm:$0xff] }
  0x48   : > { %3218 = vmatpush.bf16.msra.mxu2 %v3118_v36  ;;  %1016 = vmatpush.bf16.msra.mxu3 %v3144_v37  ;;  %v3155_v13 = vld [vmem:[%s4075_s1 + $0x108] sm:$0xff]  ;;  %v775_v20 = vrot.slane %v773_v16, 1  ;;  %v3154_v21 = vld [vmem:[%s4075_s1 + $0x100] sm:$0xff]  ;;  %v3208_v24 = vld [vmem:[%s4075_s1 + $0x238] sm:$0xff] }
  0x49   : > { %v3149_v27 = vld [vmem:[%s3452_s22 + $0x9c] sm:$0xff]  ;;  %v3125_v32 = vld [vmem:[%s3452_s22 + $0x10] sm:$0xff]  ;;  %v718_v15 = vld [vmem:[%s3452_s22 + $0x28] sm:$0x1] }
  0x4a   : > { %v776_v25 = vsel %vm764_vm0, %v771_v19, %v775_v20  ;;  %v3186_v28 = vld [vmem:[%s4075_s1 + $0x1b0] sm:$0xff]  ;;  %v3197_v31 = vld [vmem:[%s4075_s1 + $0x1e0] sm:$0xff]  ;;  %v3185_v34 = vld [vmem:[%s4075_s1 + $0x1a8] sm:$0xff]  ;;  %v757_v19 = vunpack.c.l.b16 %v718_v15 }
  0x4b   : > { %567 = vmatpush.bf16.msra.mxu0 %v3117_v38  ;;  %3219 = vmatpush.bf16.msra.mxu1 %v3117_v38  ;;  %v3173_v29 = vld [vmem:[%s4075_s1 + $0x170] sm:$0xff]  ;;  %v3172_v35 = vld [vmem:[%s4075_s1 + $0x168] sm:$0xff]  ;;  %v3196_v37 = vld [vmem:[%s4075_s1 + $0x1d8] sm:$0xff] }
  0x4c   : > { %3220 = vmatpush.bf16.msra.mxu2 %v3117_v38  ;;  %1017 = vmatpush.bf16.msra.mxu3 %v3143_v39  ;;  %v3207_v30 = vld [vmem:[%s4075_s1 + $0x230] sm:$0xff]  ;;  %v3206_v36 = vld [vmem:[%s4075_s1 + $0x228] sm:$0xff]  ;;  %v777_v38 = vshrl.u32 %v3516_v7, 16  ;;  %v781_v39 = vshll.u32 %v3125_v32, 16  ;;  %v3193_v7 = vld [vmem:[%s4075_s1 + $0x1c0] sm:$0xff] }
  0x4d   : > { %v3151_v1 = vld [vmem:[%s3452_s22 + $0xac] sm:$0xff]  ;;  %v3189_v16 = vld [vmem:[%s3452_s22 + $0x40] sm:$0xff]  ;;  %v3192_v15 = vld [vmem:[%s3452_s22 + $0x58] sm:$0xff] }
  0x4e   : > { %v3167_v8 = vld [vmem:[%s4075_s1 + $0x140] sm:$0xff] }
  0x4f   : > { %568 = vmatpush.bf16.msra.mxu0 %v3116_v40  ;;  %3221 = vmatpush.bf16.msra.mxu1 %v3116_v40 }
  0x50   : > { %3222 = vmatpush.bf16.msra.mxu2 %v3116_v40  ;;  %1018 = vmatpush.bf16.msra.mxu3 %v3142_v41  ;;  %v3184_v40 = vld [vmem:[%s4075_s1 + $0x1a0] sm:$0xff] }
  0x51   : > { %v3171_v41 = vld [vmem:[%s4075_s1 + $0x160] sm:$0xff] }
  0x53   : > { %569 = vmatpush.bf16.msra.mxu0 %v3115_v42  ;;  %3223 = vmatpush.bf16.msra.mxu1 %v3115_v42 }
  0x54   : > { %3224 = vmatpush.bf16.msra.mxu2 %v3115_v42  ;;  %1019 = vmatpush.bf16.msra.mxu3 %v3141_v49  ;;  %v3205_v42 = vld [vmem:[%s4075_s1 + $0x220] sm:$0xff] }
  0x55   : > { %v3150_v49 = vld [vmem:[%s3452_s22 + $0xa4] sm:$0xff] }
  0x56   : > { %570 = vmatmul.bf16.vlgmr.msra.gmra.mxu0 %v3110_v46  ;;  %580 = vmatmul.bf16.vlgmr.msra.gmra.mxu1 %v3112_v47  ;;  %v3170_v46 = vld [vmem:[%s4075_s1 + $0x158] sm:$0xff] }
  0x57   : > { %674 = vmatpush.bf16.msrb.mxu1 %v3109_v43  ;;  %1162 = vmatpush.bf16.msrb.mxu0 %v3161_v45  ;;  %v779_v43 = vor.u32 %v777_v38, %v775_v20  ;;  %v3183_v45 = vld [vmem:[%s4075_s1 + $0x198] sm:$0xff] }
  0x58   : > { %862 = vmatpush.bf16.msrb.mxu2 %v3135_v44  ;;  %1688 = vmatpush.bf16.msrb.mxu3 %v3200_v51  ;;  %v783_v44 = vrot.slane %v781_v39, 1  ;;  %v3204_v51 = vld [vmem:[%s4075_s1 + $0x218] sm:$0xff] }
  0x59   : > { %590 = vmatmul.bf16.vlgmr.msra.gmra.mxu2 %v3114_v48  ;;  %1020 = vmatmul.bf16.vlgmr.msra.gmra.mxu3 %v3136_v54  ;;  %v3098_v48 = vld [vmem:[%s3452_s22 + $0x8] sm:$0xff]  ;;  %v3195_v54 = vld [vmem:[%s4075_s1 + $0x1d0] sm:$0xff]  ;;  %v3100_v20 = vld [vmem:[%s3452_s22 + $0x18] sm:$0xff] }
  0x5a   : > { %v784_v47 = vsel %vm764_vm0, %v779_v43, %v783_v44  ;;  %v3162_v38 = vld [vmem:[%s3452_s22 + $0x68] sm:$0xff] }
  0x5b   : > { %675 = vmatpush.bf16.msrb.mxu1 %v3108_v50  ;;  %1163 = vmatpush.bf16.msrb.mxu0 %v3160_v53  ;;  %v3182_v50 = vld [vmem:[%s4075_s1 + $0x190] sm:$0xff] }
  0x5c   : > { %863 = vmatpush.bf16.msrb.mxu2 %v3134_v52  ;;  %1689 = vmatpush.bf16.msrb.mxu3 %v3199_v56  ;;  %v3126_v52 = vld [vmem:[%s3452_s22 + $0x18] sm:$0xff]  ;;  %v3139_v53 = vld [vmem:[%s3452_s22 + $0x80] sm:$0xff]  ;;  %v3176_v39 = vld [vmem:[%s3452_s22 + $0xc] sm:$0xff] }
  0x5d   : > { %v3181_v56 = vld [vmem:[%s4075_s1 + $0x188] sm:$0xff] }
  0x5f   : > { %676 = vmatpush.bf16.msrb.mxu1 %v3107_v55  ;;  %1164 = vmatpush.bf16.msrb.mxu0 %v3159_v58  ;;  %v3169_v55 = vld [vmem:[%s4075_s1 + $0x150] sm:$0xff]  ;;  %v3194_v58 = vld [vmem:[%s4075_s1 + $0x1c8] sm:$0xff] }
  0x60   : > { %864 = vmatpush.bf16.msrb.mxu2 %v3133_v57  ;;  %1690 = vmatpush.bf16.msrb.mxu3 %v3198_v10  ;;  %v3203_v57 = vld [vmem:[%s4075_s1 + $0x210] sm:$0xff] }
  0x63   : > { %677 = vmatpush.bf16.msrb.mxu1 %v3106_v59  ;;  %1165 = vmatpush.bf16.msrb.mxu0 %v3158_v61  ;;  %v785_v59 = vshrl.u32 %v3125_v32, 16  ;;  %v3175_v32 = vld [vmem:[%s3452_s22 + $0x4] sm:$0xf0] }
  0x64   : > { %865 = vmatpush.bf16.msrb.mxu2 %v3132_v60  ;;  %1691 = vmatpush.bf16.msrb.mxu3 %v3197_v31  ;;  %v789_v60 = vshll.u32 %v3126_v52, 16  ;;  %v2908_v31 = vld [vmem:[%s3452_s22 + $0x4] sm:$0xe] }
  0x65   : > { %v787_v61 = vor.u32 %v785_v59, %v783_v44 }
  0x66   : > { %575 = vmatmul.bf16.gmra.mxu0 %v3111_v2  ;;  %585 = vmatmul.bf16.gmra.mxu1 %v3113_v3  ;;  %v3168_v2 = vld [vmem:[%s4075_s1 + $0x148] sm:$0xff]  ;;  %v3127_v3 = vld [vmem:[%s3452_s22 + $0x20] sm:$0xff] }
  0x67   : > { %678 = vmatpush.bf16.msrb.mxu1 %v3105_v62  ;;  %1166 = vmatpush.bf16.msrb.mxu0 %v3157_v0  ;;  %v791_v62 = vrot.slane %v789_v60, 1  ;;  %v3099_v0 = vld [vmem:[%s3452_s22 + $0x10] sm:$0xff]  ;;  %v797_v10 = vshll.u32 %v3127_v3, 16 }
  0x68   : > { %866 = vmatpush.bf16.msrb.mxu2 %v3131_v63  ;;  %1692 = vmatpush.bf16.msrb.mxu3 %v3196_v37  ;;  %v2909_v37 = vor.u32 %v3175_v32, %v2908_v31 }
  0x69   : > { %1025 = vmatmul.bf16.gmra.mxu3 %v3137_v9  ;;  %v792_v63 = vsel %vm764_vm0, %v787_v61, %v791_v62  ;;  %v793_v9 = vshrl.u32 %v3126_v52, 16  ;;  %v799_v14 = vrot.slane %v797_v10, 1  ;;  %v3191_v61 = vld [vmem:[%s3452_s22 + $0x50] sm:$0xff] }
  0x6a   : > { %v1755_v43 = vshrl.u32 %v2909_v37, 16  ;;  %v1758_v44 = vshll.u32 %v2909_v37, 16 }
  0x6b   : > { %679 = vmatpush.bf16.msrb.mxu1 %v3104_v4  ;;  %1167 = vmatpush.bf16.msrb.mxu0 %v3156_v6  ;;  %v3140_v4 = vld [vmem:[%s3452_s22 + $0x88] sm:$0xff] }
  0x6c   : > { %867 = vmatpush.bf16.msrb.mxu2 %v3130_v5  ;;  %1693 = vmatpush.bf16.msrb.mxu3 %v3195_v54  ;;  %v3180_v5 = vld [vmem:[%s4075_s1 + $0x180] sm:$0xff]  ;;  %v3202_v6 = vld [vmem:[%s4075_s1 + $0x208] sm:$0xff]  ;;  %v1760_v52 = vrot.slane %v1758_v44, 2 }
  0x6f   : > { %680 = vmatpush.bf16.msrb.mxu1 %v3103_v11  ;;  %1168 = vmatpush.bf16.msrb.mxu0 %v3155_v13  ;;  %v2987_v11 = vld [vmem:[%s3452_s22 + $0x38] sm:$0xe]  ;;  %v795_v13 = vor.u32 %v793_v9, %v791_v62 }
  0x70   : > { %868 = vmatpush.bf16.msrb.mxu2 %v3129_v12  ;;  %1694 = vmatpush.bf16.msrb.mxu3 %v3194_v58  ;;  %v3188_v12 = vld [vmem:[%s3452_s22 + $0x38] sm:$0xf0] }
  0x73   : > { %681 = vmatpush.bf16.msrb.mxu1 %v3102_v17  ;;  %1169 = vmatpush.bf16.msrb.mxu0 %v3154_v21  ;;  %v2988_v17 = vor.u32 %v3188_v12, %v2987_v11  ;;  %v3152_v21 = vld [vmem:[%s3452_s22 + $0xb4] sm:$0xff] }
  0x74   : > { %869 = vmatpush.bf16.msrb.mxu2 %v3128_v18  ;;  %1695 = vmatpush.bf16.msrb.mxu3 %v3193_v7  ;;  %v800_v18 = vsel %vm764_vm0, %v795_v13, %v799_v14 }
  0x76   : > { %682 = vmatmul.bf16.vlgmr.msrb.gmra.mxu1 %v3097_v26  ;;  %1170 = vmatmul.bf16.vlgmr.msrb.gmra.mxu0 %v3149_v27  ;;  %v801_v27 = vshrl.u32 %v3127_v3, 16  ;;  %v3164_v3 = vld [vmem:[%s3452_s22 + $0x78] sm:$0xff] }
  0x77   : > { %1359 = vmatpush.bf16.msra.mxu1 %v3174_v23  ;;  %1860 = vmatpush.bf16.msra.mxu0 %v3208_v24  ;;  %v1624_v23 = vrot.slane %v2988_v17, 1  ;;  %v1625_v24 = vrot.slane %v3189_v16, 1 }
  0x78   : > { %1524 = vmatpush.bf16.msra.mxu2 %v3187_v22  ;;  %v3201_v22 = vld [vmem:[%s4075_s1 + $0x200] sm:$0xff] }
  0x79   : > { %870 = vmatmul.bf16.vlgmr.msrb.gmra.mxu2 %v776_v25  ;;  %1030 = vmatmul.bf16.gmra.mxu3 %v3138_v33  ;;  %v763_v25 = vpack.c.b16 %v757_v19, %v757_v19  ;;  %v1626_v26 = vsel %vm1459_vm1, %v1624_v23, %v1625_v24  ;;  %v3190_v33 = vld [vmem:[%s3452_s22 + $0x48] sm:$0xff]  ;;  %v3165_v23 = vld [vmem:[%s3452_s22 + $0x80] sm:$0xff] }
  0x7a   : > { %v1286_v31 = vshll.u32 %v3165_v23, 16 }
  0x7b   : > { %1360 = vmatpush.bf16.msra.mxu1 %v3173_v29  ;;  %1861 = vmatpush.bf16.msra.mxu0 %v3207_v30  ;;  %v803_v29 = vor.u32 %v801_v27, %v799_v14  ;;  %v2968_v27 = vld [vmem:[%s3452_s22 + $0x60] sm:$0x1] }
  0x7c   : > { %1525 = vmatpush.bf16.msra.mxu2 %v3186_v28  ;;  %v805_v28 = vshll.u32 %v763_v25, 16 }
  0x7e   : > { %v807_v30 = vrot.slane %v805_v28, 1  ;;  %v1282_v28 = vshrl.u32 %v3164_v3, 16 }
  0x7f   : > { %1361 = vmatpush.bf16.msra.mxu1 %v3172_v35  ;;  %1862 = vmatpush.bf16.msra.mxu0 %v3206_v36  ;;  %v3101_v35 = vld [vmem:[%s3452_s22 + $0x20] sm:$0xff] }
  0x80   : > { %1526 = vmatpush.bf16.msra.mxu2 %v3185_v34  ;;  %v808_v34 = vsel %vm764_vm0, %v803_v29, %v807_v30  ;;  %v3153_v36 = vld [vmem:[%s3452_s22 + $0xbc] sm:$0xff] }
  0x83   : > { %1362 = vmatpush.bf16.msra.mxu1 %v3171_v41  ;;  %1863 = vmatpush.bf16.msra.mxu0 %v3205_v42  ;;  %v3163_v41 = vld [vmem:[%s3452_s22 + $0x70] sm:$0xff]  ;;  %v1265_v42 = vshll.u32 %v3162_v38, 16 }
  0x84   : > { %1527 = vmatpush.bf16.msra.mxu2 %v3184_v40  ;;  %v1627_v40 = vrot.slane %v3190_v33, 1  ;;  %v1274_v7 = vshrl.u32 %v3163_v41, 16 }
  0x86   : > { %687 = vmatmul.bf16.gmra.mxu1 %v3098_v48  ;;  %1175 = vmatmul.bf16.gmra.mxu0 %v3150_v49  ;;  %v1263_v48 = vshrl.u32 %v3162_v38, 16  ;;  %v1267_v49 = vrot.slane %v1265_v42, 1  ;;  %v1288_v38 = vrot.slane %v1286_v31, 1 }
  0x87   : > { %1363 = vmatpush.bf16.msra.mxu1 %v3170_v46  ;;  %1864 = vmatpush.bf16.msra.mxu0 %v3204_v51  ;;  %v1766_v46 = vshll.u32 %v3176_v39, 16  ;;  %v1757_v51 = vrot.slane %v1755_v43, 1 }
  0x88   : > { %1528 = vmatpush.bf16.msra.mxu2 %v3183_v45  ;;  %v1763_v45 = vshrl.u32 %v3176_v39, 16 }
  0x89   : > { %875 = vmatmul.bf16.gmra.mxu2 %v784_v47  ;;  %1035 = vmatmul.bf16.gmra.mxu3 %v3139_v53  ;;  %v1628_v47 = vsel %vm1459_vm1, %v1625_v24, %v1627_v40  ;;  %v1768_v54 = vrot.slane %v1766_v46, 2  ;;  %v1761_v59 = vor.u32 %v1760_v52, %v1757_v51  ;;  %v3693_v46 = vld [vmem:[%s3452_s22 + $0x24] sm:$0xff] }
  0x8a   : > { %v1765_v53 = vrot.slane %v1763_v45, 1  ;;  %v1790_v51 = vshrl.u32 %v3693_v46, 16  ;;  %v1793_v52 = vshll.u32 %v3693_v46, 16 }
  0x8b   : > { %1364 = vmatpush.bf16.msra.mxu1 %v3169_v55  ;;  %1865 = vmatpush.bf16.msra.mxu0 %v3203_v57  ;;  %v1460_v55 = vrot.slane %v2909_v37, 1  ;;  %v1268_v57 = vor.u32 %v1267_v49, %v1263_v48 }
  0x8c   : > { %1529 = vmatpush.bf16.msra.mxu2 %v3182_v50  ;;  %v1270_v50 = vshll.u32 %v3163_v41, 16  ;;  %v1769_v60 = vor.u32 %v1768_v54, %v1765_v53 }
  0x8e   : > { %v1272_v58 = vrot.slane %v1270_v50, 1  ;;  %v3166_v50 = vld [vmem:[%s3452_s22 + $0x88] sm:$0xff] }
  0x8f   : > { %1365 = vmatpush.bf16.msra.mxu1 %v3168_v2  ;;  %1866 = vmatpush.bf16.msra.mxu0 %v3202_v6  ;;  %v1629_v2 = vrot.slane %v3191_v61, 1  ;;  %v1467_v61 = vrot.slane %v3693_v46, 1 }
  0x90   : > { %1530 = vmatpush.bf16.msra.mxu2 %v3181_v56  ;;  %v1461_v56 = vrot.slane %v3176_v39, 1  ;;  %v1276_v12 = vor.u32 %v1274_v7, %v1272_v58 }
  0x91   : > { %v1630_v6 = vsel %vm1459_vm1, %v1627_v40, %v1629_v2 }
  0x92   : > { %v1462_v62 = vsel %vm1459_vm1, %v1460_v55, %v1461_v56 }
  0x93   : > { %1366 = vmatpush.bf16.msra.mxu1 %v3167_v8  ;;  %1867 = vmatpush.bf16.msra.mxu0 %v3201_v22  ;;  %v1278_v8 = vshll.u32 %v3164_v3, 16  ;;  %v1631_v22 = vrot.slane %v3192_v15, 1 }
  0x94   : > { %1531 = vmatpush.bf16.msra.mxu2 %v3180_v5 }
  0x95   : > { %v1280_v13 = vrot.slane %v1278_v8, 1 }
  0x96   : > { %692 = vmatmul.bf16.gmra.mxu1 %v3099_v0  ;;  %1180 = vmatmul.bf16.gmra.mxu0 %v3151_v1  ;;  %v1770_v0 = vsel %vm1753_vm2, %v1761_v59, %v1769_v60  ;;  %v3177_v1 = vld [vmem:[%s3452_s22 + $0x14] sm:$0xff]  ;;  %v1795_v59 = vrot.slane %v1793_v52, 2 }
  0x97   : > { %v1775_v5 = vshll.u32 %v3177_v1, 16  ;;  %v1463_v11 = vrot.slane %v3177_v1, 1  ;;  %v1281_v19 = vsel %vm764_vm0, %v1276_v12, %v1280_v13  ;;  %v1284_v37 = vor.u32 %v1282_v28, %v1280_v13 }
  0x99   : > { %880 = vmatmul.bf16.gmra.mxu2 %v792_v63  ;;  %1040 = vmatmul.bf16.gmra.mxu3 %v3140_v4  ;;  %v1273_v63 = vsel %vm764_vm0, %v1268_v57, %v1272_v58  ;;  %v1772_v4 = vshrl.u32 %v3177_v1, 16  ;;  %v1777_v10 = vrot.slane %v1775_v5, 2  ;;  %v1464_v16 = vsel %vm1459_vm1, %v1461_v56, %v1463_v11 }
  0x9a   : > { %v1289_v44 = vsel %vm764_vm0, %v1284_v37, %v1288_v38  ;;  %v1290_v56 = vshrl.u32 %v3165_v23, 16  ;;  %v1294_v57 = vshll.u32 %v3166_v50, 16  ;;  %v1792_v58 = vrot.slane %v1790_v51, 1 }
  0x9b   : > { %v1774_v9 = vrot.slane %v1772_v4, 1  ;;  %v2821_v4 = vld [vmem:[%s3452_s22 + $0x90] sm:$0x1] }
  0x9c   : > { %v1296_v1 = vrot.slane %v1294_v57, 1 }
  0x9d   : > { %v1778_v14 = vor.u32 %v1777_v10, %v1774_v9 }
  0xa6   : > { %697 = vmatmul.bf16.gmra.mxu1 %v3100_v20  ;;  %1185 = vmatmul.bf16.gmra.mxu0 %v3152_v21  ;;  %v1779_v20 = vsel %vm1753_vm2, %v1769_v60, %v1778_v14  ;;  %v3178_v21 = vld [vmem:[%s3452_s22 + $0x1c] sm:$0xff]  ;;  %v1732_v60 = vld [vmem:[%s3452_s22 + $0x2c] sm:$0x3] }
  0xa7   : > { %v1781_v24 = vshrl.u32 %v3178_v21, 16  ;;  %v1784_v25 = vshll.u32 %v3178_v21, 16  ;;  %v1751_v3 = vunpack.c.l.b16 %v1732_v60 }
  0xa9   : > { %885 = vmatmul.bf16.gmra.mxu2 %v800_v18  ;;  %1696 = vmatmul.bf16.vlgmr.msrb.gmra.mxu3 %v1626_v26  ;;  %v1632_v26 = vsel %vm1459_vm1, %v1629_v2, %v1631_v22  ;;  %v1783_v32 = vrot.slane %v1781_v24, 1  ;;  %v1786_v33 = vrot.slane %v1784_v25, 2  ;;  %v1796_v2 = vor.u32 %v1795_v59, %v1792_v58 }
  0xaa   : > { %v1752_v12 = vpack.c.b16 %v1751_v3, %v1751_v3 }
  0xab   : > { %v1787_v39 = vor.u32 %v1786_v33, %v1783_v32 }
  0xad   : > { %v1788_v45 = vsel %vm1753_vm2, %v1778_v14, %v1787_v39  ;;  %v1797_v10 = vsel %vm1753_vm2, %v1787_v39, %v1796_v2 }
  0xb6   : > { %702 = vmatmul.bf16.gmra.mxu1 %v3101_v35  ;;  %1190 = vmatmul.bf16.gmra.mxu0 %v3153_v36  ;;  %v1465_v35 = vrot.slane %v3178_v21, 1  ;;  %v1802_v21 = vshll.u32 %v1752_v12, 16 }
  0xb8   : > { %v1466_v41 = vsel %vm1459_vm1, %v1463_v11, %v1465_v35  ;;  %v1468_v5 = vsel %vm1459_vm1, %v1465_v35, %v1467_v61  ;;  %v1255_v11 = vunpack.c.l.b16 %v2821_v4  ;;  %v1804_v32 = vrot.slane %v1802_v21, 2 }
  0xb9   : > { %890 = vmatmul.bf16.gmra.mxu2 %v808_v34  ;;  %1701 = vmatmul.bf16.gmra.mxu3 %v1628_v47  ;;  %v1617_v34 = vunpack.c.l.b16 %v2968_v27  ;;  %v1298_v27 = vshrl.u32 %v3166_v50, 16 }
  0xbb   : > { %v1623_v40 = vpack.c.b16 %v1617_v34, %v1617_v34 }
  0xbd   : > { %v1633_v47 = vrot.slane %v1623_v40, 1 }
  0xbf   : > { %v1634_v53 = vsel %vm1459_vm1, %v1631_v22, %v1633_v47 }
  0xc6   : > { %1367 = vmatmul.bf16.vlgmr.msra.gmra.mxu1 %v1273_v63  ;;  %1868 = vmatmul.bf16.vlgmr.msra.gmra.mxu0 %v1770_v0  ;;  %v1292_v0 = vor.u32 %v1290_v56, %v1288_v38  ;;  %v1300_v38 = vor.u32 %v1298_v27, %v1296_v1 }
  0xc8   : > { %v1297_v9 = vsel %vm764_vm0, %v1292_v0, %v1296_v1  ;;  %v1914_v1 = vlaneseq }
  0xc9   : > { %1532 = vmatmul.bf16.vlgmr.msra.gmra.mxu2 %v1462_v62  ;;  %1706 = vmatmul.bf16.gmra.mxu3 %v1630_v6  ;;  %v1413_v6 = vld [vmem:[%s3452_s22 + $0x2c] sm:$0x1] }
  0xca   : > { %v1452_v14 = vunpack.c.l.b16 %v1413_v6 }
  0xcc   : > { %v1458_v23 = vpack.c.b16 %v1452_v14, %v1452_v14 }
  0xce   : > { %v1469_v34 = vrot.slane %v1458_v23, 1 }
  0xd3   : > { %v3671_v17 = vpop.f32.mrf.mxu0  ;;  %v3673_v18 = vpop.f32.mrf.mxu1 }
  0xd6   : > { %1372 = vmatmul.bf16.gmra.mxu1 %v1281_v19  ;;  %1873 = vmatmul.bf16.gmra.mxu0 %v1779_v20  ;;  %v1261_v19 = vpack.c.b16 %v1255_v11, %v1255_v11  ;;  %v1799_v20 = vshrl.u32 %v1752_v12, 16 }
  0xd8   : > { %v1302_v28 = vshll.u32 %v1261_v19, 16  ;;  %v1801_v31 = vrot.slane %v1799_v20, 1  ;;  %v3279_v20 = vmov 0  }
  0xd9   : > { %1537 = vmatmul.bf16.gmra.mxu2 %v1464_v16  ;;  %1711 = vmatmul.bf16.gmra.mxu3 %v1632_v26 }
  0xda   : > { %v1304_v39 = vrot.slane %v1302_v28, 1  ;;  %v1805_v40 = vor.u32 %v1804_v32, %v1801_v31 }
  0xdb   : > { %v3681_v29 = vpop.f32.mrf.mxu0  ;;  %v3683_v30 = vpop.f32.mrf.mxu1 }
  0xdc   : > { %v1021_v36 = vpop.f32.mrf.mxu3  ;;  %v3695_v48 = vpop.f32.mrf.mxu2  ;;  %v1305_v47 = vsel %vm764_vm0, %v1300_v38, %v1304_v39  ;;  %v1806_v50 = vsel %vm1753_vm2, %v1796_v2, %v1805_v40  ;;  %v3729_v2 = vshrl.u32 %v1914_v1, 7 }
  0xde   : > { %v1928_v6 = vand.u32 65535, %v3729_v2 }
  0xe3   : > { %v3686_v42 = vpop.f32.mrf.mxu0  ;;  %v3688_v43 = vpop.f32.mrf.mxu1 }
  0xe4   : > { %v1023_v49 = vpop.f32.mrf.mxu3  ;;  %v3707_v63 = vpop.f32.mrf.mxu2 }
  0xe6   : > { %1377 = vmatmul.bf16.gmra.mxu1 %v1289_v44  ;;  %1878 = vmatmul.bf16.gmra.mxu0 %v1788_v45  ;;  %v1470_v44 = vsel %vm1459_vm1, %v1467_v61, %v1469_v34 }
  0xe9   : > { %1542 = vmatmul.bf16.gmra.mxu2 %v1466_v41  ;;  %1716 = vmatmul.bf16.gmra.mxu3 %v1634_v53 }
  0xeb   : > { %v3701_v54 = vpop.f32.mrf.mxu0  ;;  %v3703_v55 = vpop.f32.mrf.mxu1 }
  0xec   : > { %v1026_v62 = vpop.f32.mrf.mxu3 }
  0xf3   : > { %v683_v7 = vpop.f32.mrf.mxu1  ;;  %v1171_v8 = vpop.f32.mrf.mxu0 }
  0xf4   : > { %v684_v13 = vadd.f32 %v683_v7, %v3671_v17  ;;  %v1028_v15 = vpop.f32.mrf.mxu3 }
  0xf6   : > { %1382 = vmatmul.bf16.gmra.mxu1 %v1297_v9  ;;  %1883 = vmatmul.bf16.gmra.mxu0 %v1797_v10  ;;  %v1931_v10 = vmul.u32 52429, %v1928_v6 }
  0xf9   : > { %1547 = vmatmul.bf16.gmra.mxu2 %v1468_v5 }
  0xfb   : > { %v685_v25 = vpop.f32.mrf.mxu1  ;;  %v1173_v26 = vpop.f32.mrf.mxu0 }
  0xfc   : > { %v871_v16 = vpop.f32.mrf.mxu2  ;;  %v686_v17 = vadd.f32 %v685_v25, %v3681_v29  ;;  %v1031_v35 = vpop.f32.mrf.mxu3 }
  0xfd   : > { %v896_v22 = vadd.f32 %v871_v16, %v684_v13 }
  0xff   : > { %v1046_v24 = vadd.f32 %v1021_v36, %v896_v22  ;;  %v3740_v22 = vadd.s32 8, %v3729_v2 }
 0x101   : > { %v3716_v33 = vadd.f32 %v1171_v8, %v1046_v24  ;;  %v1932_v8 = vmul.u32 52428, %v1928_v6  ;;  %v1957_v27 = vand.u32 65535, %v3740_v22 }
 0x103   : > { %v688_v45 = vpop.f32.mrf.mxu1  ;;  %v1176_v46 = vpop.f32.mrf.mxu0  ;;  %v1935_v12 = vshll.u32 %v1932_v8, 16  ;;  %v1936_v31 = vshrl.u32 %v1932_v8, 16  ;;  %v1960_v38 = vmul.u32 52429, %v1957_v27 }
 0x104   : > { %v873_v37 = vpop.f32.mrf.mxu2  ;;  %v689_v29 = vadd.f32 %v688_v45, %v3686_v42  ;;  %v1033_v52 = vpop.f32.mrf.mxu3 }
 0x105   : > { %v897_v41 = vadd.f32 %v873_v37, %v686_v17  ;;  %vm1939_vm3 = vc.u32 %v1931_v10, %v1935_v12  ;;  %v1958_v17 = vshrl.u32 %v3740_v22, 16 }
 0x106   : > { %1387 = vmatmul.bf16.gmra.mxu1 %v1305_v47  ;;  %1888 = vmatmul.bf16.gmra.mxu0 %v1806_v50  ;;  %v1940_v21 = vsel %vm1939_vm3, 1, %v3279_v20 }
 0x107   : > { %v1047_v36 = vadd.f32 %v1023_v49, %v897_v41  ;;  %v1962_v39 = vmul.u32 52429, %v1958_v17 }
 0x109   : > { %1552 = vmatmul.bf16.gmra.mxu2 %v1470_v44  ;;  %v3722_v51 = vadd.f32 %v1173_v26, %v1047_v36  ;;  %v1966_v45 = vshll.u32 %v1962_v39, 16 }
 0x10b   : > { %v690_v58 = vpop.f32.mrf.mxu1  ;;  %v1178_v59 = vpop.f32.mrf.mxu0 }
 0x10c   : > { %v876_v53 = vpop.f32.mrf.mxu2  ;;  %v691_v49 = vadd.f32 %v690_v58, %v3701_v54  ;;  %v3727_v61 = vpop.f32.mrf.mxu3  ;;  %v1929_v54 = vshrl.u32 %v3729_v2, 16 }
 0x10d   : > { %v898_v56 = vadd.f32 %v876_v53, %v689_v29 }
 0x10e   : > { %v1933_v11 = vmul.u32 52429, %v1929_v54  ;;  %v1934_v16 = vmul.u32 52428, %v1929_v54 }
 0x10f   : > { %v1048_v57 = vadd.f32 %v1026_v62, %v898_v56 }
 0x110   : > { %v1942_v25 = vadd.s32 %v1940_v21, %v1934_v16  ;;  %v1938_v41 = vshrl.u32 %v1933_v11, 16 }
 0x111   : > { %v3725_v60 = vadd.f32 %v1176_v46, %v1048_v57  ;;  %v3749_v46 = vadd.s32 16, %v3729_v2 }
 0x113   : > { %v693_v4 = vpop.f32.mrf.mxu1  ;;  %v1181_v5 = vpop.f32.mrf.mxu0  ;;  %v1986_v58 = vand.u32 65535, %v3749_v46 }
 0x114   : > { %v878_v0 = vpop.f32.mrf.mxu2  ;;  %v694_v62 = vadd.f32 %v693_v4, %v3673_v18  ;;  %v3736_v14 = vpop.f32.mrf.mxu3  ;;  %v1941_v18 = vadd.s32 %v1935_v12, %v1931_v10 }
 0x115   : > { %v899_v42 = vadd.f32 %v878_v0, %v691_v49 }
 0x117   : > { %v1049_v3 = vadd.f32 %v1028_v15, %v899_v42  ;;  %v1937_v15 = vshll.u32 %v1933_v11, 16  ;;  %v1967_v11 = vshrl.u32 %v1962_v39, 16 }
 0x119   : > { %v3733_v7 = vadd.f32 %v1178_v59, %v1049_v3  ;;  %vm1943_vm4 = vc.u32 %v1941_v18, %v1937_v15  ;;  %v1990_v3 = vmul.u32 52428, %v1986_v58 }
 0x11a   : > { %v1944_v32 = vsel %vm1943_vm4, 1, %v3279_v20 }
 0x11b   : > { %v695_v23 = vpop.f32.mrf.mxu1  ;;  %v1183_v24 = vpop.f32.mrf.mxu0  ;;  %v1946_v34 = vadd.s32 %v1944_v32, %v1942_v25  ;;  %v1993_v8 = vshll.u32 %v1990_v3, 16 }
 0x11c   : > { %v881_v9 = vpop.f32.mrf.mxu2  ;;  %v696_v26 = vadd.f32 %v695_v23, %v3683_v30  ;;  %v1963_v30 = vmul.u32 52428, %v1958_v17  ;;  %v3751_v50 = vpop.f32.mrf.mxu3  ;;  %v3763_v23 = vadd.s32 24, %v3729_v2  ;;  %v1994_v17 = vshrl.u32 %v1990_v3, 16 }
 0x11d   : > { %v900_v13 = vadd.f32 %v881_v9, %v694_v62  ;;  %v1947_v44 = vadd.s32 %v1946_v34, %v1936_v31  ;;  %v1989_v62 = vmul.u32 52429, %v1986_v58 }
 0x11f   : > { %v1050_v19 = vadd.f32 %v1031_v35, %v900_v13  ;;  %v1961_v35 = vmul.u32 52428, %v1957_v27  ;;  %v1948_v49 = vadd.s32 %v1947_v44, %v1938_v41  ;;  %vm1997_vm7 = vc.u32 %v1989_v62, %v1993_v8 }
 0x120   : > { %v1999_v16 = vadd.s32 %v1993_v8, %v1989_v62  ;;  %v1998_v18 = vsel %vm1997_vm7, 1, %v3279_v20 }
 0x121   : > { %v3744_v28 = vadd.f32 %v1181_v5, %v1050_v19  ;;  %v1964_v36 = vshll.u32 %v1961_v35, 16  ;;  %v1965_v1 = vshrl.u32 %v1961_v35, 16  ;;  %v1949_v10 = vshrl.u32 %v1948_v49, 3 }
 0x122   : > { %v2016_v35 = vshrl.u32 %v3763_v23, 16 }
 0x123   : > { %vm1968_vm5 = vc.u32 %v1960_v38, %v1964_v36  ;;  %v1970_v29 = vadd.s32 %v1964_v36, %v1960_v38  ;;  %v698_v53 = vpop.f32.mrf.mxu1  ;;  %v1186_v56 = vpop.f32.mrf.mxu0 }
 0x124   : > { %v883_v37 = vpop.f32.mrf.mxu2  ;;  %v1969_v57 = vsel %vm1968_vm5, 1, %v3279_v20  ;;  %v699_v59 = vadd.f32 %v698_v53, %v3688_v43  ;;  %v3766_v25 = vpop.f32.mrf.mxu3  ;;  %v2021_v53 = vmul.u32 52428, %v2016_v35 }
 0x125   : > { %v901_v40 = vadd.f32 %v883_v37, %v696_v26  ;;  %v1971_v0 = vadd.s32 %v1969_v57, %v1963_v30  ;;  %vm1972_vm6 = vc.u32 %v1970_v29, %v1966_v45  ;;  %v1950_v26 = vmul.u32 10, %v1949_v10 }
 0x126   : > { %v1973_v42 = vsel %vm1972_vm6, 1, %v3279_v20  ;;  %v2020_v30 = vmul.u32 52429, %v2016_v35  ;;  %v3777_v45 = vadd.s32 32, %v3729_v2 }
 0x127   : > { %v1051_v47 = vadd.f32 %v1033_v52, %v901_v40  ;;  %v1987_v52 = vshrl.u32 %v3749_v46, 16  ;;  %v1975_v4 = vadd.s32 %v1973_v42, %v1971_v0  ;;  %v3774_v40 = vsub.s32 %v3729_v2, %v1950_v26 }
 0x128   : > { %v2044_v42 = vand.u32 65535, %v3777_v45  ;;  %v2025_v10 = vshrl.u32 %v2020_v30, 16 }
 0x129   : > { %v3758_v5 = vadd.f32 %v1183_v24, %v1051_v47  ;;  %v1991_v54 = vmul.u32 52429, %v1987_v52  ;;  %v1976_v43 = vadd.s32 %v1975_v4, %v1965_v1  ;;  %v1992_v12 = vmul.u32 52428, %v1987_v52 }
 0x12a   : > { %vm2215_vm10 = vcmp.ne.s32.totalorder %v3774_v40, 0  ;;  %vm2225_vm12 = vcmp.lt.s32.totalorder %v3774_v40, 0 }
 0x12b   : > { %v1995_v13 = vshll.u32 %v1991_v54, 16  ;;  %v700_v19 = vpop.f32.mrf.mxu1  ;;  %v1188_v21 = vpop.f32.mrf.mxu0  ;;  %v2000_v27 = vadd.s32 %v1998_v18, %v1992_v12  ;;  %v1977_v31 = vadd.s32 %v1976_v43, %v1967_v11  ;;  %v1996_v36 = vshrl.u32 %v1991_v54, 16  ;;  %vm3795_vm13 = vmand %vm2225_vm12, %vm2215_vm10 }
 0x12c   : > { %v886_v6 = vpop.f32.mrf.mxu2  ;;  %v701_v24 = vadd.f32 %v700_v19, %v3703_v55  ;;  %v3784_v52 = vpop.f32.mrf.mxu3  ;;  %v2045_v54 = vshrl.u32 %v3777_v45, 16  ;;  %v2047_v43 = vmul.u32 52429, %v2044_v42  ;;  %v2048_v12 = vmul.u32 52428, %v2044_v42 }
 0x12d   : > { %v902_v9 = vadd.f32 %v886_v6, %v699_v59  ;;  %vm2001_vm8 = vc.u32 %v1999_v16, %v1995_v13  ;;  %v1978_v44 = vshrl.u32 %v1977_v31, 3  ;;  %v2024_v59 = vshll.u32 %v2020_v30, 16 }
 0x12e   : > { %v2002_v32 = vsel %vm2001_vm8, 1, %v3279_v20  ;;  %v2049_v13 = vmul.u32 52429, %v2045_v54 }
 0x12f   : > { %v1052_v15 = vadd.f32 %v3727_v61, %v902_v9  ;;  %v2004_v34 = vadd.s32 %v2002_v32, %v2000_v27  ;;  %v2015_v61 = vand.u32 65535, %v3763_v23  ;;  %v1979_v3 = vmul.u32 10, %v1978_v44 }
 0x130   : > { %v2245_v9 = vadd.s32 10, %v3774_v40  ;;  %v2050_v32 = vmul.u32 52428, %v2045_v54 }
 0x131   : > { %v3771_v38 = vadd.f32 %v1186_v56, %v1052_v15  ;;  %v2018_v55 = vmul.u32 52429, %v2015_v61  ;;  %v2019_v41 = vmul.u32 52428, %v2015_v61  ;;  %v2005_v29 = vadd.s32 %v2004_v34, %v1994_v17 }
 0x132   : > { %v3800_v18 = vsub.s32 %v3740_v22, %v1979_v3  ;;  %v2051_v17 = vshll.u32 %v2048_v12, 16  ;;  %v2053_v34 = vshll.u32 %v2049_v13, 16  ;;  %v2255_v22 = vsel %vm3795_vm13, %v2245_v9, %v3774_v40 }
 0x133   : > { %v2022_v57 = vshll.u32 %v2019_v41, 16  ;;  %v703_v58 = vpop.f32.mrf.mxu1  ;;  %v1191_v56 = vpop.f32.mrf.mxu0  ;;  %v2023_v62 = vshrl.u32 %v2019_v41, 16  ;;  %vm3836_vm3 = vcmp.lt.s32.totalorder %v2255_v22, 8 }
 0x134   : > { %v888_v37 = vpop.f32.mrf.mxu2  ;;  %v704_v49 = vadd.f32 %v703_v58, %v3695_v48  ;;  %vm2055_vm14 = vc.u32 %v2047_v43, %v2051_v17  ;;  %vm2216_vm15 = vcmp.ne.s32.totalorder %v3800_v18, 0  ;;  %vm2226_vm1 = vcmp.lt.s32.totalorder %v3800_v18, 0 }
 0x135   : > { %v903_v39 = vadd.f32 %v888_v37, %v701_v24  ;;  %vm2026_vm9 = vc.u32 %v2018_v55, %v2022_v57  ;;  %v2028_v0 = vadd.s32 %v2022_v57, %v2018_v55  ;;  %v2056_v37 = vsel %vm2055_vm14, 1, %v3279_v20  ;;  %vm3846_vm4 = vmand %vm2226_vm1, %vm2216_vm15 }
 0x136   : > { %v2027_v1 = vsel %vm2026_vm9, 1, %v3279_v20  ;;  %v2246_v9 = vadd.s32 10, %v3800_v18 }
 0x137   : > { %v1053_v47 = vadd.f32 %v3736_v14, %v903_v39  ;;  %v2006_v14 = vadd.s32 %v2005_v29, %v1996_v36  ;;  %v2029_v4 = vadd.s32 %v2027_v1, %v2021_v53  ;;  %vm2030_vm11 = vc.u32 %v2028_v0, %v2024_v59 }
 0x138   : > { %v2031_v48 = vsel %vm2030_vm11, 1, %v3279_v20  ;;  %v2057_v39 = vadd.s32 %v2051_v17, %v2047_v43  ;;  %v2058_v36 = vadd.s32 %v2056_v37, %v2050_v32  ;;  %v2052_v29 = vshrl.u32 %v2048_v12, 16 }
 0x139   : > { %v2033_v11 = vadd.s32 %v2031_v48, %v2029_v4  ;;  %v3790_v16 = vadd.f32 %v1188_v21, %v1053_v47  ;;  %v2007_v24 = vshrl.u32 %v2006_v14, 3  ;;  %v3803_v21 = vadd.s32 40, %v3729_v2  ;;  %v3821_v47 = vpop.f32.mrf.mxu3 }
 0x13a   : > { %vm2059_vm0 = vc.u32 %v2057_v39, %v2053_v34  ;;  %v3851_v43 = vadd.s32 48, %v3729_v2  ;;  %v2256_v32 = vsel %vm3846_vm4, %v2246_v9, %v3800_v18 }
 0x13b   : > { %v705_v26 = vpop.f32.mrf.mxu1  ;;  %v1193_v27 = vpop.f32.mrf.mxu0  ;;  %v2034_v31 = vadd.s32 %v2033_v11, %v2023_v62  ;;  %v2073_v55 = vand.u32 65535, %v3803_v21  ;;  %v2074_v40 = vshrl.u32 %v3803_v21, 16  ;;  %v2060_v57 = vsel %vm2059_vm0, 1, %v3279_v20 }
 0x13c   : > { %v891_v6 = vpop.f32.mrf.mxu2  ;;  %v2062_v0 = vadd.s32 %v2060_v57, %v2058_v36  ;;  %vm3885_vm11 = vcmp.lt.s32.totalorder %v2256_v32, 8 }
 0x13d   : > { %v904_v8 = vadd.f32 %v891_v6, %v704_v49  ;;  %v2035_v35 = vadd.s32 %v2034_v31, %v2025_v10  ;;  %v2077_v53 = vmul.u32 52428, %v2073_v55  ;;  %v2076_v58 = vmul.u32 52429, %v2073_v55 }
 0x13e   : > { %v2054_v49 = vshrl.u32 %v2049_v13, 16  ;;  %v2079_v6 = vmul.u32 52428, %v2074_v40  ;;  %v2063_v54 = vadd.s32 %v2062_v0, %v2052_v29 }
 0x13f   : > { %v1054_v15 = vadd.f32 %v3751_v50, %v904_v8  ;;  %v706_v50 = vadd.f32 %v705_v26, %v3707_v63  ;;  %v2008_v63 = vmul.u32 10, %v2007_v24  ;;  %v2036_v44 = vshrl.u32 %v2035_v35, 3 }
 0x140   : > { %v2080_v1 = vshll.u32 %v2077_v53, 16 }
 0x141   : > { %v3806_v61 = vadd.f32 %v1191_v56, %v1054_v15  ;;  %v2078_v56 = vmul.u32 52429, %v2074_v40  ;;  %v3833_v14 = vsub.s32 %v3749_v46, %v2008_v63  ;;  %v2037_v4 = vmul.u32 10, %v2036_v44  ;;  %v3868_v22 = vpop.f32.mrf.mxu3 }
 0x142   : > { %vm2084_vm2 = vc.u32 %v2076_v58, %v2080_v1  ;;  %v2081_v15 = vshrl.u32 %v2077_v53, 16 }
 0x143   : > { %v1368_v42 = vpop.f32.mrf.mxu1  ;;  %v1869_v3 = vpop.f32.mrf.mxu0  ;;  %v2082_v62 = vshll.u32 %v2078_v56, 16  ;;  %v2085_v10 = vsel %vm2084_vm2, 1, %v3279_v20  ;;  %v3855_v13 = vsub.s32 %v3763_v23, %v2037_v4  ;;  %vm2217_vm6 = vcmp.ne.s32.totalorder %v3833_v14, 0 }
 0x144   : > { %v893_v41 = vpop.f32.mrf.mxu2  ;;  %v1393_v48 = vadd.f32 %v1368_v42, %v3716_v33  ;;  %v2064_v33 = vadd.s32 %v2063_v54, %v2054_v49  ;;  %v2087_v11 = vadd.s32 %v2085_v10, %v2079_v6  ;;  %vm2227_vm7 = vcmp.lt.s32.totalorder %v3833_v14, 0 }
 0x145   : > { %v905_v30 = vadd.f32 %v893_v41, %v706_v50  ;;  %v2083_v17 = vshrl.u32 %v2078_v56, 16  ;;  %v2102_v50 = vand.u32 65535, %v3851_v43  ;;  %v2103_v23 = vshrl.u32 %v3851_v43, 16  ;;  %vm3878_vm8 = vmand %vm2227_vm7, %vm2217_vm6 }
 0x146   : > { %v2065_v35 = vshrl.u32 %v2064_v33, 3  ;;  %vm2218_vm9 = vcmp.ne.s32.totalorder %v3855_v13, 0  ;;  %vm2228_vm10 = vcmp.lt.s32.totalorder %v3855_v13, 0  ;;  %v2248_v56 = vadd.s32 10, %v3855_v13 }
 0x147   : > { %v1055_v59 = vadd.f32 %v3766_v25, %v905_v30  ;;  %v2086_v25 = vadd.s32 %v2080_v1, %v2076_v58  ;;  %v2106_v41 = vmul.u32 52428, %v2102_v50  ;;  %v2107_v63 = vmul.u32 52429, %v2103_v23  ;;  %vm3896_vm12 = vmand %vm2228_vm10, %vm2218_vm9 }
 0x148   : > { %v2108_v29 = vmul.u32 52428, %v2103_v23  ;;  %v3280_v42 = vmov 0.0   ;;  %v2258_v8 = vsel %vm3896_vm12, %v2248_v56, %v3855_v13 }
 0x149   : > { %vm2088_vm5 = vc.u32 %v2086_v25, %v2082_v62  ;;  %v3858_v24 = vadd.f32 %v1193_v27, %v1055_v59  ;;  %v2247_v27 = vadd.s32 10, %v3833_v14  ;;  %v2109_v53 = vshll.u32 %v2106_v41, 16  ;;  %v1704_v13 = vpop.f32.mrf.mxu3 }
 0x14a   : > { %v2089_v19 = vsel %vm2088_vm5, 1, %v3279_v20  ;;  %v2111_v57 = vshll.u32 %v2107_v63, 16  ;;  %v2066_v59 = vmul.u32 10, %v2065_v35  ;;  %vm3926_vm0 = vcmp.lt.s32.totalorder %v2258_v8, 8 }
 0x14b   : > { %v2091_v31 = vadd.s32 %v2089_v19, %v2087_v11  ;;  %v1370_v18 = vpop.f32.mrf.mxu1  ;;  %v1871_v39 = vpop.f32.mrf.mxu0  ;;  %v2257_v58 = vsel %vm3878_vm8, %v2247_v27, %v3833_v14  ;;  %v3086_v14 = vsel %vm3885_vm11, 1.0, %v3280_v42  ;;  %v3920_v19 = vadd.s32 56, %v3729_v2 }
 0x14c   : > { %v1533_v12 = vpop.f32.mrf.mxu2  ;;  %v1394_v36 = vadd.f32 %v1370_v18, %v3722_v51  ;;  %vm3907_vm14 = vcmp.lt.s32.totalorder %v2257_v58, 8  ;;  %v3916_v9 = vsub.s32 %v3777_v45, %v2066_v59 }
 0x14d   : > { %v1558_v26 = vadd.f32 %v1533_v12, %v1393_v48  ;;  %v2092_v37 = vadd.s32 %v2091_v31, %v2081_v15  ;;  %v2110_v48 = vshrl.u32 %v2106_v41, 16  ;;  %v2112_v12 = vshrl.u32 %v2107_v63, 16 }
 0x14e   : > { %v3087_v45 = vsel %vm3907_vm14, 1.0, %v3280_v42  ;;  %v2131_v27 = vand.u32 65535, %v3920_v19  ;;  %v2132_v35 = vshrl.u32 %v3920_v19, 16  ;;  %vm2219_vm1 = vcmp.ne.s32.totalorder %v3916_v9, 0 }
 0x14f   : > { %v1722_v34 = vadd.f32 %v3784_v52, %v1558_v26  ;;  %v2105_v52 = vmul.u32 52429, %v2102_v50  ;;  %v2093_v40 = vadd.s32 %v2092_v37, %v2083_v17  ;;  %vm2229_vm2 = vcmp.lt.s32.totalorder %v3916_v9, 0 }
 0x150   : > { %v3941_v63 = vsel %vm3926_vm0, 1.0, %v3280_v42 }
 0x151   : > { %v1894_v44 = vadd.f32 %v1869_v3, %v1722_v34  ;;  %v2094_v0 = vshrl.u32 %v2093_v40, 3  ;;  %vm2113_vm13 = vc.u32 %v2105_v52, %v2109_v53  ;;  %v2115_v1 = vadd.s32 %v2109_v53, %v2105_v52 }
 0x152   : > { %v3085_v3 = vsel %vm3836_vm3, 1.0, %v3280_v42  ;;  %v2114_v6 = vsel %vm2113_vm13, 1, %v3279_v20  ;;  %v3944_v40 = vadd.s32 64, %v3729_v2  ;;  %v2136_v53 = vmul.u32 52429, %v2132_v35  ;;  %vm3952_vm3 = vmand %vm2229_vm2, %vm2219_vm1 }
 0x153   : > { %1904 = vst [vmem:[%s3874_s28] sm:$0xff] %v1894_v44  ;;  %v2116_v54 = vadd.s32 %v2114_v6, %v2108_v29  ;;  %vm2117_vm15 = vc.u32 %v2115_v1, %v2111_v57  ;;  %v1373_v46 = vpop.f32.mrf.mxu1  ;;  %v1874_v33 = vpop.f32.mrf.mxu0  ;;  %v2095_v11 = vmul.u32 10, %v2094_v0  ;;  %v2321_v26 = vmul.f32 %v1894_v44, %v1894_v44 }
 0x154   : > { %v1535_v49 = vpop.f32.mrf.mxu2  ;;  %v2118_v10 = vsel %vm2117_vm15, 1, %v3279_v20  ;;  %v1395_v31 = vadd.f32 %v1373_v46, %v3725_v60  ;;  %v2295_v32 = vmul.f32 %v3085_v3, %v1894_v44  ;;  %v2134_v44 = vmul.u32 52429, %v2131_v27 }
 0x155   : > { %v1559_v4 = vadd.f32 %v1535_v49, %v1394_v36  ;;  %v2120_v15 = vadd.s32 %v2118_v10, %v2116_v54  ;;  %v3936_v60 = vsub.s32 %v3803_v21, %v2095_v11  ;;  %v2135_v36 = vmul.u32 52428, %v2131_v27 }
 0x156   : > { %v2249_v21 = vadd.s32 10, %v3916_v9  ;;  %v2137_v49 = vmul.u32 52428, %v2132_v35  ;;  %v2140_v1 = vshll.u32 %v2136_v53, 16 }
 0x157   : > { %v1723_v25 = vadd.f32 %v3821_v47, %v1559_v4  ;;  %v2121_v50 = vadd.s32 %v2120_v15, %v2110_v48  ;;  %vm2220_vm4 = vcmp.ne.s32.totalorder %v3936_v60, 0  ;;  %v2138_v51 = vshll.u32 %v2135_v36, 16 }
 0x158   : > { %vm2230_vm5 = vcmp.lt.s32.totalorder %v3936_v60, 0  ;;  %v2160_v4 = vand.u32 65535, %v3944_v40  ;;  %v2259_v48 = vsel %vm3952_vm3, %v2249_v21, %v3916_v9  ;;  %v3967_v8 = vadd.s32 10, %v3936_v60 }
 0x159   : > { %v1895_v47 = vadd.f32 %v1871_v39, %v1723_v25  ;;  %v2122_v18 = vadd.s32 %v2121_v50, %v2112_v12  ;;  %v2331_v39 = vmul.f32 %v3085_v3, %v2321_v26  ;;  %vm2142_vm6 = vc.u32 %v2134_v44, %v2138_v51  ;;  %vm3973_vm7 = vmand %vm2230_vm5, %vm2220_vm4 }
 0x15a   : > { %v2144_v3 = vadd.s32 %v2138_v51, %v2134_v44  ;;  %v2143_v54 = vsel %vm2142_vm6, 1, %v3279_v20  ;;  %v2139_v46 = vshrl.u32 %v2135_v36, 16  ;;  %vm3980_vm9 = vcmp.lt.s32.totalorder %v2259_v48, 8 }
 0x15b   : > { %1905 = vst [vmem:[%s3874_s28 + $0x8] sm:$0xff] %v1895_v47  ;;  %v2296_v23 = vmul.f32 %v3086_v14, %v1895_v47  ;;  %v2322_v34 = vmul.f32 %v1895_v47, %v1895_v47  ;;  %v1375_v57 = vpop.f32.mrf.mxu1  ;;  %v1876_v58 = vpop.f32.mrf.mxu0  ;;  %v2123_v59 = vshrl.u32 %v2122_v18, 3  ;;  %v2163_v47 = vmul.u32 52429, %v2160_v4 }
 0x15c   : > { %v1538_v37 = vpop.f32.mrf.mxu2  ;;  %v1396_v0 = vadd.f32 %v1375_v57, %v3733_v7  ;;  %v1707_v7 = vpop.f32.mrf.mxu3  ;;  %vm2146_vm8 = vc.u32 %v2144_v3, %v2140_v1  ;;  %v3089_v48 = vsel %vm3980_vm9, 1.0, %v3280_v42 }
 0x15d   : > { %v2305_v55 = vadd.f32 %v2296_v23, %v2295_v32  ;;  %v2332_v52 = vmul.f32 %v3086_v14, %v2322_v34  ;;  %v1560_v41 = vadd.f32 %v1538_v37, %v1395_v31  ;;  %v2161_v14 = vshrl.u32 %v3944_v40, 16 }
 0x15e   : > { %v2124_v10 = vmul.u32 10, %v2123_v59  ;;  %v2147_v9 = vsel %vm2146_vm8, 1, %v3279_v20  ;;  %v2164_v31 = vmul.u32 52428, %v2160_v4  ;;  %v2141_v23 = vshrl.u32 %v2136_v53, 16 }
 0x15f   : > { %v2341_v30 = vadd.f32 %v2332_v52, %v2331_v39  ;;  %v1724_v29 = vadd.f32 %v3868_v22, %v1560_v41  ;;  %v3978_v32 = vmul.u32 52429, %v2161_v14  ;;  %v2260_v37 = vsel %vm3973_vm7, %v3967_v8, %v3936_v60 }
 0x160   : > { %v2166_v18 = vmul.u32 52428, %v2161_v14  ;;  %v2167_v39 = vshll.u32 %v2164_v31, 16  ;;  %v3991_v44 = vsub.s32 %v3851_v43, %v2124_v10  ;;  %vm4008_vm12 = vcmp.lt.s32.totalorder %v2260_v37, 8 }
 0x161   : > { %v1896_v22 = vadd.f32 %v1874_v33, %v1724_v29  ;;  %v2145_v33 = vadd.s32 %v2143_v54, %v2137_v49  ;;  %v2169_v41 = vshll.u32 %v3978_v32, 16 }
 0x162   : > { %vm2171_vm10 = vc.u32 %v2163_v47, %v2167_v39  ;;  %v2173_v36 = vadd.s32 %v2167_v39, %v2163_v47  ;;  %vm2221_vm13 = vcmp.ne.s32.totalorder %v3991_v44, 0  ;;  %vm2231_vm15 = vcmp.lt.s32.totalorder %v3991_v44, 0 }
 0x163   : > { %1906 = vst [vmem:[%s3874_s28 + $0x10] sm:$0xff] %v1896_v22  ;;  %v2297_v6 = vmul.f32 %v3087_v45, %v1896_v22  ;;  %v2323_v62 = vmul.f32 %v1896_v22, %v1896_v22  ;;  %v1378_v34 = vpop.f32.mrf.mxu1  ;;  %v1879_v27 = vpop.f32.mrf.mxu0  ;;  %v2172_v53 = vsel %vm2171_vm10, 1, %v3279_v20  ;;  %vm4022_vm1 = vmand %vm2231_vm15, %vm2221_vm13 }
 0x164   : > { %v1540_v25 = vpop.f32.mrf.mxu2  ;;  %v1397_v52 = vadd.f32 %v1378_v34, %v3744_v28  ;;  %v2174_v28 = vadd.s32 %v2172_v53, %v2166_v18  ;;  %vm2175_vm11 = vc.u32 %v2173_v36, %v2169_v41  ;;  %v1709_v51 = vpop.f32.mrf.mxu3 }
 0x165   : > { %v2306_v11 = vadd.f32 %v2305_v55, %v2297_v6  ;;  %v2333_v12 = vmul.f32 %v3087_v45, %v2323_v62  ;;  %v1561_v15 = vadd.f32 %v1540_v25, %v1396_v0  ;;  %v2149_v45 = vadd.s32 %v2147_v9, %v2145_v33 }
 0x166   : > { %v2176_v22 = vsel %vm2175_vm11, 1, %v3279_v20 }
 0x167   : > { %v2342_v17 = vadd.f32 %v2341_v30, %v2333_v12  ;;  %v1725_v50 = vadd.f32 %v1704_v13, %v1561_v15  ;;  %v2150_v13 = vadd.s32 %v2149_v45, %v2139_v46  ;;  %v3994_v30 = vadd.s32 72, %v3729_v2 }
 0x168   : > { %v2168_v2 = vshrl.u32 %v2164_v31, 16  ;;  %v2178_v62 = vadd.s32 %v2176_v22, %v2174_v28 }
 0x169   : > { %v1897_v55 = vadd.f32 %v1876_v58, %v1725_v50  ;;  %v2151_v21 = vadd.s32 %v2150_v13, %v2141_v23  ;;  %v2189_v58 = vand.u32 65535, %v3994_v30  ;;  %v2190_v43 = vshrl.u32 %v3994_v30, 16 }
 0x16b   : > { %1907 = vst [vmem:[%s3874_s28 + $0x18] sm:$0xff] %v1897_v55  ;;  %v2298_v29 = vmul.f32 %v3941_v63, %v1897_v55  ;;  %v2324_v60 = vmul.f32 %v1897_v55, %v1897_v55  ;;  %v2192_v0 = vmul.u32 52429, %v2189_v58  ;;  %v2193_v1 = vmul.u32 52428, %v2189_v58  ;;  %v1380_v54 = vpop.f32.mrf.mxu1  ;;  %v1881_v25 = vpop.f32.mrf.mxu0 }
 0x16c   : > { %v1543_v57 = vpop.f32.mrf.mxu2  ;;  %v2194_v3 = vmul.u32 52429, %v2190_v43  ;;  %v2152_v6 = vshrl.u32 %v2151_v21, 3  ;;  %v1398_v33 = vadd.f32 %v1380_v54, %v3758_v5  ;;  %v2195_v12 = vmul.u32 52428, %v2190_v43  ;;  %v1712_v13 = vpop.f32.mrf.mxu3 }
 0x16d   : > { %v2307_v56 = vadd.f32 %v2306_v11, %v2298_v29  ;;  %v2334_v59 = vmul.f32 %v3941_v63, %v2324_v60  ;;  %v1562_v49 = vadd.f32 %v1543_v57, %v1397_v52  ;;  %v2170_v63 = vshrl.u32 %v3978_v32, 16 }
 0x16e   : > { %v2196_v8 = vshll.u32 %v2193_v1, 16  ;;  %v2198_v10 = vshll.u32 %v2194_v3, 16  ;;  %v2179_v11 = vadd.s32 %v2178_v62, %v2168_v2  ;;  %v2153_v47 = vmul.u32 10, %v2152_v6 }
 0x16f   : > { %v2343_v4 = vadd.f32 %v2342_v17, %v2334_v59  ;;  %v1726_v14 = vadd.f32 %v1707_v7, %v1562_v49  ;;  %v2197_v17 = vshrl.u32 %v2193_v1, 16  ;;  %v3090_v52 = vsel %vm4008_vm12, 1.0, %v3280_v42 }
 0x170   : > { %vm2200_vm14 = vc.u32 %v2192_v0, %v2196_v8  ;;  %v2202_v15 = vadd.s32 %v2196_v8, %v2192_v0  ;;  %v2180_v32 = vadd.s32 %v2179_v11, %v2170_v63  ;;  %v2199_v29 = vshrl.u32 %v2194_v3, 16 }
 0x171   : > { %v1898_v46 = vadd.f32 %v1879_v27, %v1726_v14  ;;  %v2201_v5 = vsel %vm2200_vm14, 1, %v3279_v20  ;;  %v2251_v27 = vadd.s32 10, %v3991_v44 }
 0x172   : > { %vm2204_vm0 = vc.u32 %v2202_v15, %v2198_v10  ;;  %v2203_v34 = vadd.s32 %v2201_v5, %v2195_v12  ;;  %v2181_v36 = vshrl.u32 %v2180_v32, 3 }
 0x173   : > { %1908 = vst [vmem:[%s3874_s28 + $0x20] sm:$0xff] %v1898_v46  ;;  %v2299_v26 = vmul.f32 %v3089_v48, %v1898_v46  ;;  %v2325_v9 = vmul.f32 %v1898_v46, %v1898_v46  ;;  %v2205_v35 = vsel %vm2204_vm0, 1, %v3279_v20  ;;  %v1383_v41 = vpop.f32.mrf.mxu1  ;;  %v2154_v20 = vsub.s32 %v3920_v19, %v2153_v47  ;;  %v1884_v57 = vpop.f32.mrf.mxu0 }
 0x174   : > { %v1545_v31 = vpop.f32.mrf.mxu2  ;;  %v2207_v55 = vadd.s32 %v2205_v35, %v2203_v34  ;;  %v1399_v21 = vadd.f32 %v1383_v41, %v3771_v38  ;;  %v2261_v28 = vsel %vm4022_vm1, %v2251_v27, %v3991_v44  ;;  %v2182_v59 = vmul.u32 10, %v2181_v36 }
 0x175   : > { %v2308_v50 = vadd.f32 %v2307_v56, %v2299_v26  ;;  %v2335_v23 = vmul.f32 %v3089_v48, %v2325_v9  ;;  %v1563_v45 = vadd.f32 %v1545_v31, %v1398_v33  ;;  %vm2222_vm2 = vcmp.ne.s32.totalorder %v2154_v20, 0  ;;  %v1714_v48 = vpop.f32.mrf.mxu3 }
 0x176   : > { %v2208_v53 = vadd.s32 %v2207_v55, %v2197_v17  ;;  %vm2232_vm3 = vcmp.lt.s32.totalorder %v2154_v20, 0  ;;  %vm2271_vm4 = vcmp.lt.s32.totalorder %v2261_v28, 8  ;;  %v2252_v38 = vadd.s32 10, %v2154_v20 }
 0x177   : > { %v2344_v37 = vadd.f32 %v2343_v4, %v2335_v23  ;;  %v1727_v18 = vadd.f32 %v1709_v51, %v1563_v45  ;;  %vm4035_vm5 = vmand %vm2232_vm3, %vm2222_vm2  ;;  %v3091_v44 = vsel %vm2271_vm4, 1.0, %v3280_v42  ;;  %v2183_v4 = vsub.s32 %v3944_v40, %v2182_v59 }
 0x178   : > { %v2209_v49 = vadd.s32 %v2208_v53, %v2199_v29  ;;  %v2262_v54 = vsel %vm4035_vm5, %v2252_v38, %v2154_v20 }
 0x179   : > { %v1899_v60 = vadd.f32 %v1881_v25, %v1727_v18  ;;  %vm2223_vm6 = vcmp.ne.s32.totalorder %v2183_v4, 0  ;;  %vm2233_vm7 = vcmp.lt.s32.totalorder %v2183_v4, 0  ;;  %vm2272_vm8 = vcmp.lt.s32.totalorder %v2262_v54, 8 }
 0x17a   : > { %v2210_v14 = vshrl.u32 %v2209_v49, 3  ;;  %v2253_v12 = vadd.s32 10, %v2183_v4  ;;  %vm4045_vm9 = vmand %vm2233_vm7, %vm2223_vm6  ;;  %v3092_v26 = vsel %vm2272_vm8, 1.0, %v3280_v42 }
 0x17b   : > { %1909 = vst [vmem:[%s3874_s28 + $0x28] sm:$0xff] %v1899_v60  ;;  %v2300_v58 = vmul.f32 %v3090_v52, %v1899_v60  ;;  %v2326_v43 = vmul.f32 %v1899_v60, %v1899_v60  ;;  %v1385_v3 = vpop.f32.mrf.mxu1  ;;  %v1886_v8 = vpop.f32.mrf.mxu0 }
 0x17c   : > { %v1548_v56 = vpop.f32.mrf.mxu2  ;;  %v1400_v62 = vadd.f32 %v1385_v3, %v3790_v16  ;;  %v2211_v46 = vmul.u32 10, %v2210_v14  ;;  %v2263_v17 = vsel %vm4045_vm9, %v2253_v12, %v2183_v4 }
 0x17d   : > { %v2309_v19 = vadd.f32 %v2308_v50, %v2300_v58  ;;  %v2336_v2 = vmul.f32 %v3090_v52, %v2326_v43  ;;  %v1564_v51 = vadd.f32 %v1548_v56, %v1399_v21  ;;  %v1717_v23 = vpop.f32.mrf.mxu3  ;;  %vm2273_vm12 = vcmp.lt.s32.totalorder %v2263_v17, 8 }
 0x17e   : > { %v2212_v47 = vsub.s32 %v3994_v30, %v2211_v46 }
 0x17f   : > { %v2345_v22 = vadd.f32 %v2344_v37, %v2336_v2  ;;  %v1728_v0 = vadd.f32 %v1712_v13, %v1564_v51 }
 0x180   : > { %vm2224_vm10 = vcmp.ne.s32.totalorder %v2212_v47, 0  ;;  %vm2234_vm11 = vcmp.lt.s32.totalorder %v2212_v47, 0  ;;  %v2254_v30 = vadd.s32 10, %v2212_v47 }
 0x181   : > { %v1900_v6 = vadd.f32 %v1884_v57, %v1728_v0  ;;  %vm2244_vm13 = vmand %vm2234_vm11, %vm2224_vm10 }
 0x182   : > { %v2264_v41 = vsel %vm2244_vm13, %v2254_v30, %v2212_v47 }
 0x183   : > { %1910 = vst [vmem:[%s3874_s28 + $0x30] sm:$0xff] %v1900_v6  ;;  %v2301_v25 = vmul.f32 %v3091_v44, %v1900_v6  ;;  %v2327_v63 = vmul.f32 %v1900_v6, %v1900_v6  ;;  %v1388_v9 = vpop.f32.mrf.mxu1  ;;  %v1889_v37 = vpop.f32.mrf.mxu0  ;;  %vm2274_vm14 = vcmp.lt.s32.totalorder %v2264_v41, 8 }
 0x184   : > { %v1550_v10 = vpop.f32.mrf.mxu2  ;;  %v1401_v32 = vadd.f32 %v1388_v9, %v3806_v61  ;;  %v3093_v61 = vsel %vm2273_vm12, 1.0, %v3280_v42  ;;  %v3094_v56 = vsel %vm2274_vm14, 1.0, %v3280_v42 }
 0x185   : > { %v2310_v33 = vadd.f32 %v2309_v19, %v2301_v25  ;;  %v2337_v11 = vmul.f32 %v3091_v44, %v2327_v63  ;;  %v1565_v40 = vadd.f32 %v1550_v10, %v1400_v62  ;;  %v1719_v57 = vpop.f32.mrf.mxu3 }
 0x187   : > { %v2346_v7 = vadd.f32 %v2345_v22, %v2337_v11  ;;  %v1729_v16 = vadd.f32 %v1714_v48, %v1565_v40 }
 0x189   : > { %v1901_v31 = vadd.f32 %v1886_v8, %v1729_v16 }
 0x18b   : > { %1911 = vst [vmem:[%s3874_s28 + $0x38] sm:$0xff] %v1901_v31  ;;  %v2302_v5 = vmul.f32 %v3092_v26, %v1901_v31  ;;  %v2328_v50 = vmul.f32 %v1901_v31, %v1901_v31  ;;  %v1390_v55 = vpop.f32.mrf.mxu1  ;;  %v1891_v43 = vpop.f32.mrf.mxu0 }
 0x18c   : > { %v1553_v45 = vpop.f32.mrf.mxu2  ;;  %v1402_v13 = vadd.f32 %v1390_v55, %v3858_v24 }
 0x18d   : > { %v2311_v34 = vadd.f32 %v2310_v33, %v2302_v5  ;;  %v2338_v27 = vmul.f32 %v3092_v26, %v2328_v50  ;;  %v1566_v35 = vadd.f32 %v1553_v45, %v1401_v32 }
 0x18f   : > { %v2347_v18 = vadd.f32 %v2346_v7, %v2338_v27  ;;  %v1730_v39 = vadd.f32 %v1717_v23, %v1566_v35 }
 0x191   : > { %v1902_v52 = vadd.f32 %v1889_v37, %v1730_v39 }
 0x193   : > { %1912 = vst [vmem:[%s3874_s28 + $0x40] sm:$0xff] %v1902_v52  ;;  %v2303_v20 = vmul.f32 %v3093_v61, %v1902_v52  ;;  %v2329_v36 = vmul.f32 %v1902_v52, %v1902_v52 }
 0x194   : > { %v1555_v29 = vpop.f32.mrf.mxu2 }
 0x195   : > { %v2312_v60 = vadd.f32 %v2311_v34, %v2303_v20  ;;  %v2339_v21 = vmul.f32 %v3093_v61, %v2329_v36  ;;  %v1567_v53 = vadd.f32 %v1555_v29, %v1402_v13 }
 0x197   : > { %v2348_v28 = vadd.f32 %v2347_v18, %v2339_v21  ;;  %v1731_v58 = vadd.f32 %v1719_v57, %v1567_v53 }
 0x199   : > { %v1903_v59 = vadd.f32 %v1891_v43, %v1731_v58 }
 0x19b   : > { %1913 = vst [vmem:[%s3874_s28 + $0x48] sm:$0xff] %v1903_v59  ;;  %v2304_v24 = vmul.f32 %v3094_v56, %v1903_v59  ;;  %v2330_v49 = vmul.f32 %v1903_v59, %v1903_v59 }
 0x19d   : > { %v2313_v19 = vadd.f32 %v2312_v60, %v2304_v24  ;;  %v2340_v2 = vmul.f32 %v3094_v56, %v2330_v49 }
 0x19f   : > { %v2314_v51 = vrot.slane %v2313_v19, 4  ;;  %v2349_v38 = vadd.f32 %v2348_v28, %v2340_v2 }
 0x1a1   : > { %v2315_v22 = vadd.f32 %v2314_v51, %v2313_v19  ;;  %v2350_v0 = vrot.slane %v2349_v38, 4 }
 0x1a3   : > { %v2316_v1 = vrot.slane %v2315_v22, 2  ;;  %v2351_v44 = vadd.f32 %v2350_v0, %v2349_v38 }
 0x1a5   : > { %v2317_v3 = vadd.f32 %v2316_v1, %v2315_v22  ;;  %v2352_v4 = vrot.slane %v2351_v44, 2 }
 0x1a7   : > { %v2318_v14 = vrot.slane %v2317_v3, 1  ;;  %v2353_v6 = vadd.f32 %v2352_v4, %v2351_v44 }
 0x1a9   : > { %v2319_v42 = vadd.f32 %v2318_v14, %v2317_v3  ;;  %v2354_v62 = vrot.slane %v2353_v6, 1 }
 0x1ab   : > { %2320 = vst [vmem:[%s429_s5] sm:$0x1] %v2319_v42  ;;  %v2355_v48 = vadd.f32 %v2354_v62, %v2353_v6 }
 0x1ad   : > { %2356 = vst [vmem:[%s429_s5 + $0x1] sm:$0x1] %v2355_v48 }
 0x1ae PF: > { %p11_p9 = scmp.ge.s32.totalorder %s3318_s16, 4   ;;  %s4109_s12 = smov %s3273_s13 }
 0x1af   : > { %s4110_s13 = smov %s3327_s19  ;;  %s4111_s14 = smov %s3318_s16 }
 0x1b0   :  { %13 = sbr.rel (!%p11_p9) target bundleno = 2 (0x2), region = 127 }

// kernel: _basic_block_impl.8
= control target key start
LH: loop header
LB: loop body
LE: loop exit
PB: predicated region body
PF: predicated region fallthrough
CT: control target
= control target key end

     0   :  { %s1309_s12 = smov 0   ;;  %s1311_s13 = smov 0   ;;  %s1749_s0 = inlined_call_operand.vmem [shape: bf16[4,2,100,128], index: 0, kind: input, shape index: {}]   ;;  %s1750_s1 = inlined_call_operand.vmem [shape: bf16[1,128,128], index: 1, kind: input, shape index: {}]   ;;  %s1751_s2 = inlined_call_operand.vmem [shape: f32[2,80,128], index: 2, kind: output, shape index: {0}]   ;;  %s1752_s3 = inlined_call_operand.vmem [shape: f32[2,2,128], index: 3, kind: output, shape index: {1}]  }
   0x1   :  { %s1313_s14 = smov 0  }
   0x2 LB: > { %s1114_s15 = sadd.s32 4294967295, %s1285_s14   ;;  %s1326_s16 = sadd.s32 1, %s1285_s14   ;;  %s1285_s14 = sphi %s1313_s14, %s1780_s14   ;;  %s1281_s13 = sphi %s1311_s13, %s1779_s13   ;;  %s1277_s12 = sphi %s1309_s12, %s1778_s12  }
   0x3   : > { %s18_s17 = ssub.s32 %s1285_s14, %s1326_s16  ;;  %s21_s18 = sadd.s32 1, %s1281_s13 }
   0x4   : > { %p19_p0 = scmp.eq.s32.totalorder %s18_s17, 0  ;;  %p28_p1 = scmp.ne.s32.totalorder %s1281_s13, %s1277_s12 }
   0x5   : > { %p29_p2 = scmp.eq.s32.totalorder %s1285_s14, 0  ;;  %p1117_p4 = scmp.ge.s32.totalorder %s1285_s14, 2 }
   0x6   : > { %s1335_s19 = scalar_select %p19_p0, %s1281_s13, %s21_s18  }
   0x7   : > { %p30_p3 = por %p29_p2, %p28_p1  ;;  %130 = sbr.rel (%p1117_p4) target bundleno = 45 (0x2d), region = 20 }
   0xc   : > { %133 = sbr.rel (!%p30_p3) target bundleno = 45 (0x2d), region = 24  ;;  %s135_s20 = sand.u32 (%p30_p3), 1, %s1281_s13  }
   0xd   : > { %s1234_s21 = smul.u32 (%p30_p3), 52, %s1285_s14 }
   0xe   : > { %s1233_s22 = smul.u32 (%p30_p3), 208, %s135_s20 }
   0xf   : > { %s1343_s25 = scalar_lea.vmem (%p30_p3), %s1749_s0, %s1234_s21 }
  0x10   : > { %v157_v0 = vld [vmem:[%s1343_s25] sm:$0xff] (%p30_p3)   ;;  %v161_v1 = vld [vmem:[%s1343_s25 + $0x8] sm:$0xff] (%p30_p3)   ;;  %v165_v2 = vld [vmem:[%s1343_s25 + $0x10] sm:$0xff] (%p30_p3)   ;;  %s1348_s26 = scalar_lea.vmem (%p30_p3), [#allocation2], %s1233_s22 }
  0x11   : > { %158 = vst [vmem:[%s1348_s26] sm:$0xff] %v157_v0   ;;  %v169_v3 = vld [vmem:[%s1343_s25 + $0x18] sm:$0xff]   ;;  %v173_v4 = vld [vmem:[%s1343_s25 + $0x20] sm:$0xff]   ;;  %v177_v5 = vld [vmem:[%s1343_s25 + $0x28] sm:$0xff]  }
  0x12   : > { %162 = vst [vmem:[%s1348_s26 + $0x8] sm:$0xff] %v161_v1   ;;  %v181_v6 = vld [vmem:[%s1343_s25 + $0x30] sm:$0xf]  ;;  %v183_v7 = vld [vmem:[%s1343_s25 + $0x68] sm:$0xff]   ;;  %v191_v9 = vld [vmem:[%s1343_s25 + $0x78] sm:$0xff]  }
  0x13   : > { %166 = vst [vmem:[%s1348_s26 + $0x10] sm:$0xff] %v165_v2   ;;  %v187_v8 = vld [vmem:[%s1343_s25 + $0x70] sm:$0xff]   ;;  %v195_v10 = vld [vmem:[%s1343_s25 + $0x80] sm:$0xff]   ;;  %v199_v11 = vld [vmem:[%s1343_s25 + $0x88] sm:$0xff]  }
  0x14   : > { %170 = vst [vmem:[%s1348_s26 + $0x18] sm:$0xff] %v169_v3   ;;  %v203_v12 = vld [vmem:[%s1343_s25 + $0x90] sm:$0xff]   ;;  %v207_v13 = vld [vmem:[%s1343_s25 + $0x98] sm:$0xf]  ;;  %v217_v16 = vld [vmem:[%s1343_s25 + $0xe0] sm:$0xff]  }
  0x15   : > { %174 = vst [vmem:[%s1348_s26 + $0x20] sm:$0xff] %v173_v4   ;;  %v209_v14 = vld [vmem:[%s1343_s25 + $0xd0] sm:$0xff]   ;;  %v213_v15 = vld [vmem:[%s1343_s25 + $0xd8] sm:$0xff]   ;;  %v221_v17 = vld [vmem:[%s1343_s25 + $0xe8] sm:$0xff]  }
  0x16   : > { %178 = vst [vmem:[%s1348_s26 + $0x28] sm:$0xff] %v177_v5   ;;  %v225_v18 = vld [vmem:[%s1343_s25 + $0xf0] sm:$0xff]   ;;  %v229_v19 = vld [vmem:[%s1343_s25 + $0xf8] sm:$0xff]   ;;  %v233_v20 = vld [vmem:[%s1343_s25 + $0x100] sm:$0xf] }
  0x17   : > { %182 = vst [vmem:[%s1348_s26 + $0x30] sm:$0xf] %v181_v6  ;;  %v235_v21 = vld [vmem:[%s1343_s25 + $0x138] sm:$0xff]   ;;  %v239_v22 = vld [vmem:[%s1343_s25 + $0x140] sm:$0xff]   ;;  %v243_v23 = vld [vmem:[%s1343_s25 + $0x148] sm:$0xff]  }
  0x18   : > { %184 = vst [vmem:[%s1348_s26 + $0x34] sm:$0xff] %v183_v7   ;;  %v247_v24 = vld [vmem:[%s1343_s25 + $0x150] sm:$0xff]   ;;  %v251_v25 = vld [vmem:[%s1343_s25 + $0x158] sm:$0xff]   ;;  %v255_v26 = vld [vmem:[%s1343_s25 + $0x160] sm:$0xff]  }
  0x19   : > { %188 = vst [vmem:[%s1348_s26 + $0x3c] sm:$0xff] %v187_v8   ;;  %v259_v27 = vld [vmem:[%s1343_s25 + $0x168] sm:$0xf] }
  0x1a   : > { %192 = vst [vmem:[%s1348_s26 + $0x44] sm:$0xff] %v191_v9  }
  0x1b   : > { %196 = vst [vmem:[%s1348_s26 + $0x4c] sm:$0xff] %v195_v10  }
  0x1c   : > { %200 = vst [vmem:[%s1348_s26 + $0x54] sm:$0xff] %v199_v11  }
  0x1d   : > { %204 = vst [vmem:[%s1348_s26 + $0x5c] sm:$0xff] %v203_v12  }
  0x1e   : > { %208 = vst [vmem:[%s1348_s26 + $0x64] sm:$0xf] %v207_v13 }
  0x1f   : > { %210 = vst [vmem:[%s1348_s26 + $0x68] sm:$0xff] %v209_v14  }
  0x20   : > { %214 = vst [vmem:[%s1348_s26 + $0x70] sm:$0xff] %v213_v15  }
  0x21   : > { %218 = vst [vmem:[%s1348_s26 + $0x78] sm:$0xff] %v217_v16  }
  0x22   : > { %222 = vst [vmem:[%s1348_s26 + $0x80] sm:$0xff] %v221_v17  }
  0x23   : > { %226 = vst [vmem:[%s1348_s26 + $0x88] sm:$0xff] %v225_v18  }
  0x24   : > { %230 = vst [vmem:[%s1348_s26 + $0x90] sm:$0xff] %v229_v19  }
  0x25   : > { %234 = vst [vmem:[%s1348_s26 + $0x98] sm:$0xf] %v233_v20 }
  0x26   : > { %236 = vst [vmem:[%s1348_s26 + $0x9c] sm:$0xff] %v235_v21  }
  0x27   : > { %240 = vst [vmem:[%s1348_s26 + $0xa4] sm:$0xff] %v239_v22  }
  0x28   : > { %244 = vst [vmem:[%s1348_s26 + $0xac] sm:$0xff] %v243_v23  }
  0x29   : > { %248 = vst [vmem:[%s1348_s26 + $0xb4] sm:$0xff] %v247_v24  }
  0x2a   : > { %252 = vst [vmem:[%s1348_s26 + $0xbc] sm:$0xff] %v251_v25  }
  0x2b   : > { %256 = vst [vmem:[%s1348_s26 + $0xc4] sm:$0xff] %v255_v26  }
  0x2c   : > { %260 = vst [vmem:[%s1348_s26 + $0xcc] sm:$0xf] %v259_v27 }
  0x2d PF: > { %p1119_p5 = scmp.ge.s32.totalorder %s1285_s14, 1  ;;  %p387_p6 = scmp.lt.s32.totalorder %s1285_s14, 3 }
  0x2f   : > { %p388_p7 = pnand %p1119_p5, %p387_p6 }
  0x30   : > { %s394_s17 = sand.u32 (!%p388_p7), 1, %s1277_s12   ;;  %p1482_p8 = scmp.lt.s32.totalorder (!%p388_p7), %s1114_s15, 1 }
  0x31   : > { %391 = sbr.rel (%p388_p7) target bundleno = 262 (0x106), region = 65 }
  0x32   : > { %s1235_s21 = smul.u32 (!%p388_p7), 208, %s394_s17 }
  0x34   : > { %s396_s24 = scalar_lea.vmem (!%p388_p7), [#allocation2], %s1235_s21 }
  0x36   : > { %v1208_v28 = vld [vmem:[%s1750_s1 + $0x38] sm:$0xff]  ;;  %v1207_v29 = vld [vmem:[%s1750_s1 + $0x30] sm:$0xff]  ;;  %v1206_v30 = vld [vmem:[%s1750_s1 + $0x28] sm:$0xff]  ;;  %v579_v41 = vlaneseq  ;;  %v1287_v56 = vmov 0   ;;  %s1782_s15 = smov (!%p1482_p8, %s1114_s15), 1 }
  0x37   : > { %535 = vmatpush.bf16.msra.mxu0 %v1208_v28  ;;  %1210 = vmatpush.bf16.msra.mxu2 %v1208_v28  ;;  %v1205_v31 = vld [vmem:[%s1750_s1 + $0x20] sm:$0xff]  ;;  %v1204_v32 = vld [vmem:[%s1750_s1 + $0x18] sm:$0xff]  ;;  %v1203_v33 = vld [vmem:[%s1750_s1 + $0x10] sm:$0xff]  ;;  %s1236_s14 = smul.u32 80, %s1782_s15  ;;  %s1121_s28 = sshll.u32 %s1782_s15, 1 }
  0x38   : > { %1211 = vmatpush.bf16.msra.mxu3 %v1208_v28  ;;  %1209 = vmatpush.bf16.msra.mxu1 %v1208_v28  ;;  %v1202_v34 = vld [vmem:[%s1750_s1 + $0x8] sm:$0xff]  ;;  %v1201_v35 = vld [vmem:[%s1750_s1] sm:$0xff]  ;;  %v1430_v42 = vshrl.u32 %v579_v41, 7  ;;  %s429_s4 = scalar_lea.vmem %s1752_s3, %s1121_s28 }
  0x39   : > { %v1196_v36 = vld [vmem:[%s396_s24 + $0x9c] sm:$0xff]  ;;  %v1198_v37 = vld [vmem:[%s396_s24 + $0xac] sm:$0xff]  ;;  %v1199_v38 = vld [vmem:[%s396_s24 + $0xb4] sm:$0xff]  ;;  %s1530_s27 = scalar_lea.vmem %s1751_s2, %s1236_s14 }
  0x3a   : > { %v1197_v39 = vld [vmem:[%s396_s24 + $0xa4] sm:$0xff]  ;;  %v1200_v40 = vld [vmem:[%s396_s24 + $0xbc] sm:$0xff]  ;;  %v1433_v43 = vadd.s32 48, %v1430_v42  ;;  %v593_v44 = vand.u32 65535, %v1430_v42  ;;  %v594_v45 = vshrl.u32 %v1430_v42, 16  ;;  %v1438_v47 = vadd.s32 16, %v1430_v42 }
  0x3b   : > { %536 = vmatpush.bf16.msra.mxu0 %v1207_v29  ;;  %1213 = vmatpush.bf16.msra.mxu2 %v1207_v29  ;;  %v1446_v62 = vadd.s32 32, %v1430_v42  ;;  %v1451_v0 = vadd.s32 8, %v1430_v42 }
  0x3c   : > { %1214 = vmatpush.bf16.msra.mxu3 %v1207_v29  ;;  %1212 = vmatpush.bf16.msra.mxu1 %v1207_v29  ;;  %v597_v46 = vmul.u32 52428, %v593_v44  ;;  %v767_v48 = vand.u32 65535, %v1433_v43  ;;  %v596_v49 = vmul.u32 52429, %v593_v44  ;;  %v598_v50 = vmul.u32 52429, %v594_v45 }
  0x3d   : > { %v651_v52 = vand.u32 65535, %v1438_v47  ;;  %v768_v53 = vshrl.u32 %v1433_v43, 16  ;;  %v599_v54 = vmul.u32 52428, %v594_v45  ;;  %v652_v59 = vshrl.u32 %v1438_v47, 16 }
  0x3e   : > { %v600_v51 = vshll.u32 %v597_v46, 16  ;;  %v602_v55 = vshll.u32 %v598_v50, 16  ;;  %v1448_v63 = vmul.u32 52428, %v767_v48  ;;  %v709_v6 = vand.u32 65535, %v1446_v62 }
  0x3f   : > { %537 = vmatpush.bf16.msra.mxu0 %v1206_v30  ;;  %1216 = vmatpush.bf16.msra.mxu2 %v1206_v30  ;;  %v655_v60 = vmul.u32 52428, %v651_v52  ;;  %v654_v61 = vmul.u32 52429, %v651_v52  ;;  %v656_v2 = vmul.u32 52429, %v652_v59  ;;  %v657_v5 = vmul.u32 52428, %v652_v59 }
  0x40   : > { %1217 = vmatpush.bf16.msra.mxu3 %v1206_v30  ;;  %1215 = vmatpush.bf16.msra.mxu1 %v1206_v30  ;;  %vm604_vm0 = vc.u32 %v596_v49, %v600_v51  ;;  %v606_v58 = vadd.s32 %v600_v51, %v596_v49  ;;  %v770_v7 = vmul.u32 52429, %v767_v48  ;;  %v1455_v10 = vmul.u32 52429, %v768_v53 }
  0x41   : > { %v605_v57 = vsel %vm604_vm0, 1, %v1287_v56  ;;  %v658_v3 = vshll.u32 %v655_v60, 16  ;;  %v660_v8 = vshll.u32 %v656_v2, 16  ;;  %v601_v11 = vshrl.u32 %v597_v46, 16 }
  0x42   : > { %v607_v1 = vadd.s32 %v605_v57, %v599_v54  ;;  %vm608_vm1 = vc.u32 %v606_v58, %v602_v55  ;;  %v710_v13 = vshrl.u32 %v1446_v62, 16  ;;  %v774_v14 = vshll.u32 %v1448_v63, 16 }
  0x43   : > { %538 = vmatpush.bf16.msra.mxu0 %v1205_v31  ;;  %1219 = vmatpush.bf16.msra.mxu2 %v1205_v31  ;;  %v609_v4 = vsel %vm608_vm1, 1, %v1287_v56  ;;  %vm662_vm2 = vc.u32 %v654_v61, %v658_v3  ;;  %v664_v9 = vadd.s32 %v658_v3, %v654_v61  ;;  %v712_v16 = vmul.u32 52429, %v709_v6 }
  0x44   : > { %1220 = vmatpush.bf16.msra.mxu3 %v1205_v31  ;;  %1218 = vmatpush.bf16.msra.mxu1 %v1205_v31  ;;  %v663_v12 = vsel %vm662_vm2, 1, %v1287_v56  ;;  %v611_v15 = vadd.s32 %v609_v4, %v607_v1  ;;  %v713_v17 = vmul.u32 52428, %v709_v6  ;;  %v714_v19 = vmul.u32 52429, %v710_v13 }
  0x45   : > { %vm666_vm3 = vc.u32 %v664_v9, %v660_v8  ;;  %v665_v18 = vadd.s32 %v663_v12, %v657_v5  ;;  %v715_v21 = vmul.u32 52428, %v710_v13  ;;  %v622_v23 = vand.u32 65535, %v1451_v0 }
  0x46   : > { %v667_v20 = vsel %vm666_vm3, 1, %v1287_v56  ;;  %v716_v22 = vshll.u32 %v713_v17, 16  ;;  %v718_v24 = vshll.u32 %v714_v19, 16  ;;  %v773_v25 = vmul.u32 52428, %v768_v53 }
  0x47   : > { %539 = vmatpush.bf16.msra.mxu0 %v1204_v32  ;;  %1222 = vmatpush.bf16.msra.mxu2 %v1204_v32  ;;  %v776_v26 = vshll.u32 %v1455_v10, 16  ;;  %vm778_vm4 = vc.u32 %v770_v7, %v774_v14  ;;  %v603_v27 = vshrl.u32 %v598_v50, 16  ;;  %v612_v28 = vadd.s32 %v611_v15, %v601_v11 }
  0x48   : > { %1223 = vmatpush.bf16.msra.mxu3 %v1204_v32  ;;  %1221 = vmatpush.bf16.msra.mxu1 %v1204_v32  ;;  %vm720_vm5 = vc.u32 %v712_v16, %v716_v22  ;;  %v722_v29 = vadd.s32 %v716_v22, %v712_v16  ;;  %v659_v30 = vshrl.u32 %v655_v60, 16  ;;  %v669_v31 = vadd.s32 %v667_v20, %v665_v18 }
  0x49   : > { %v721_v32 = vsel %vm720_vm5, 1, %v1287_v56  ;;  %v661_v41 = vshrl.u32 %v656_v2, 16  ;;  %v626_v46 = vmul.u32 52428, %v622_v23  ;;  %v719_v50 = vshrl.u32 %v714_v19, 16 }
  0x4a   : > { %vm724_vm6 = vc.u32 %v722_v29, %v718_v24  ;;  %v670_v44 = vadd.s32 %v669_v31, %v659_v30  ;;  %v625_v52 = vmul.u32 52429, %v622_v23  ;;  %v1469_v55 = vadd.s32 24, %v1430_v42 }
  0x4b   : > { %540 = vmatpush.bf16.msra.mxu0 %v1203_v33  ;;  %1225 = vmatpush.bf16.msra.mxu2 %v1203_v33  ;;  %v629_v53 = vshll.u32 %v626_v46, 16  ;;  %v775_v58 = vshrl.u32 %v1448_v63, 16  ;;  %v777_v8 = vshrl.u32 %v1455_v10, 16  ;;  %v630_v12 = vshrl.u32 %v626_v46, 16 }
  0x4c   : > { %1226 = vmatpush.bf16.msra.mxu3 %v1203_v33  ;;  %1224 = vmatpush.bf16.msra.mxu1 %v1203_v33  ;;  %v780_v33 = vadd.s32 %v774_v14, %v770_v7  ;;  %v671_v57 = vadd.s32 %v670_v44, %v661_v41  ;;  %v680_v5 = vand.u32 65535, %v1469_v55  ;;  %v681_v6 = vshrl.u32 %v1469_v55, 16 }
  0x4d   : > { %vm633_vm8 = vc.u32 %v625_v52, %v629_v53  ;;  %v635_v2 = vadd.s32 %v629_v53, %v625_v52 }
  0x4e   : > { %vm782_vm7 = vc.u32 %v780_v33, %v776_v26  ;;  %v634_v4 = vsel %vm633_vm8, 1, %v1287_v56  ;;  %v672_v7 = vshrl.u32 %v671_v57, 3  ;;  %v683_v63 = vmul.u32 52429, %v680_v5 }
  0x4f   : > { %541 = vmatpush.bf16.msra.mxu0 %v1202_v34  ;;  %1228 = vmatpush.bf16.msra.mxu2 %v1202_v34  ;;  %v783_v48 = vsel %vm782_vm7, 1, %v1287_v56  ;;  %v684_v13 = vmul.u32 52428, %v680_v5  ;;  %v685_v16 = vmul.u32 52429, %v681_v6  ;;  %v686_v10 = vmul.u32 52428, %v681_v6 }
  0x50   : > { %1229 = vmatpush.bf16.msra.mxu3 %v1202_v34  ;;  %1227 = vmatpush.bf16.msra.mxu1 %v1202_v34  ;;  %v723_v34 = vadd.s32 %v721_v32, %v715_v21  ;;  %v673_v21 = vmul.u32 10, %v672_v7  ;;  %v1496_v33 = vadd.s32 40, %v1430_v42 }
  0x51   : > { %v687_v20 = vshll.u32 %v684_v13, 16  ;;  %v689_v24 = vshll.u32 %v685_v16, 16  ;;  %v690_v41 = vshrl.u32 %v685_v16, 16 }
  0x52   : > { %v1493_v30 = vsub.s32 %v1438_v47, %v673_v21  ;;  %v739_v47 = vshrl.u32 %v1496_v33, 16 }
  0x53   : > { %542 = vmatpush.bf16.msra.mxu0 %v1201_v35  ;;  %1231 = vmatpush.bf16.msra.mxu2 %v1201_v35  ;;  %vm691_vm10 = vc.u32 %v683_v63, %v687_v20  ;;  %v693_v29 = vadd.s32 %v687_v20, %v683_v63  ;;  %v1555_v20 = vadd.s32 64, %v1430_v42 }
  0x54   : > { %1232 = vmatpush.bf16.msra.mxu3 %v1201_v35  ;;  %1230 = vmatpush.bf16.msra.mxu1 %v1201_v35  ;;  %v779_v35 = vsel %vm778_vm4, 1, %v1287_v56  ;;  %vm882_vm14 = vcmp.ne.s32.totalorder %v1493_v30, 0  ;;  %vm892_vm15 = vcmp.lt.s32.totalorder %v1493_v30, 0  ;;  %v912_v52 = vadd.s32 10, %v1493_v30 }
  0x55   : > { %v781_v45 = vadd.s32 %v779_v35, %v773_v25  ;;  %v688_v35 = vshrl.u32 %v684_v13, 16  ;;  %vm695_vm13 = vc.u32 %v693_v29, %v689_v24  ;;  %v744_v53 = vmul.u32 52428, %v739_v47 }
  0x56   : > { %543 = vmatmul.bf16.vlgmr.msra.gmra.mxu0 %v1196_v36  ;;  %553 = vmatmul.bf16.vlgmr.msra.gmra.mxu2 %v1198_v37  ;;  %v623_v36 = vshrl.u32 %v1451_v0, 16  ;;  %v717_v37 = vshrl.u32 %v713_v17, 16 }
  0x57   : > { %558 = vmatmul.bf16.vlgmr.msra.gmra.mxu3 %v1199_v38  ;;  %548 = vmatmul.bf16.vlgmr.msra.gmra.mxu1 %v1197_v39  ;;  %v725_v38 = vsel %vm724_vm6, 1, %v1287_v56  ;;  %v613_v39 = vadd.s32 %v612_v28, %v603_v27  ;;  %v785_v59 = vadd.s32 %v783_v48, %v781_v45  ;;  %v692_v28 = vsel %vm691_vm10, 1, %v1287_v56  ;;  %vm1545_vm6 = vmand %vm892_vm15, %vm882_vm14 }
  0x58   : > { %v627_v49 = vmul.u32 52429, %v623_v36  ;;  %v628_v60 = vmul.u32 52428, %v623_v36  ;;  %v694_v32 = vadd.s32 %v692_v28, %v686_v10  ;;  %v1499_v36 = vadd.s32 56, %v1430_v42 }
  0x59   : > { %v614_v54 = vshrl.u32 %v613_v39, 3  ;;  %v786_v9 = vadd.s32 %v785_v59, %v775_v58  ;;  %v738_v39 = vand.u32 65535, %v1496_v33 }
  0x5a   : > { %v631_v61 = vshll.u32 %v627_v49, 16  ;;  %v636_v11 = vadd.s32 %v634_v4, %v628_v60  ;;  %v632_v18 = vshrl.u32 %v627_v49, 16  ;;  %v796_v45 = vand.u32 65535, %v1499_v36 }
  0x5b   : > { %v615_v3 = vmul.u32 10, %v614_v54  ;;  %v787_v22 = vadd.s32 %v786_v9, %v777_v8  ;;  %v741_v46 = vmul.u32 52429, %v738_v39  ;;  %v742_v48 = vmul.u32 52428, %v738_v39 }
  0x5c   : > { %vm637_vm9 = vc.u32 %v635_v2, %v631_v61  ;;  %v797_v49 = vshrl.u32 %v1499_v36, 16 }
  0x5d   : > { %v638_v15 = vsel %vm637_vm9, 1, %v1287_v56  ;;  %v1478_v17 = vsub.s32 %v1430_v42, %v615_v3  ;;  %v788_v31 = vshrl.u32 %v787_v22, 3  ;;  %v745_v54 = vshll.u32 %v742_v48, 16 }
  0x5e   : > { %v640_v19 = vadd.s32 %v638_v15, %v636_v11  ;;  %v1523_v2 = vmul.u32 52429, %v797_v49  ;;  %v746_v4 = vshrl.u32 %v742_v48, 16  ;;  %v802_v9 = vmul.u32 52428, %v797_v49 }
  0x5f   : > { %v1487_v26 = vadd.s32 10, %v1478_v17  ;;  %vm880_vm11 = vcmp.ne.s32.totalorder %v1478_v17, 0  ;;  %vm890_vm12 = vcmp.lt.s32.totalorder %v1478_v17, 0  ;;  %v789_v58 = vmul.u32 10, %v788_v31 }
  0x60   : > { %v641_v23 = vadd.s32 %v640_v19, %v630_v12  ;;  %vm749_vm1 = vc.u32 %v741_v46, %v745_v54  ;;  %v751_v61 = vadd.s32 %v745_v54, %v741_v46  ;;  %vm1536_vm3 = vmand %vm890_vm12, %vm880_vm11  ;;  %v826_v48 = vshrl.u32 %v1555_v20, 16 }
  0x61   : > { %v750_v5 = vsel %vm749_vm1, 1, %v1287_v56  ;;  %v920_v24 = vsel %vm1536_vm3, %v1487_v26, %v1478_v17  ;;  %v1585_v31 = vsub.s32 %v1433_v43, %v789_v58 }
  0x62   : > { %v642_v27 = vadd.s32 %v641_v23, %v632_v18  ;;  %v752_v8 = vadd.s32 %v750_v5, %v744_v53  ;;  %vm1592_vm12 = vcmp.lt.s32.totalorder %v920_v24, 8  ;;  %v1288_v53 = vmov 0.0  }
  0x63   : > { %vm896_vm1 = vcmp.lt.s32.totalorder %v1585_v31, 0  ;;  %v1650_v5 = vmul.u32 52429, %v826_v48 }
  0x67   : > { %563 = vmatmul.bf16.gmra.mxu3 %v1200_v40  ;;  %v727_v40 = vadd.s32 %v725_v38, %v723_v34  ;;  %v643_v34 = vshrl.u32 %v642_v27, 3  ;;  %v696_v38 = vsel %vm695_vm13, 1, %v1287_v56 }
  0x68   : > { %v698_v44 = vadd.s32 %v696_v38, %v694_v32 }
  0x69   : > { %v728_v51 = vadd.s32 %v727_v40, %v717_v37  ;;  %v644_v40 = vmul.u32 10, %v643_v34 }
  0x6b   : > { %v729_v1 = vadd.s32 %v728_v51, %v719_v50  ;;  %v699_v50 = vadd.s32 %v698_v44, %v688_v35  ;;  %v1517_v51 = vmul.u32 52428, %v796_v45  ;;  %v645_v59 = vsub.s32 %v1451_v0, %v644_v40 }
  0x6c   : > { %v806_v40 = vshrl.u32 %v1523_v2, 16 }
  0x6d   : > { %v730_v14 = vshrl.u32 %v729_v1, 3  ;;  %v700_v60 = vadd.s32 %v699_v50, %v690_v41  ;;  %v799_v1 = vmul.u32 52429, %v796_v45  ;;  %v803_v6 = vshll.u32 %v1517_v51, 16 }
  0x6e   : > { %vm881_vm4 = vcmp.ne.s32.totalorder %v645_v59, 0  ;;  %vm891_vm5 = vcmp.lt.s32.totalorder %v645_v59, 0  ;;  %v911_v18 = vadd.s32 10, %v645_v59  ;;  %v1619_v50 = vadd.s32 10, %v1585_v31 }
  0x6f   : > { %v731_v25 = vmul.u32 10, %v730_v14  ;;  %v701_v3 = vshrl.u32 %v700_v60, 3  ;;  %v805_v14 = vshll.u32 %v1523_v2, 16  ;;  %vm807_vm7 = vc.u32 %v799_v1, %v803_v6  ;;  %vm1563_vm9 = vmand %vm891_vm5, %vm881_vm4 }
  0x70   : > { %v809_v15 = vadd.s32 %v803_v6, %v799_v1  ;;  %v808_v19 = vsel %vm807_vm7, 1, %v1287_v56  ;;  %v921_v26 = vsel %vm1563_vm9, %v911_v18, %v645_v59  ;;  %v1631_v59 = vadd.s32 72, %v1430_v42 }
  0x71   : > { %v1502_v37 = vsub.s32 %v1446_v62, %v731_v25  ;;  %v743_v62 = vmul.u32 52429, %v739_v47  ;;  %v702_v11 = vmul.u32 10, %v701_v3  ;;  %v810_v23 = vadd.s32 %v808_v19, %v802_v9 }
  0x72   : > { %v922_v25 = vsel %vm1545_vm6, %v912_v52, %v1493_v30  ;;  %vm811_vm11 = vc.u32 %v809_v15, %v805_v14  ;;  %v804_v30 = vshrl.u32 %v1517_v51, 16  ;;  %v1184_v60 = vsel %vm1592_vm12, 1.0, %v1288_v53 }
  0x73   : > { %v747_v57 = vshll.u32 %v743_v62, 16  ;;  %vm884_vm0 = vcmp.ne.s32.totalorder %v1502_v37, 0  ;;  %v748_v7 = vshrl.u32 %v743_v62, 16  ;;  %vm894_vm8 = vcmp.lt.s32.totalorder %v1502_v37, 0 }
  0x74   : > { %v914_v27 = vadd.s32 10, %v1502_v37  ;;  %v703_v28 = vsub.s32 %v1469_v55, %v702_v11  ;;  %vm1580_vm10 = vmand %vm894_vm8, %vm884_vm0  ;;  %v812_v32 = vsel %vm811_vm11, 1, %v1287_v56  ;;  %v825_v55 = vand.u32 65535, %v1555_v20 }
  0x75   : > { %vm753_vm2 = vc.u32 %v751_v61, %v747_v57  ;;  %vm1596_vm13 = vcmp.lt.s32.totalorder %v922_v25, 8  ;;  %v814_v38 = vadd.s32 %v812_v32, %v810_v23  ;;  %vm886_vm0 = vcmp.ne.s32.totalorder %v1585_v31, 0 }
  0x76   : > { %v754_v12 = vsel %vm753_vm2, 1, %v1287_v56  ;;  %v924_v47 = vsel %vm1580_vm10, %v914_v27, %v1502_v37  ;;  %vm883_vm14 = vcmp.ne.s32.totalorder %v703_v28, 0  ;;  %vm893_vm15 = vcmp.lt.s32.totalorder %v703_v28, 0  ;;  %vm1643_vm5 = vmand %vm896_vm1, %vm886_vm0 }
  0x77   : > { %v756_v13 = vadd.s32 %v754_v12, %v752_v8  ;;  %vm931_vm2 = vcmp.lt.s32.totalorder %v921_v26, 8  ;;  %v913_v46 = vadd.s32 10, %v703_v28  ;;  %v815_v37 = vadd.s32 %v814_v38, %v804_v30  ;;  %vm1624_vm4 = vmand %vm893_vm15, %vm883_vm14 }
  0x78   : > { %v1612_v62 = vmul.u32 52428, %v825_v55  ;;  %vm1614_vm3 = vcmp.lt.s32.totalorder %v924_v47, 8  ;;  %v1185_v54 = vsel %vm931_vm2, 1.0, %v1288_v53  ;;  %v828_v58 = vmul.u32 52429, %v825_v55 }
  0x79   : > { %v757_v10 = vadd.s32 %v756_v13, %v746_v4  ;;  %v816_v57 = vadd.s32 %v815_v37, %v806_v40  ;;  %v1186_v61 = vsel %vm1596_vm13, 1.0, %v1288_v53  ;;  %v923_v3 = vsel %vm1624_vm4, %v913_v46, %v703_v28 }
  0x7a   : > { %v832_v6 = vshll.u32 %v1612_v62, 16  ;;  %v926_v11 = vsel %vm1643_vm5, %v1619_v50, %v1585_v31  ;;  %v854_v63 = vand.u32 65535, %v1631_v59  ;;  %vm1668_vm7 = vcmp.lt.s32.totalorder %v923_v3, 8 }
  0x7b   : > { %v758_v17 = vadd.s32 %v757_v10, %v748_v7  ;;  %v817_v4 = vshrl.u32 %v816_v57, 3  ;;  %v834_v19 = vshll.u32 %v1650_v5, 16  ;;  %v1187_v30 = vsel %vm1668_vm7, 1.0, %v1288_v53 }
  0x7c   : > { %vm836_vm6 = vc.u32 %v828_v58, %v832_v6  ;;  %v833_v43 = vshrl.u32 %v1612_v62, 16  ;;  %v857_v40 = vmul.u32 52429, %v854_v63  ;;  %vm936_vm2 = vcmp.lt.s32.totalorder %v926_v11, 8 }
  0x7d   : > { %v759_v35 = vshrl.u32 %v758_v17, 3  ;;  %v818_v18 = vmul.u32 10, %v817_v4  ;;  %v837_v22 = vsel %vm836_vm6, 1, %v1287_v56  ;;  %v838_v17 = vadd.s32 %v832_v6, %v828_v58 }
  0x7f   : > { %v760_v44 = vmul.u32 10, %v759_v35  ;;  %v819_v34 = vsub.s32 %v1499_v36, %v818_v18  ;;  %vm840_vm11 = vc.u32 %v838_v17, %v834_v19  ;;  %v858_v35 = vmul.u32 52428, %v854_v63 }
  0x80   : > { %v841_v47 = vsel %vm840_vm11, 1, %v1287_v56 }
  0x81   : > { %v761_v42 = vsub.s32 %v1496_v33, %v760_v44  ;;  %v1188_v33 = vsel %vm1614_vm3, 1.0, %v1288_v53  ;;  %v861_v52 = vshll.u32 %v858_v35, 16  ;;  %vm887_vm12 = vcmp.ne.s32.totalorder %v819_v34, 0 }
  0x82   : > { %vm897_vm13 = vcmp.lt.s32.totalorder %v819_v34, 0 }
  0x83   : > { %vm885_vm8 = vcmp.ne.s32.totalorder %v761_v42, 0  ;;  %vm895_vm9 = vcmp.lt.s32.totalorder %v761_v42, 0  ;;  %v915_v29 = vadd.s32 10, %v761_v42  ;;  %vm865_vm15 = vc.u32 %v857_v40, %v861_v52  ;;  %vm1703_vm0 = vmand %vm897_vm13, %vm887_vm12 }
  0x84   : > { %vm1686_vm10 = vmand %vm895_vm9, %vm885_vm8 }
  0x85   : > { %v925_v44 = vsel %vm1686_vm10, %v915_v29, %v761_v42  ;;  %v866_v42 = vsel %vm865_vm15, 1, %v1287_v56 }
  0x86   : > { %vm935_vm14 = vcmp.lt.s32.totalorder %v925_v44, 8 }
  0xd3   : > { %v1550_v16 = vpop.f32.mrf.mxu0 }
  0xd4   : > { %569 = vst [vmem:[%s1530_s27] sm:$0xff] %v1550_v16  ;;  %v1559_v21 = vpop.f32.mrf.mxu1  ;;  %v986_v7 = vmul.f32 %v1550_v16, %v1550_v16  ;;  %v960_v0 = vmul.f32 %v1184_v60, %v1550_v16  ;;  %v831_v16 = vmul.u32 52428, %v826_v48 }
  0xd5   : > { %571 = vst [vmem:[%s1530_s27 + $0x10] sm:$0xff] %v1559_v21  ;;  %v988_v8 = vmul.f32 %v1559_v21, %v1559_v21  ;;  %v962_v23 = vmul.f32 %v1186_v61, %v1559_v21  ;;  %v855_v21 = vshrl.u32 %v1631_v59, 16 }
  0xd6   : > { %v996_v10 = vmul.f32 %v1184_v60, %v986_v7  ;;  %v839_v55 = vadd.s32 %v837_v22, %v831_v16  ;;  %v1189_v7 = vsel %vm935_vm14, 1.0, %v1288_v53 }
  0xd7   : > { %v998_v24 = vmul.f32 %v1186_v61, %v988_v8  ;;  %v859_v37 = vmul.u32 52429, %v855_v21  ;;  %v860_v62 = vmul.u32 52428, %v855_v21  ;;  %v917_v61 = vadd.s32 10, %v819_v34 }
  0xd8   : > { %v843_v46 = vadd.s32 %v841_v47, %v839_v55 }
  0xd9   : > { %v554_v39 = vpop.f32.mrf.mxu2  ;;  %v863_v57 = vshll.u32 %v859_v37, 16  ;;  %v868_v6 = vadd.s32 %v866_v42, %v860_v62  ;;  %v864_v16 = vshrl.u32 %v859_v37, 16 }
  0xda   : > { %573 = vst [vmem:[%s1530_s27 + $0x20] sm:$0xff] %v554_v39  ;;  %v1605_v41 = vpop.f32.mrf.mxu3  ;;  %v964_v27 = vmul.f32 %v1188_v33, %v554_v39  ;;  %v990_v28 = vmul.f32 %v554_v39, %v554_v39 }
  0xdb   : > { %575 = vst [vmem:[%s1530_s27 + $0x30] sm:$0xff] %v1605_v41  ;;  %v546_v45 = vpop.f32.mrf.mxu0  ;;  %v992_v11 = vmul.f32 %v1605_v41, %v1605_v41 }
  0xdc   : > { %570 = vst [vmem:[%s1530_s27 + $0x8] sm:$0xff] %v546_v45  ;;  %v551_v51 = vpop.f32.mrf.mxu1  ;;  %v987_v2 = vmul.f32 %v546_v45, %v546_v45  ;;  %v961_v9 = vmul.f32 %v1185_v54, %v546_v45  ;;  %v835_v45 = vshrl.u32 %v1650_v5, 16  ;;  %v1000_v3 = vmul.f32 %v1188_v33, %v990_v28 }
  0xdd   : > { %572 = vst [vmem:[%s1530_s27 + $0x18] sm:$0xff] %v551_v51  ;;  %v989_v39 = vmul.f32 %v551_v51, %v551_v51  ;;  %v963_v48 = vmul.f32 %v1187_v30, %v551_v51  ;;  %v867_v51 = vadd.s32 %v861_v52, %v857_v40 }
  0xde   : > { %v997_v13 = vmul.f32 %v1185_v54, %v987_v2  ;;  %v970_v25 = vadd.f32 %v961_v9, %v960_v0  ;;  %v844_v54 = vadd.s32 %v843_v46, %v833_v43  ;;  %v862_v9 = vshrl.u32 %v858_v35, 16 }
  0xdf   : > { %v999_v60 = vmul.f32 %v1187_v30, %v989_v39  ;;  %vm869_vm1 = vc.u32 %v867_v51, %v863_v57 }
  0xe0   : > { %v1006_v26 = vadd.f32 %v997_v13, %v996_v10  ;;  %v971_v38 = vadd.f32 %v970_v25, %v962_v23  ;;  %v845_v2 = vadd.s32 %v844_v54, %v835_v45  ;;  %v870_v63 = vsel %vm869_vm1, 1, %v1287_v56 }
  0xe1   : > { %v1665_v12 = vpop.f32.mrf.mxu2  ;;  %v927_v13 = vsel %vm1703_vm0, %v917_v61, %v819_v34  ;;  %v872_v18 = vadd.s32 %v870_v63, %v868_v6  ;;  %v1190_v10 = vsel %vm936_vm2, 1.0, %v1288_v53 }
  0xe2   : > { %574 = vst [vmem:[%s1530_s27 + $0x28] sm:$0xff] %v1665_v12  ;;  %v1674_v15 = vpop.f32.mrf.mxu3  ;;  %v1007_v49 = vadd.f32 %v1006_v26, %v998_v24  ;;  %v972_v58 = vadd.f32 %v971_v38, %v963_v48  ;;  %v846_v8 = vshrl.u32 %v845_v2, 3  ;;  %v991_v0 = vmul.f32 %v1665_v12, %v1665_v12 }
  0xe3   : > { %576 = vst [vmem:[%s1530_s27 + $0x38] sm:$0xff] %v1674_v15  ;;  %v965_v19 = vmul.f32 %v1189_v7, %v1665_v12  ;;  %v873_v50 = vadd.s32 %v872_v18, %v862_v9  ;;  %vm937_vm3 = vcmp.lt.s32.totalorder %v927_v13, 8  ;;  %v966_v12 = vmul.f32 %v1190_v10, %v1605_v41 }
  0xe4   : > { %v1008_v4 = vadd.f32 %v1007_v49, %v999_v60  ;;  %v973_v33 = vadd.f32 %v972_v58, %v964_v27  ;;  %v847_v14 = vmul.u32 10, %v846_v8  ;;  %v1001_v23 = vmul.f32 %v1189_v7, %v991_v0 }
  0xe5   : > { %v874_v25 = vadd.s32 %v873_v50, %v864_v16  ;;  %v1002_v17 = vmul.f32 %v1190_v10, %v992_v11  ;;  %v993_v26 = vmul.f32 %v1674_v15, %v1674_v15 }
  0xe6   : > { %v1009_v22 = vadd.f32 %v1008_v4, %v1000_v3  ;;  %v848_v31 = vsub.s32 %v1555_v20, %v847_v14  ;;  %v974_v56 = vadd.f32 %v973_v33, %v965_v19  ;;  %v1191_v20 = vsel %vm937_vm3, 1.0, %v1288_v53 }
  0xe7   : > { %v875_v29 = vshrl.u32 %v874_v25, 3  ;;  %v967_v34 = vmul.f32 %v1191_v20, %v1674_v15  ;;  %v1003_v35 = vmul.f32 %v1191_v20, %v993_v26 }
  0xe8   : > { %vm888_vm4 = vcmp.ne.s32.totalorder %v848_v31, 0  ;;  %vm898_vm5 = vcmp.lt.s32.totalorder %v848_v31, 0  ;;  %v918_v24 = vadd.s32 10, %v848_v31  ;;  %v1010_v27 = vadd.f32 %v1009_v22, %v1001_v23 }
  0xe9   : > { %vm908_vm6 = vmand %vm898_vm5, %vm888_vm4  ;;  %v975_v30 = vadd.f32 %v974_v56, %v966_v12  ;;  %v876_v32 = vmul.u32 10, %v875_v29 }
  0xea   : > { %v1697_v36 = vpop.f32.mrf.mxu3  ;;  %v928_v28 = vsel %vm908_vm6, %v918_v24, %v848_v31  ;;  %v1011_v55 = vadd.f32 %v1010_v27, %v1002_v17 }
  0xeb   : > { %577 = vst [vmem:[%s1530_s27 + $0x40] sm:$0xff] %v1697_v36  ;;  %vm938_vm7 = vcmp.lt.s32.totalorder %v928_v28, 8  ;;  %v994_v21 = vmul.f32 %v1697_v36, %v1697_v36  ;;  %v877_v41 = vsub.s32 %v1631_v59, %v876_v32  ;;  %v976_v38 = vadd.f32 %v975_v30, %v967_v34 }
  0xec   : > { %v1192_v43 = vsel %vm938_vm7, 1.0, %v1288_v53  ;;  %v1012_v47 = vadd.f32 %v1011_v55, %v1003_v35 }
  0xed   : > { %vm889_vm8 = vcmp.ne.s32.totalorder %v877_v41, 0  ;;  %vm899_vm9 = vcmp.lt.s32.totalorder %v877_v41, 0  ;;  %v919_v39 = vadd.s32 10, %v877_v41  ;;  %v968_v40 = vmul.f32 %v1192_v43, %v1697_v36 }
  0xee   : > { %v1004_v44 = vmul.f32 %v1192_v43, %v994_v21  ;;  %vm909_vm10 = vmand %vm899_vm9, %vm889_vm8 }
  0xef   : > { %v929_v46 = vsel %vm909_vm10, %v919_v39, %v877_v41  ;;  %v977_v37 = vadd.f32 %v976_v38, %v968_v40 }
  0xf0   : > { %vm939_vm11 = vcmp.lt.s32.totalorder %v929_v46, 8  ;;  %v1013_v48 = vadd.f32 %v1012_v47, %v1004_v44 }
  0xf1   : > { %v1193_v15 = vsel %vm939_vm11, 1.0, %v1288_v53 }
  0xf2   : > { %v566_v1 = vpop.f32.mrf.mxu3 }
  0xf3   : > { %578 = vst [vmem:[%s1530_s27 + $0x48] sm:$0xff] %v566_v1  ;;  %v995_v45 = vmul.f32 %v566_v1, %v566_v1  ;;  %v969_v49 = vmul.f32 %v1193_v15, %v566_v1 }
  0xf5   : > { %v1005_v59 = vmul.f32 %v1193_v15, %v995_v45  ;;  %v978_v62 = vadd.f32 %v977_v37, %v969_v49 }
  0xf7   : > { %v1014_v52 = vadd.f32 %v1013_v48, %v1005_v59  ;;  %v979_v54 = vrot.slane %v978_v62, 4 }
  0xf9   : > { %v1015_v57 = vrot.slane %v1014_v52, 4  ;;  %v980_v58 = vadd.f32 %v979_v54, %v978_v62 }
  0xfb   : > { %v1016_v60 = vadd.f32 %v1015_v57, %v1014_v52  ;;  %v981_v61 = vrot.slane %v980_v58, 2 }
  0xfd   : > { %v1017_v36 = vrot.slane %v1016_v60, 2  ;;  %v982_v2 = vadd.f32 %v981_v61, %v980_v58 }
  0xff   : > { %v1018_v42 = vadd.f32 %v1017_v36, %v1016_v60  ;;  %v983_v51 = vrot.slane %v982_v2, 1 }
 0x101   : > { %v1019_v3 = vrot.slane %v1018_v42, 1  ;;  %v984_v53 = vadd.f32 %v983_v51, %v982_v2 }
 0x103   : > { %v1020_v4 = vadd.f32 %v1019_v3, %v1018_v42  ;;  %985 = vst [vmem:[%s429_s4] sm:$0x1] %v984_v53 }
 0x105   : > { %1021 = vst [vmem:[%s429_s4 + $0x1] sm:$0x1] %v1020_v4 }
 0x106 PF: > { %p11_p9 = scmp.ge.s32.totalorder %s1326_s16, 4   ;;  %s1778_s12 = smov %s1281_s13 }
 0x107   : > { %s1779_s13 = smov %s1335_s19  ;;  %s1780_s14 = smov %s1326_s16 }
 0x108   :  { %13 = sbr.rel (!%p11_p9) target bundleno = 2 (0x2), region = 117 }

// kernel: _basic_block_impl.7
= control target key start
LH: loop header
LB: loop body
LE: loop exit
PB: predicated region body
PF: predicated region fallthrough
CT: control target
= control target key end

     0   :  { %s2707_s12 = smov 0   ;;  %s3475_s0 = inlined_call_operand.vmem [shape: bf16[1,2,110,128], index: 0, kind: input, shape index: {}]   ;;  %s3476_s1 = inlined_call_operand.vmem [shape: bf16[9,128,128], index: 1, kind: input, shape index: {}]   ;;  %s3477_s2 = inlined_call_operand.vmem [shape: f32[2,80,128], index: 2, kind: output, shape index: {0}]   ;;  %s3478_s3 = inlined_call_operand.vmem [shape: f32[2,2,128], index: 3, kind: output, shape index: {1}]  }
   0x1 LB: > { %s2074_s13 = sadd.s32 4294967295, %s2683_s12   ;;  %p2078_p0 = scmp.ge.s32.totalorder %s2683_s12, 1  ;;  %s2683_s12 = sphi %s2707_s12, %s14_s12  }
   0x2   : > { %p140_p1 = scmp.lt.s32.totalorder %s2683_s12, 3 }
   0x4   : > { %p141_p2 = pnand %p2078_p0, %p140_p1 }
   0x5   : > { %p168_p3 = scmp.lt.s32.totalorder (!%p141_p2), %s2074_s13, 1 }
   0x6   : > { %144 = sbr.rel (%p141_p2) target bundleno = 387 (0x183), region = 28 }
   0xb   : > { %v2577_v0 = vld [vmem:[%s3476_s1 + $0x78] sm:$0xff]  ;;  %v2576_v1 = vld [vmem:[%s3476_s1 + $0x70] sm:$0xff]  ;;  %s3510_s13 = smov (!%p168_p3, %s2074_s13), 1  ;;  %v2575_v4 = vld [vmem:[%s3476_s1 + $0x68] sm:$0xff]  ;;  %vm254_vm0 = vsmask.f32 7424 }
   0xc   : > { %352 = vmatpush.bf16.msra.mxu0 %v2577_v0  ;;  %2649 = vmatpush.bf16.msra.mxu1 %v2577_v0  ;;  %v2597_v2 = vld [vmem:[%s3476_s1 + $0xf8] sm:$0xff]  ;;  %v2596_v3 = vld [vmem:[%s3476_s1 + $0xf0] sm:$0xff]  ;;  %s2665_s24 = smul.u32 56, %s3510_s13  ;;  %v2595_v5 = vld [vmem:[%s3476_s1 + $0xe8] sm:$0xff]  ;;  %vm494_vm1 = vcmask 1046528   ;;  %vm960_vm4 = vcmask 1045504  }
   0xd   : > { %2650 = vmatpush.bf16.msra.mxu2 %v2577_v0  ;;  %723 = vmatpush.bf16.msra.mxu3 %v2597_v2  ;;  %v2574_v6 = vld [vmem:[%s3476_s1 + $0x60] sm:$0xff]  ;;  %v2573_v9 = vld [vmem:[%s3476_s1 + $0x58] sm:$0xff]  ;;  %v2572_v17 = vld [vmem:[%s3476_s1 + $0x50] sm:$0xff]  ;;  %vm788_vm2 = vsmask.f32 6400  ;;  %vm1426_vm5 = vcmask 1044480  }
   0xe   : > { %s2742_s4 = scalar_lea.vmem %s3475_s0, %s2665_s24  ;;  %v2594_v7 = vld [vmem:[%s3476_s1 + $0xe0] sm:$0xff]  ;;  %v2593_v14 = vld [vmem:[%s3476_s1 + $0xd8] sm:$0xff]  ;;  %v2592_v24 = vld [vmem:[%s3476_s1 + $0xd0] sm:$0xff]  ;;  %vm1254_vm3 = vsmask.f32 5376  ;;  %s2081_s20 = sshll.u32 %s3510_s13, 1 }
   0xf   : > { %v208_v8 = vld [vmem:[%s2742_s4 + $0x28] sm:$0x1]  ;;  %v2752_v10 = vld [vmem:[%s2742_s4] sm:$0xff]   ;;  %v2755_v11 = vld [vmem:[%s2742_s4 + $0x10] sm:$0xff]  ;;  %s181_s23 = scalar_lea.vmem %s3478_s3, %s2081_s20 }
  0x10   : > { %353 = vmatpush.bf16.msra.mxu0 %v2576_v1  ;;  %2651 = vmatpush.bf16.msra.mxu1 %v2576_v1  ;;  %v2758_v12 = vld [vmem:[%s2742_s4 + $0x20] sm:$0xff]  ;;  %v247_v13 = vunpack.c.l.b16 %v208_v8  ;;  %v2764_v15 = vld [vmem:[%s2742_s4 + $0x8] sm:$0xff]  ;;  %v258_v16 = vshll.u32 %v2752_v10, 16  ;;  %v2771_v18 = vld [vmem:[%s2742_s4 + $0x18] sm:$0xff]  ;;  %v271_v19 = vshll.u32 %v2755_v11, 16  ;;  %v256_v25 = vshrl.u32 %v2752_v10, 16 }
  0x11   : > { %2652 = vmatpush.bf16.msra.mxu2 %v2576_v1  ;;  %724 = vmatpush.bf16.msra.mxu3 %v2596_v3  ;;  %v287_v21 = vshll.u32 %v2758_v12, 16  ;;  %v603_v22 = vld [vmem:[%s2742_s4 + $0x4] sm:$0xe]  ;;  %v2779_v23 = vld [vmem:[%s2742_s4 + $0x8] sm:$0xff]   ;;  %v263_v27 = vshll.u32 %v2764_v15, 16  ;;  %v275_v28 = vshrl.u32 %v2755_v11, 16 }
  0x12   : > { %v2774_v20 = vpack.c.b16 %v247_v13, %v247_v13  ;;  %v260_v26 = vrot.slane %v258_v16, 1  ;;  %v2571_v29 = vld [vmem:[%s3476_s1 + $0x48] sm:$0xff]  ;;  %v2790_v30 = vrot.slane %v271_v19, 1  ;;  %v279_v31 = vshll.u32 %v2771_v18, 16  ;;  %v2570_v39 = vld [vmem:[%s3476_s1 + $0x40] sm:$0xff]  ;;  %v2569_v45 = vld [vmem:[%s3476_s1 + $0x38] sm:$0xff] }
  0x13   : > { %v642_v32 = vunpack.c.l.b16 %v603_v22  ;;  %v643_v33 = vunpack.c.l.b16 %v2779_v23  ;;  %v2794_v34 = vrot.slane %v287_v21, 1  ;;  %v291_v35 = vshrl.u32 %v2758_v12, 16  ;;  %v2591_v37 = vld [vmem:[%s3476_s1 + $0xc8] sm:$0xff]  ;;  %v2585_v48 = vld [vmem:[%s3476_s1 + $0xb8] sm:$0xff]  ;;  %v2590_v52 = vld [vmem:[%s3476_s1 + $0xc0] sm:$0xff] }
  0x14   : > { %354 = vmatpush.bf16.msra.mxu0 %v2575_v4  ;;  %2653 = vmatpush.bf16.msra.mxu1 %v2575_v4  ;;  %v295_v36 = vshll.u32 %v2774_v20, 16  ;;  %v265_v38 = vrot.slane %v263_v27, 1  ;;  %v261_v40 = vor.u32 %v260_v26, %v256_v25  ;;  %v277_v41 = vor.u32 %v275_v28, %v2790_v30  ;;  %v2806_v43 = vld [vmem:[%s2742_s4 + $0xc] sm:$0xff]  ;;  %v2605_v49 = vld [vmem:[%s3476_s1 + $0x138] sm:$0xff]  ;;  %v2566_v3 = vld [vmem:[%s3476_s1 + $0x20] sm:$0xff] }
  0x15   : > { %2654 = vmatpush.bf16.msra.mxu2 %v2575_v4  ;;  %725 = vmatpush.bf16.msra.mxu3 %v2595_v5  ;;  %v281_v42 = vrot.slane %v279_v31, 1  ;;  %v2810_v44 = vpack.c.b16 %v643_v33, %v642_v32  ;;  %v293_v46 = vor.u32 %v291_v35, %v2794_v34  ;;  %v660_v54 = vrot.slane %v2806_v43, 1  ;;  %v2568_v56 = vld [vmem:[%s3476_s1 + $0x30] sm:$0xff]  ;;  %v2633_v57 = vld [vmem:[%s3476_s1 + $0x1f8] sm:$0xff]  ;;  %v2567_v61 = vld [vmem:[%s3476_s1 + $0x28] sm:$0xff] }
  0x16   : > { %v297_v47 = vrot.slane %v295_v36, 1  ;;  %v266_v50 = vsel %vm254_vm0, %v261_v40, %v265_v38  ;;  %v2584_v58 = vld [vmem:[%s3476_s1 + $0xb0] sm:$0xff]  ;;  %v2583_v63 = vld [vmem:[%s3476_s1 + $0xa8] sm:$0xff]  ;;  %v267_v1 = vshrl.u32 %v2764_v15, 16  ;;  %v283_v2 = vshrl.u32 %v2771_v18, 16  ;;  %v2582_v4 = vld [vmem:[%s3476_s1 + $0xa0] sm:$0xff] }
  0x17   : > { %v282_v51 = vsel %vm254_vm0, %v277_v41, %v281_v42  ;;  %v659_v53 = vrot.slane %v2810_v44, 1  ;;  %v2604_v59 = vld [vmem:[%s3476_s1 + $0x130] sm:$0xff]  ;;  %v2603_v0 = vld [vmem:[%s3476_s1 + $0x128] sm:$0xff]  ;;  %v2602_v5 = vld [vmem:[%s3476_s1 + $0x120] sm:$0xff]  ;;  %v790_v27 = vshrl.u32 %v2810_v44, 16  ;;  %v801_v31 = vshll.u32 %v2806_v43, 16 }
  0x18   : > { %355 = vmatpush.bf16.msra.mxu0 %v2574_v6  ;;  %2655 = vmatpush.bf16.msra.mxu1 %v2574_v6  ;;  %v298_v55 = vsel %vm254_vm0, %v293_v46, %v297_v47  ;;  %v2632_v62 = vld [vmem:[%s3476_s1 + $0x1f0] sm:$0xff]  ;;  %v2581_v13 = vld [vmem:[%s3476_s1 + $0x98] sm:$0xff]  ;;  %v2646_v25 = vld [vmem:[%s2742_s4] sm:$0xf0]  ;;  %v496_v46 = vrot.slane %v2764_v15, 1 }
  0x19   : > { %2656 = vmatpush.bf16.msra.mxu2 %v2574_v6  ;;  %726 = vmatpush.bf16.msra.mxu3 %v2594_v7  ;;  %v661_v60 = vsel %vm494_vm1, %v659_v53, %v660_v54  ;;  %v269_v6 = vor.u32 %v267_v1, %v265_v38  ;;  %v285_v7 = vor.u32 %v283_v2, %v281_v42  ;;  %v2867_v8 = vld [vmem:[%s2742_s4 + $0x14] sm:$0xff]  ;;  %v2647_v26 = vld [vmem:[%s2742_s4] sm:$0xe]  ;;  %v2631_v28 = vld [vmem:[%s3476_s1 + $0x1e8] sm:$0xff]  ;;  %v792_v38 = vrot.slane %v790_v27, 1 }
  0x1a   : > { %v662_v19 = vrot.slane %v2867_v8, 1  ;;  %v2564_v21 = vld [vmem:[%s3476_s1 + $0x10] sm:$0xff]  ;;  %v2579_v35 = vld [vmem:[%s3476_s1 + $0x88] sm:$0xff]  ;;  %v803_v41 = vrot.slane %v801_v31, 2  ;;  %v2562_v42 = vld [vmem:[%s3476_s1] sm:$0xff] }
  0x1b   : > { %v274_v16 = vsel %vm254_vm0, %v269_v6, %v2790_v30  ;;  %v2580_v22 = vld [vmem:[%s3476_s1 + $0x90] sm:$0xff]  ;;  %v798_v30 = vshrl.u32 %v2806_v43, 16  ;;  %v2599_v36 = vld [vmem:[%s3476_s1 + $0x108] sm:$0xff]  ;;  %v2598_v47 = vld [vmem:[%s3476_s1 + $0x100] sm:$0xff] }
  0x1c   : > { %356 = vmatpush.bf16.msra.mxu0 %v2573_v9  ;;  %2657 = vmatpush.bf16.msra.mxu1 %v2573_v9  ;;  %v663_v32 = vsel %vm494_vm1, %v660_v54, %v662_v19  ;;  %v2933_v53 = vld [vmem:[%s2742_s4 + $0x1c] sm:$0xff]  ;;  %v2608_v27 = vld [vmem:[%s3476_s1 + $0x150] sm:$0xff] }
  0x1d   : > { %2658 = vmatpush.bf16.msra.mxu2 %v2573_v9  ;;  %727 = vmatpush.bf16.msra.mxu3 %v2593_v14  ;;  %v2565_v9 = vld [vmem:[%s3476_s1 + $0x18] sm:$0xff]  ;;  %v800_v40 = vrot.slane %v798_v30, 1  ;;  %v2610_v6 = vld [vmem:[%s3476_s1 + $0x160] sm:$0xff]  ;;  %v2636_v31 = vld [vmem:[%s3476_s1 + $0x210] sm:$0xff] }
  0x1e   : > { %v2601_v14 = vld [vmem:[%s3476_s1 + $0x118] sm:$0xff] }
  0x1f   : > { %v2629_v2 = vld [vmem:[%s3476_s1 + $0x1d8] sm:$0xff] }
  0x20   : > { %357 = vmatpush.bf16.msra.mxu0 %v2572_v17  ;;  %2659 = vmatpush.bf16.msra.mxu1 %v2572_v17 }
  0x21   : > { %2660 = vmatpush.bf16.msra.mxu2 %v2572_v17  ;;  %728 = vmatpush.bf16.msra.mxu3 %v2592_v24  ;;  %v290_v17 = vsel %vm254_vm0, %v285_v7, %v2794_v34  ;;  %v2600_v24 = vld [vmem:[%s3476_s1 + $0x110] sm:$0xff]  ;;  %v2563_v34 = vld [vmem:[%s3476_s1 + $0x8] sm:$0xff]  ;;  %v2638_v7 = vld [vmem:[%s3476_s1 + $0x220] sm:$0xff] }
  0x24   : > { %358 = vmatpush.bf16.msra.mxu0 %v2571_v29  ;;  %2661 = vmatpush.bf16.msra.mxu1 %v2571_v29 }
  0x25   : > { %2662 = vmatpush.bf16.msra.mxu2 %v2571_v29  ;;  %729 = vmatpush.bf16.msra.mxu3 %v2591_v37  ;;  %v793_v29 = vshll.u32 %v2810_v44, 16  ;;  %v2648_v37 = vor.u32 %v2647_v26, %v2646_v25  ;;  %v2578_v44 = vld [vmem:[%s3476_s1 + $0x80] sm:$0xff]  ;;  %v2637_v25 = vld [vmem:[%s3476_s1 + $0x218] sm:$0xff]  ;;  %v2628_v26 = vld [vmem:[%s3476_s1 + $0x1d0] sm:$0xff] }
  0x28   : > { %359 = vmatpush.bf16.msra.mxu0 %v2570_v39  ;;  %2663 = vmatpush.bf16.msra.mxu1 %v2570_v39 }
  0x29   : > { %2664 = vmatpush.bf16.msra.mxu2 %v2570_v39  ;;  %730 = vmatpush.bf16.msra.mxu3 %v2590_v52  ;;  %v795_v39 = vrot.slane %v793_v29, 2  ;;  %v2641_v52 = vld [vmem:[%s3476_s1 + $0x238] sm:$0xff]  ;;  %v819_v29 = vshll.u32 %v2933_v53, 16 }
  0x2b   : > { %360 = vmatmul.bf16.vlgmr.msra.gmra.mxu0 %v266_v50  ;;  %370 = vmatmul.bf16.vlgmr.msra.gmra.mxu1 %v282_v51  ;;  %v796_v50 = vor.u32 %v795_v39, %v792_v38  ;;  %v804_v51 = vor.u32 %v803_v41, %v800_v40  ;;  %v500_v38 = vrot.slane %v2771_v18, 1 }
  0x2c   : > { %439 = vmatpush.bf16.msrb.mxu1 %v2569_v45  ;;  %895 = vmatpush.bf16.msrb.mxu0 %v2605_v49  ;;  %v495_v45 = vrot.slane %v2648_v37, 1  ;;  %v2613_v49 = vld [vmem:[%s3476_s1 + $0x178] sm:$0xff] }
  0x2d   : > { %559 = vmatpush.bf16.msrb.mxu2 %v2585_v48  ;;  %1361 = vmatpush.bf16.msrb.mxu3 %v2633_v57  ;;  %v2625_v48 = vld [vmem:[%s3476_s1 + $0x1b8] sm:$0xff]  ;;  %v2612_v57 = vld [vmem:[%s3476_s1 + $0x170] sm:$0xff] }
  0x2e   : > { %380 = vmatmul.bf16.vlgmr.msra.gmra.mxu2 %v298_v55  ;;  %731 = vmatmul.bf16.vlgmr.msra.gmra.mxu3 %v661_v60  ;;  %v497_v54 = vsel %vm494_vm1, %v495_v45, %v496_v46  ;;  %v805_v55 = vsel %vm788_vm2, %v796_v50, %v804_v51  ;;  %v2630_v60 = vld [vmem:[%s3476_s1 + $0x1e0] sm:$0xff] }
  0x30   : > { %440 = vmatpush.bf16.msrb.mxu1 %v2568_v56  ;;  %896 = vmatpush.bf16.msrb.mxu0 %v2604_v59  ;;  %v2624_v56 = vld [vmem:[%s3476_s1 + $0x1b0] sm:$0xff] }
  0x31   : > { %560 = vmatpush.bf16.msrb.mxu2 %v2584_v58  ;;  %1362 = vmatpush.bf16.msrb.mxu3 %v2632_v62  ;;  %v664_v58 = vrot.slane %v2933_v53, 1  ;;  %v2640_v59 = vld [vmem:[%s3476_s1 + $0x230] sm:$0xff]  ;;  %v810_v62 = vshll.u32 %v2867_v8, 16 }
  0x33   : > { %v665_v1 = vsel %vm494_vm1, %v662_v19, %v664_v58 }
  0x34   : > { %441 = vmatpush.bf16.msrb.mxu1 %v2567_v61  ;;  %897 = vmatpush.bf16.msrb.mxu0 %v2603_v0  ;;  %v807_v61 = vshrl.u32 %v2867_v8, 16  ;;  %v2611_v0 = vld [vmem:[%s3476_s1 + $0x168] sm:$0xff] }
  0x35   : > { %561 = vmatpush.bf16.msrb.mxu2 %v2583_v63  ;;  %1363 = vmatpush.bf16.msrb.mxu3 %v2631_v28  ;;  %v2623_v63 = vld [vmem:[%s3476_s1 + $0x1a8] sm:$0xff]  ;;  %v816_v28 = vshrl.u32 %v2933_v53, 16 }
  0x38   : > { %442 = vmatpush.bf16.msrb.mxu1 %v2566_v3  ;;  %898 = vmatpush.bf16.msrb.mxu0 %v2602_v5  ;;  %v809_v3 = vrot.slane %v807_v61, 1  ;;  %v2622_v5 = vld [vmem:[%s3476_s1 + $0x1a0] sm:$0xff] }
  0x39   : > { %562 = vmatpush.bf16.msrb.mxu2 %v2582_v4  ;;  %1364 = vmatpush.bf16.msrb.mxu3 %v2630_v60  ;;  %v812_v4 = vrot.slane %v810_v62, 2  ;;  %v767_v60 = vld [vmem:[%s2742_s4 + $0x2c] sm:$0x3] }
  0x3b   : > { %365 = vmatmul.bf16.gmra.mxu0 %v274_v16  ;;  %375 = vmatmul.bf16.gmra.mxu1 %v290_v17  ;;  %v2982_v16 = vld [vmem:[%s2742_s4 + $0x24] sm:$0xff]  ;;  %v2609_v17 = vld [vmem:[%s3476_s1 + $0x158] sm:$0xff] }
  0x3c   : > { %443 = vmatpush.bf16.msrb.mxu1 %v2565_v9  ;;  %899 = vmatpush.bf16.msrb.mxu0 %v2601_v14  ;;  %v498_v9 = vrot.slane %v2755_v11, 1  ;;  %v2621_v14 = vld [vmem:[%s3476_s1 + $0x198] sm:$0xff]  ;;  %v828_v50 = vshll.u32 %v2982_v16, 16 }
  0x3d   : > { %563 = vmatpush.bf16.msrb.mxu2 %v2581_v13  ;;  %1365 = vmatpush.bf16.msrb.mxu3 %v2629_v2  ;;  %v813_v13 = vor.u32 %v812_v4, %v809_v3  ;;  %v786_v2 = vunpack.c.l.b16 %v767_v60 }
  0x3e   : > { %736 = vmatmul.bf16.gmra.mxu3 %v663_v32  ;;  %v499_v19 = vsel %vm494_vm1, %v496_v46, %v498_v9  ;;  %v613_v32 = vld [vmem:[%s2742_s4 + $0x2c] sm:$0x1]  ;;  %v501_v41 = vsel %vm494_vm1, %v498_v9, %v500_v38  ;;  %v2634_v9 = vld [vmem:[%s3476_s1 + $0x200] sm:$0xff] }
  0x3f   : > { %v652_v37 = vunpack.c.l.b16 %v613_v32 }
  0x40   : > { %444 = vmatpush.bf16.msrb.mxu1 %v2564_v21  ;;  %900 = vmatpush.bf16.msrb.mxu0 %v2600_v24  ;;  %v814_v21 = vsel %vm788_vm2, %v804_v51, %v813_v13  ;;  %v2620_v24 = vld [vmem:[%s3476_s1 + $0x190] sm:$0xff]  ;;  %v2618_v51 = vld [vmem:[%s3476_s1 + $0x180] sm:$0xff] }
  0x41   : > { %564 = vmatpush.bf16.msrb.mxu2 %v2580_v22  ;;  %v666_v22 = vrot.slane %v2982_v16, 1  ;;  %1366 = vmatpush.bf16.msrb.mxu3 %v2628_v26  ;;  %v658_v40 = vpack.c.b16 %v652_v37, %v652_v37  ;;  %v1405_v37 = vld [vmem:[%s2742_s4 + $0x8] sm:$0x8] }
  0x43   : > { %v667_v30 = vsel %vm494_vm1, %v664_v58, %v666_v22  ;;  %v668_v45 = vrot.slane %v658_v40, 1 }
  0x44   : > { %445 = vmatpush.bf16.msrb.mxu1 %v2563_v34  ;;  %901 = vmatpush.bf16.msrb.mxu0 %v2599_v36  ;;  %v2627_v34 = vld [vmem:[%s3476_s1 + $0x1c8] sm:$0xff]  ;;  %v821_v36 = vrot.slane %v819_v29, 2 }
  0x45   : > { %565 = vmatpush.bf16.msrb.mxu2 %v2579_v35  ;;  %v818_v35 = vrot.slane %v816_v28, 1  ;;  %1367 = vmatpush.bf16.msrb.mxu3 %v2627_v34 }
  0x47   : > { %v822_v39 = vor.u32 %v821_v36, %v818_v35  ;;  %v939_v35 = vld [vmem:[%s2742_s4 + $0x4] sm:$0xc] }
  0x48   : > { %446 = vmatpush.bf16.msrb.mxu1 %v2562_v42  ;;  %902 = vmatpush.bf16.msrb.mxu0 %v2598_v47  ;;  %v1069_v42 = vld [vmem:[%s2742_s4 + $0x8] sm:$0xc]  ;;  %v1109_v47 = vunpack.c.h.b16 %v2779_v23 }
  0x49   : > { %566 = vmatpush.bf16.msrb.mxu2 %v2578_v44  ;;  %v823_v44 = vsel %vm788_vm2, %v813_v13, %v822_v39  ;;  %v1108_v46 = vunpack.c.l.b16 %v1069_v42 }
  0x4b   : > { %447 = vmatmul.bf16.vlgmr.msrb.gmra.mxu1 %v2752_v10  ;;  %903 = vmatmul.bf16.vlgmr.msrb.gmra.mxu0 %v805_v55  ;;  %v2639_v10 = vld [vmem:[%s3476_s1 + $0x228] sm:$0xff]  ;;  %v2606_v55 = vld [vmem:[%s3476_s1 + $0x140] sm:$0xff] }
  0x4c   : > { %1025 = vmatpush.bf16.msra.mxu1 %v2613_v49  ;;  %1491 = vmatpush.bf16.msra.mxu0 %v2641_v52  ;;  %v825_v49 = vshrl.u32 %v2982_v16, 16  ;;  %v2635_v52 = vld [vmem:[%s3476_s1 + $0x208] sm:$0xff] }
  0x4d   : > { %1189 = vmatpush.bf16.msra.mxu2 %v2625_v48  ;;  %v2607_v48 = vld [vmem:[%s3476_s1 + $0x148] sm:$0xff] }
  0x4e   : > { %567 = vmatmul.bf16.vlgmr.msrb.gmra.mxu2 %v497_v54  ;;  %741 = vmatmul.bf16.gmra.mxu3 %v665_v1  ;;  %v2626_v54 = vld [vmem:[%s3476_s1 + $0x1c0] sm:$0xff]  ;;  %v827_v58 = vrot.slane %v825_v49, 1  ;;  %v502_v1 = vrot.slane %v2758_v12, 1  ;;  %v962_v49 = vrot.slane %v2806_v43, 2  ;;  %v3094_v43 = vld [vmem:[%s2742_s4 + $0x28] sm:$0xff] }
  0x4f   : > { %1368 = vmatpush.bf16.msrb.mxu3 %v2626_v54 }
  0x50   : > { %1026 = vmatpush.bf16.msra.mxu1 %v2612_v57  ;;  %1492 = vmatpush.bf16.msra.mxu0 %v2640_v59  ;;  %v3045_v57 = vpack.c.b16 %v1109_v47, %v1108_v46  ;;  %v830_v59 = vrot.slane %v828_v50, 2 }
  0x51   : > { %1190 = vmatpush.bf16.msra.mxu2 %v2624_v56  ;;  %v3041_v56 = vld [vmem:[%s2742_s4 + $0x10] sm:$0xff] }
  0x52   : > { %v1256_v61 = vshrl.u32 %v3045_v57, 16  ;;  %v1259_v62 = vshll.u32 %v3045_v57, 16  ;;  %v1126_v46 = vrot.slane %v3041_v56, 2 }
  0x54   : > { %1027 = vmatpush.bf16.msra.mxu1 %v2611_v0  ;;  %1493 = vmatpush.bf16.msra.mxu0 %v2639_v10  ;;  %v1267_v0 = vshll.u32 %v3041_v56, 16  ;;  %v831_v10 = vor.u32 %v830_v59, %v827_v58  ;;  %v1258_v3 = vrot.slane %v1256_v61, 2  ;;  %v1261_v4 = vrot.slane %v1259_v62, 3 }
  0x55   : > { %1191 = vmatpush.bf16.msra.mxu2 %v2623_v63  ;;  %v1264_v63 = vshrl.u32 %v3041_v56, 16  ;;  %v964_v59 = vrot.slane %v2867_v8, 2 }
  0x56   : > { %v832_v13 = vsel %vm788_vm2, %v822_v39, %v831_v10  ;;  %v1424_v39 = vunpack.c.l.b16 %v1405_v37 }
  0x58   : > { %1028 = vmatpush.bf16.msra.mxu1 %v2610_v6  ;;  %1494 = vmatpush.bf16.msra.mxu0 %v2638_v7  ;;  %v1269_v6 = vrot.slane %v1267_v0, 3  ;;  %v503_v7 = vsel %vm494_vm1, %v500_v38, %v502_v1  ;;  %v958_v38 = vunpack.c.l.b16 %v939_v35  ;;  %v1425_v42 = vpack.c.b16 %v1109_v47, %v1424_v39  ;;  %v1233_v0 = vld [vmem:[%s2742_s4 + $0x30] sm:$0x7] }
  0x59   : > { %1192 = vmatpush.bf16.msra.mxu2 %v2622_v5  ;;  %v1266_v5 = vrot.slane %v1264_v63, 2  ;;  %v968_v39 = vrot.slane %v2982_v16, 2 }
  0x5a   : > { %v1427_v50 = vrot.slane %v1425_v42, 3 }
  0x5b   : > { %452 = vmatmul.bf16.gmra.mxu1 %v2764_v15  ;;  %908 = vmatmul.bf16.gmra.mxu0 %v814_v21  ;;  %v2619_v15 = vld [vmem:[%s3476_s1 + $0x188] sm:$0xff] }
  0x5c   : > { %1029 = vmatpush.bf16.msra.mxu1 %v2609_v17  ;;  %1495 = vmatpush.bf16.msra.mxu0 %v2637_v25  ;;  %v1262_v17 = vor.u32 %v1261_v4, %v1258_v3  ;;  %v3065_v25 = vld [vmem:[%s2742_s4 + $0x18] sm:$0xff] }
  0x5d   : > { %1193 = vmatpush.bf16.msra.mxu2 %v2621_v14  ;;  %v3058_v14 = vpack.c.b16 %v786_v2, %v786_v2  ;;  %v1273_v28 = vshrl.u32 %v3065_v25, 16  ;;  %v1276_v29 = vshll.u32 %v3065_v25, 16  ;;  %v1128_v58 = vrot.slane %v3065_v25, 2 }
  0x5e   : > { %572 = vmatmul.bf16.gmra.mxu2 %v499_v19  ;;  %746 = vmatmul.bf16.gmra.mxu3 %v667_v30  ;;  %v1270_v19 = vor.u32 %v1269_v6, %v1266_v5  ;;  %v1430_v60 = vrot.slane %v3065_v25, 3  ;;  %v965_v2 = vsel %vm960_vm4, %v962_v49, %v964_v59  ;;  %v1252_v5 = vunpack.c.l.b16 %v1233_v0 }
  0x5f   : > { %v834_v21 = vshrl.u32 %v3058_v14, 16  ;;  %v1129_v63 = vsel %vm960_vm4, %v1126_v46, %v1128_v58 }
  0x60   : > { %1030 = vmatpush.bf16.msra.mxu1 %v2608_v27  ;;  %1496 = vmatpush.bf16.msra.mxu0 %v2636_v31  ;;  %v1278_v31 = vrot.slane %v1276_v29, 3  ;;  %v3108_v6 = vpack.c.b16 %v1252_v5, %v1252_v5 }
  0x61   : > { %1194 = vmatpush.bf16.msra.mxu2 %v2620_v24  ;;  %v1271_v24 = vsel %vm1254_vm3, %v1262_v17, %v1270_v19  ;;  %v836_v26 = vrot.slane %v834_v21, 1 }
  0x62   : > { %v1303_v17 = vshll.u32 %v3108_v6, 16 }
  0x64   : > { %1031 = vmatpush.bf16.msra.mxu1 %v2607_v48  ;;  %1497 = vmatpush.bf16.msra.mxu0 %v2635_v52 }
  0x65   : > { %1195 = vmatpush.bf16.msra.mxu2 %v2619_v15  ;;  %v1275_v15 = vrot.slane %v1273_v28, 2 }
  0x67   : > { %v1279_v36 = vor.u32 %v1278_v31, %v1275_v15 }
  0x68   : > { %1032 = vmatpush.bf16.msra.mxu1 %v2606_v55  ;;  %1498 = vmatpush.bf16.msra.mxu0 %v2634_v9 }
  0x69   : > { %1196 = vmatpush.bf16.msra.mxu2 %v2618_v51  ;;  %v1280_v40 = vsel %vm1254_vm3, %v1270_v19, %v1279_v36 }
  0x6b   : > { %457 = vmatmul.bf16.gmra.mxu1 %v2755_v11  ;;  %913 = vmatmul.bf16.gmra.mxu0 %v823_v44  ;;  %v669_v11 = vsel %vm494_vm1, %v666_v22, %v668_v45  ;;  %v837_v22 = vshll.u32 %v3058_v14, 16 }
  0x6d   : > { %v839_v27 = vrot.slane %v837_v22, 2  ;;  %v966_v22 = vrot.slane %v2933_v53, 2 }
  0x6e   : > { %577 = vmatmul.bf16.gmra.mxu2 %v501_v41  ;;  %751 = vmatmul.bf16.gmra.mxu3 %v669_v11  ;;  %v3077_v41 = vld [vmem:[%s2742_s4 + $0x20] sm:$0xff] }
  0x6f   : > { %v840_v30 = vor.u32 %v839_v27, %v836_v26  ;;  %v1282_v44 = vshrl.u32 %v3077_v41, 16  ;;  %v1285_v45 = vshll.u32 %v3077_v41, 16  ;;  %v1130_v19 = vrot.slane %v3077_v41, 2 }
  0x70   : > { %v1305_v26 = vrot.slane %v1303_v17, 3 }
  0x71   : > { %v841_v34 = vsel %vm788_vm2, %v831_v10, %v840_v30  ;;  %v1284_v51 = vrot.slane %v1282_v44, 2  ;;  %v1287_v52 = vrot.slane %v1285_v45, 3  ;;  %v1131_v27 = vsel %vm960_vm4, %v1128_v58, %v1130_v19 }
  0x72   : > { %v969_v45 = vsel %vm960_vm4, %v966_v22, %v968_v39 }
  0x73   : > { %v1288_v11 = vor.u32 %v1287_v52, %v1284_v51 }
  0x75   : > { %v1289_v55 = vsel %vm1254_vm3, %v1279_v36, %v1288_v11  ;;  %v1132_v36 = vrot.slane %v3094_v43, 2 }
  0x7b   : > { %462 = vmatmul.bf16.gmra.mxu1 %v2771_v18  ;;  %918 = vmatmul.bf16.gmra.mxu0 %v832_v13  ;;  %v504_v18 = vrot.slane %v2774_v20, 1  ;;  %v959_v20 = vpack.c.b16 %v643_v33, %v958_v38  ;;  %v1428_v33 = vrot.slane %v3041_v56, 3  ;;  %v1291_v56 = vshrl.u32 %v3094_v43, 16 }
  0x7c   : > { %v1300_v13 = vshrl.u32 %v3108_v6, 16 }
  0x7d   : > { %v505_v32 = vsel %vm494_vm1, %v502_v1, %v504_v18  ;;  %v961_v48 = vrot.slane %v959_v20, 2  ;;  %v1429_v54 = vsel %vm1426_vm5, %v1427_v50, %v1428_v33  ;;  %v1293_v61 = vrot.slane %v1291_v56, 2  ;;  %v1079_v20 = vld [vmem:[%s2742_s4 + $0x30] sm:$0x3]  ;;  %s2666_s4 = smul.u32 80, %s3510_s13 }
  0x7e   : > { %582 = vmatmul.bf16.gmra.mxu2 %v503_v7  ;;  %1369 = vmatmul.bf16.vlgmr.msrb.gmra.mxu3 %v1271_v24  ;;  %v1431_v3 = vsel %vm1426_vm5, %v1428_v33, %v1430_v60  ;;  %v1432_v24 = vrot.slane %v3077_v41, 3  ;;  %v1302_v25 = vrot.slane %v1300_v13, 2  ;;  %v967_v18 = vsel %vm960_vm4, %v964_v59, %v966_v22 }
  0x7f   : > { %v963_v47 = vsel %vm960_vm4, %v961_v48, %v962_v49  ;;  %v1133_v41 = vsel %vm960_vm4, %v1130_v19, %v1132_v36  ;;  %v1118_v48 = vunpack.c.l.b16 %v1079_v20  ;;  %v970_v56 = vrot.slane %v3058_v14, 2  ;;  %s3282_s19 = scalar_lea.vmem %s3477_s2, %s2666_s4 }
  0x80   : > { %v1433_v30 = vsel %vm1426_vm5, %v1430_v60, %v1432_v24  ;;  %v1306_v15 = vor.u32 %v1305_v26, %v1302_v25 }
  0x81   : > { %v1124_v16 = vpack.c.b16 %v1118_v48, %v1118_v48 }
  0x8b   : > { %467 = vmatmul.bf16.gmra.mxu1 %v2758_v12  ;;  %923 = vmatmul.bf16.gmra.mxu0 %v841_v34  ;;  %v1125_v12 = vrot.slane %v3045_v57, 2  ;;  %v1294_v57 = vshll.u32 %v3094_v43, 16 }
  0x8d   : > { %v1127_v23 = vsel %vm960_vm4, %v1125_v12, %v1126_v46  ;;  %v1296_v62 = vrot.slane %v1294_v57, 3  ;;  %v1436_v57 = vrot.slane %v3108_v6, 3 }
  0x8e   : > { %587 = vmatmul.bf16.gmra.mxu2 %v505_v32  ;;  %1374 = vmatmul.bf16.gmra.mxu3 %v1280_v40  ;;  %v1434_v40 = vrot.slane %v3094_v43, 3 }
  0x8f   : > { %v1297_v4 = vor.u32 %v1296_v62, %v1293_v61 }
  0x90   : > { %v1435_v12 = vsel %vm1426_vm5, %v1432_v24, %v1434_v40  ;;  %v1437_v0 = vsel %vm1426_vm5, %v1434_v40, %v1436_v57 }
  0x91   : > { %v1298_v8 = vsel %vm1254_vm3, %v1288_v11, %v1297_v4  ;;  %v1307_v53 = vsel %vm1254_vm3, %v1297_v4, %v1306_v15  ;;  %v1134_v11 = vrot.slane %v1124_v16, 2 }
  0x93   : > { %v1135_v59 = vsel %vm960_vm4, %v1132_v36, %v1134_v11 }
  0x9b   : > { %1033 = vmatmul.bf16.vlgmr.msra.gmra.mxu1 %v963_v47  ;;  %1499 = vmatmul.bf16.vlgmr.msra.gmra.mxu0 %v1429_v54 }
  0x9e   : > { %1197 = vmatmul.bf16.vlgmr.msra.gmra.mxu2 %v1127_v23  ;;  %1379 = vmatmul.bf16.gmra.mxu3 %v1289_v55 }
  0xa8   : > { %v361_v1 = vpop.f32.mrf.mxu0  ;;  %v3103_v10 = vpop.f32.mrf.mxu1 }
  0xab   : > { %1038 = vmatmul.bf16.gmra.mxu1 %v965_v2  ;;  %1504 = vmatmul.bf16.gmra.mxu0 %v1431_v3 }
  0xae   : > { %1202 = vmatmul.bf16.gmra.mxu2 %v1129_v63  ;;  %1384 = vmatmul.bf16.gmra.mxu3 %v1298_v8  ;;  %v971_v63 = vsel %vm960_vm4, %v968_v39, %v970_v56 }
  0xb0   : > { %v363_v7 = vpop.f32.mrf.mxu0  ;;  %v3110_v9 = vpop.f32.mrf.mxu1 }
  0xb1   : > { %v732_v21 = vpop.f32.mrf.mxu3  ;;  %v3122_v31 = vpop.f32.mrf.mxu2 }
  0xb8   : > { %v366_v28 = vpop.f32.mrf.mxu0  ;;  %v3118_v29 = vpop.f32.mrf.mxu1 }
  0xb9   : > { %v734_v32 = vpop.f32.mrf.mxu3  ;;  %v3128_v38 = vpop.f32.mrf.mxu2 }
  0xbb   : > { %1043 = vmatmul.bf16.gmra.mxu1 %v967_v18  ;;  %1509 = vmatmul.bf16.gmra.mxu0 %v1433_v30 }
  0xbe   : > { %1207 = vmatmul.bf16.gmra.mxu2 %v1131_v27  ;;  %1389 = vmatmul.bf16.gmra.mxu3 %v1307_v53 }
  0xc0   : > { %v368_v34 = vpop.f32.mrf.mxu0  ;;  %v3125_v35 = vpop.f32.mrf.mxu1 }
  0xc1   : > { %v737_v37 = vpop.f32.mrf.mxu3 }
  0xc8   : > { %v448_v42 = vpop.f32.mrf.mxu1  ;;  %v904_v44 = vpop.f32.mrf.mxu0 }
  0xc9   : > { %v449_v46 = vadd.f32 %v448_v42, %v361_v1  ;;  %v739_v49 = vpop.f32.mrf.mxu3 }
  0xcb   : > { %1048 = vmatmul.bf16.gmra.mxu1 %v969_v45  ;;  %1514 = vmatmul.bf16.gmra.mxu0 %v1435_v12 }
  0xce   : > { %1212 = vmatmul.bf16.gmra.mxu2 %v1133_v41 }
  0xd0   : > { %v450_v52 = vpop.f32.mrf.mxu1  ;;  %v906_v23 = vpop.f32.mrf.mxu0 }
  0xd1   : > { %v568_v50 = vpop.f32.mrf.mxu2  ;;  %v451_v47 = vadd.f32 %v450_v52, %v363_v7  ;;  %v742_v55 = vpop.f32.mrf.mxu3 }
  0xd2   : > { %v593_v33 = vadd.f32 %v568_v50, %v449_v46 }
  0xd4   : > { %v757_v51 = vadd.f32 %v732_v21, %v593_v33  ;;  %v1545_v21 = vlaneseq }
  0xd6   : > { %v3136_v54 = vadd.f32 %v904_v44, %v757_v51  ;;  %v3149_v24 = vshrl.u32 %v1545_v21, 7  ;;  %v2685_v44 = vmov 0  }
  0xd8   : > { %v453_v61 = vpop.f32.mrf.mxu1  ;;  %v909_v62 = vpop.f32.mrf.mxu0  ;;  %v1560_v15 = vshrl.u32 %v3149_v24, 16  ;;  %v3160_v12 = vadd.s32 8, %v3149_v24 }
  0xd9   : > { %v570_v43 = vpop.f32.mrf.mxu2  ;;  %v454_v1 = vadd.f32 %v453_v61, %v366_v28  ;;  %v744_v3 = vpop.f32.mrf.mxu3  ;;  %v1559_v28 = vand.u32 65535, %v3149_v24 }
  0xda   : > { %v594_v58 = vadd.f32 %v570_v43, %v451_v47  ;;  %v1564_v36 = vmul.u32 52429, %v1560_v15  ;;  %v1565_v41 = vmul.u32 52428, %v1560_v15  ;;  %v1588_v33 = vand.u32 65535, %v3160_v12 }
  0xdb   : > { %1053 = vmatmul.bf16.gmra.mxu1 %v971_v63  ;;  %1519 = vmatmul.bf16.gmra.mxu0 %v1437_v0 }
  0xdc   : > { %v758_v60 = vadd.f32 %v734_v32, %v594_v58  ;;  %v1563_v32 = vmul.u32 52428, %v1559_v28  ;;  %v1568_v20 = vshll.u32 %v1564_v36, 16  ;;  %v1592_v11 = vmul.u32 52428, %v1588_v33 }
  0xdd   : > { %v1591_v43 = vmul.u32 52429, %v1588_v33  ;;  %v1569_v58 = vshrl.u32 %v1564_v36, 16 }
  0xde   : > { %1217 = vmatmul.bf16.gmra.mxu2 %v1135_v59  ;;  %v3143_v2 = vadd.f32 %v906_v23, %v758_v60  ;;  %v1567_v51 = vshrl.u32 %v1563_v32, 16  ;;  %v1589_v23 = vshrl.u32 %v3160_v12, 16  ;;  %v1595_v60 = vshll.u32 %v1592_v11, 16 }
  0xdf   : > { %v1596_v21 = vshrl.u32 %v1592_v11, 16 }
  0xe0   : > { %v455_v8 = vpop.f32.mrf.mxu1  ;;  %v911_v6 = vpop.f32.mrf.mxu0  ;;  %v1593_v56 = vmul.u32 52429, %v1589_v23  ;;  %vm1599_vm8 = vc.u32 %v1591_v43, %v1595_v60 }
  0xe1   : > { %v573_v14 = vpop.f32.mrf.mxu2  ;;  %v456_v7 = vadd.f32 %v455_v8, %v368_v34  ;;  %v3147_v17 = vpop.f32.mrf.mxu3  ;;  %v1562_v34 = vmul.u32 52429, %v1559_v28 }
  0xe2   : > { %v595_v4 = vadd.f32 %v573_v14, %v454_v1  ;;  %v1597_v61 = vshll.u32 %v1593_v56, 16  ;;  %v1601_v1 = vadd.s32 %v1595_v60, %v1591_v43  ;;  %v1598_v36 = vshrl.u32 %v1593_v56, 16 }
  0xe4   : > { %v759_v5 = vadd.f32 %v737_v37, %v595_v4  ;;  %v1566_v37 = vshll.u32 %v1563_v32, 16  ;;  %vm1603_vm9 = vc.u32 %v1601_v1, %v1597_v61  ;;  %v3197_v61 = vadd.s32 32, %v3149_v24 }
  0xe6   : > { %v3145_v13 = vadd.f32 %v909_v62, %v759_v5  ;;  %vm1570_vm6 = vc.u32 %v1562_v34, %v1566_v37  ;;  %v3169_v62 = vadd.s32 16, %v3149_v24  ;;  %v1600_v5 = vsel %vm1599_vm8, 1, %v2685_v44 }
  0xe7   : > { %v1571_v45 = vsel %vm1570_vm6, 1, %v2685_v44 }
  0xe8   : > { %v458_v26 = vpop.f32.mrf.mxu1  ;;  %v914_v27 = vpop.f32.mrf.mxu0  ;;  %v1617_v8 = vand.u32 65535, %v3169_v62 }
  0xe9   : > { %v575_v19 = vpop.f32.mrf.mxu2  ;;  %v459_v18 = vadd.f32 %v458_v26, %v3103_v10  ;;  %v3156_v40 = vpop.f32.mrf.mxu3  ;;  %v1572_v10 = vadd.s32 %v1566_v37, %v1562_v34 }
  0xea   : > { %v596_v22 = vadd.f32 %v575_v19, %v456_v7 }
  0xeb   : > { %vm1574_vm7 = vc.u32 %v1572_v10, %v1568_v20 }
  0xec   : > { %v760_v25 = vadd.f32 %v739_v49, %v596_v22  ;;  %v1573_v49 = vadd.s32 %v1571_v45, %v1565_v41  ;;  %v1575_v52 = vsel %vm1574_vm7, 1, %v2685_v44  ;;  %v1604_v22 = vsel %vm1603_vm9, 1, %v2685_v44 }
  0xee   : > { %v3153_v30 = vadd.f32 %v911_v6, %v760_v25  ;;  %v1577_v47 = vadd.s32 %v1575_v52, %v1573_v49  ;;  %v1621_v25 = vmul.u32 52428, %v1617_v8 }
  0xf0   : > { %v460_v46 = vpop.f32.mrf.mxu1  ;;  %v916_v48 = vpop.f32.mrf.mxu0  ;;  %v1578_v59 = vadd.s32 %v1577_v47, %v1567_v51  ;;  %v1624_v32 = vshll.u32 %v1621_v25, 16 }
  0xf1   : > { %v578_v53 = vpop.f32.mrf.mxu2  ;;  %v461_v50 = vadd.f32 %v460_v46, %v3110_v9  ;;  %v1594_v9 = vmul.u32 52428, %v1589_v23  ;;  %v3171_v0 = vpop.f32.mrf.mxu3  ;;  %v3183_v46 = vadd.s32 24, %v3149_v24  ;;  %v1625_v23 = vshrl.u32 %v1621_v25, 16 }
  0xf2   : > { %v597_v39 = vadd.f32 %v578_v53, %v459_v18  ;;  %v1579_v7 = vadd.s32 %v1578_v59, %v1569_v58  ;;  %v1620_v18 = vmul.u32 52429, %v1617_v8 }
  0xf3   : > { %v1602_v19 = vadd.s32 %v1600_v5, %v1594_v9  ;;  %v1647_v11 = vshrl.u32 %v3183_v46, 16 }
  0xf4   : > { %v761_v42 = vadd.f32 %v742_v55, %v597_v39  ;;  %v1580_v34 = vshrl.u32 %v1579_v7, 3  ;;  %vm1628_vm10 = vc.u32 %v1620_v18, %v1624_v32  ;;  %v1630_v41 = vadd.s32 %v1624_v32, %v1620_v18 }
  0xf5   : > { %v1606_v26 = vadd.s32 %v1604_v22, %v1602_v19  ;;  %v1629_v10 = vsel %vm1628_vm10, 1, %v2685_v44  ;;  %v1651_v9 = vmul.u32 52429, %v1647_v11  ;;  %v1675_v22 = vand.u32 65535, %v3197_v61 }
  0xf6   : > { %v3164_v16 = vadd.f32 %v914_v27, %v761_v42 }
  0xf8   : > { %v463_v14 = vpop.f32.mrf.mxu1  ;;  %v919_v4 = vpop.f32.mrf.mxu0 }
  0xf9   : > { %v580_v55 = vpop.f32.mrf.mxu2  ;;  %v464_v6 = vadd.f32 %v463_v14, %v3118_v29  ;;  %v1607_v29 = vadd.s32 %v1606_v26, %v1596_v21  ;;  %v3186_v49 = vpop.f32.mrf.mxu3  ;;  %v1652_v14 = vmul.u32 52428, %v1647_v11 }
  0xfa   : > { %v598_v57 = vadd.f32 %v580_v55, %v461_v50  ;;  %v1581_v50 = vmul.u32 10, %v1580_v34  ;;  %v1656_v34 = vshrl.u32 %v1651_v9, 16 }
  0xfb   : > { %v1608_v51 = vadd.s32 %v1607_v29, %v1598_v36  ;;  %v1678_v29 = vmul.u32 52429, %v1675_v22 }
  0xfc   : > { %v762_v63 = vadd.f32 %v744_v3, %v598_v57  ;;  %v1618_v3 = vshrl.u32 %v3169_v62, 16  ;;  %v3194_v57 = vsub.s32 %v3149_v24, %v1581_v50 }
  0xfd   : > { %v1609_v59 = vshrl.u32 %v1608_v51, 3 }
  0xfe   : > { %v3178_v27 = vadd.f32 %v916_v48, %v762_v63  ;;  %v1622_v15 = vmul.u32 52429, %v1618_v3  ;;  %v1623_v37 = vmul.u32 52428, %v1618_v3  ;;  %vm1846_vm13 = vcmp.ne.s32.totalorder %v3194_v57, 0 }
  0xff   : > { %v1610_v25 = vmul.u32 10, %v1609_v59  ;;  %vm1856_vm15 = vcmp.lt.s32.totalorder %v3194_v57, 0 }
 0x100   : > { %v1626_v39 = vshll.u32 %v1622_v15, 16  ;;  %v465_v42 = vpop.f32.mrf.mxu1  ;;  %v921_v45 = vpop.f32.mrf.mxu0  ;;  %v1631_v33 = vadd.s32 %v1629_v10, %v1623_v37  ;;  %v1627_v60 = vshrl.u32 %v1622_v15, 16  ;;  %v1676_v15 = vshrl.u32 %v3197_v61, 16  ;;  %vm3215_vm0 = vmand %vm1856_vm15, %vm1846_vm13 }
 0x101   : > { %v583_v28 = vpop.f32.mrf.mxu2  ;;  %v466_v48 = vadd.f32 %v465_v42, %v3125_v35  ;;  %v3204_v3 = vpop.f32.mrf.mxu3  ;;  %v1679_v37 = vmul.u32 52428, %v1675_v22  ;;  %v3220_v10 = vsub.s32 %v3160_v12, %v1610_v25 }
 0x102   : > { %v599_v53 = vadd.f32 %v583_v28, %v464_v6  ;;  %vm1632_vm11 = vc.u32 %v1630_v41, %v1626_v39  ;;  %v1655_v6 = vshll.u32 %v1651_v9, 16  ;;  %v1680_v39 = vmul.u32 52429, %v1676_v15 }
 0x103   : > { %v1633_v52 = vsel %vm1632_vm11, 1, %v2685_v44  ;;  %vm1847_vm2 = vcmp.ne.s32.totalorder %v3220_v10, 0  ;;  %vm1857_vm4 = vcmp.lt.s32.totalorder %v3220_v10, 0 }
 0x104   : > { %v763_v20 = vadd.f32 %v3147_v17, %v599_v53  ;;  %v1635_v47 = vadd.s32 %v1633_v52, %v1631_v33  ;;  %v1646_v17 = vand.u32 65535, %v3183_v46  ;;  %v1876_v53 = vadd.s32 10, %v3194_v57  ;;  %vm3254_vm7 = vmand %vm1857_vm4, %vm1847_vm2 }
 0x105   : > { %v1681_v52 = vmul.u32 52428, %v1676_v15 }
 0x106   : > { %v3191_v43 = vadd.f32 %v919_v4, %v763_v20  ;;  %v1649_v35 = vmul.u32 52429, %v1646_v17  ;;  %v1650_v58 = vmul.u32 52428, %v1646_v17  ;;  %v1636_v1 = vadd.s32 %v1635_v47, %v1625_v23 }
 0x107   : > { %v1682_v23 = vshll.u32 %v1679_v37, 16  ;;  %v1684_v47 = vshll.u32 %v1680_v39, 16  ;;  %v1886_v11 = vsel %vm3215_vm0, %v1876_v53, %v3194_v57 }
 0x108   : > { %v1653_v5 = vshll.u32 %v1650_v58, 16  ;;  %v468_v8 = vpop.f32.mrf.mxu1  ;;  %v924_v4 = vpop.f32.mrf.mxu0  ;;  %v1654_v18 = vshrl.u32 %v1650_v58, 16  ;;  %vm3244_vm6 = vcmp.lt.s32.totalorder %v1886_v11, 8 }
 0x109   : > { %v585_v55 = vpop.f32.mrf.mxu2  ;;  %v469_v7 = vadd.f32 %v468_v8, %v3122_v31  ;;  %vm1686_vm1 = vc.u32 %v1678_v29, %v1682_v23 }
 0x10a   : > { %v600_v56 = vadd.f32 %v585_v55, %v466_v48  ;;  %vm1657_vm12 = vc.u32 %v1649_v35, %v1653_v5  ;;  %v1659_v19 = vadd.s32 %v1653_v5, %v1649_v35  ;;  %v1687_v55 = vsel %vm1686_vm1, 1, %v2685_v44 }
 0x10b   : > { %v1658_v21 = vsel %vm1657_vm12, 1, %v2685_v44 }
 0x10c   : > { %v764_v63 = vadd.f32 %v3156_v40, %v600_v56  ;;  %v1637_v40 = vadd.s32 %v1636_v1, %v1627_v60  ;;  %v1660_v26 = vadd.s32 %v1658_v21, %v1652_v14  ;;  %vm1661_vm14 = vc.u32 %v1659_v19, %v1655_v6  ;;  %v3235_v1 = vpop.f32.mrf.mxu3 }
 0x10d   : > { %v1662_v31 = vsel %vm1661_vm14, 1, %v2685_v44  ;;  %v1688_v56 = vadd.s32 %v1682_v23, %v1678_v29  ;;  %v1683_v14 = vshrl.u32 %v1679_v37, 16  ;;  %v3259_v29 = vadd.s32 48, %v3149_v24 }
 0x10e   : > { %v1664_v36 = vadd.s32 %v1662_v31, %v1660_v26  ;;  %v3210_v41 = vadd.f32 %v921_v45, %v764_v63  ;;  %v1638_v48 = vshrl.u32 %v1637_v40, 3  ;;  %v3223_v45 = vadd.s32 40, %v3149_v24 }
 0x10f   : > { %vm1690_vm3 = vc.u32 %v1688_v56, %v1684_v47 }
 0x110   : > { %v470_v50 = vpop.f32.mrf.mxu1  ;;  %v926_v33 = vpop.f32.mrf.mxu0  ;;  %v1665_v51 = vadd.s32 %v1664_v36, %v1654_v18  ;;  %v1704_v35 = vand.u32 65535, %v3223_v45  ;;  %v1639_v59 = vmul.u32 10, %v1638_v48  ;;  %v1705_v9 = vshrl.u32 %v3223_v45, 16 }
 0x111   : > { %v588_v28 = vpop.f32.mrf.mxu2  ;;  %v1691_v5 = vsel %vm1690_vm3, 1, %v2685_v44 }
 0x112   : > { %v601_v32 = vadd.f32 %v588_v28, %v469_v7  ;;  %v1666_v12 = vadd.s32 %v1665_v51, %v1656_v34  ;;  %v1708_v57 = vmul.u32 52428, %v1704_v35  ;;  %v1707_v8 = vmul.u32 52429, %v1704_v35 }
 0x113   : > { %v1685_v7 = vshrl.u32 %v1680_v39, 16  ;;  %v3241_v40 = vsub.s32 %v3169_v62, %v1639_v59  ;;  %v1710_v28 = vmul.u32 52428, %v1705_v9 }
 0x114   : > { %v765_v20 = vadd.f32 %v3171_v0, %v601_v32  ;;  %v471_v0 = vadd.f32 %v470_v50, %v3128_v38  ;;  %v1667_v60 = vshrl.u32 %v1666_v12, 3  ;;  %v1689_v38 = vadd.s32 %v1687_v55, %v1681_v52  ;;  %v3276_v11 = vpop.f32.mrf.mxu3 }
 0x115   : > { %v1711_v21 = vshll.u32 %v1708_v57, 16  ;;  %vm1848_vm9 = vcmp.ne.s32.totalorder %v3241_v40, 0  ;;  %vm1858_vm10 = vcmp.lt.s32.totalorder %v3241_v40, 0 }
 0x116   : > { %v3226_v17 = vadd.f32 %v924_v4, %v765_v20  ;;  %v1709_v4 = vmul.u32 52429, %v1705_v9  ;;  %v1693_v19 = vadd.s32 %v1691_v5, %v1689_v38  ;;  %v1668_v26 = vmul.u32 10, %v1667_v60  ;;  %vm3286_vm11 = vmand %vm1858_vm10, %vm1848_vm9 }
 0x117   : > { %vm1715_vm5 = vc.u32 %v1707_v8, %v1711_v21  ;;  %v1717_v32 = vadd.s32 %v1711_v21, %v1707_v8  ;;  %v1712_v20 = vshrl.u32 %v1708_v57, 16 }
 0x118   : > { %v1034_v22 = vpop.f32.mrf.mxu1  ;;  %v1500_v25 = vpop.f32.mrf.mxu0  ;;  %v1713_v18 = vshll.u32 %v1709_v4, 16  ;;  %v1694_v15 = vadd.s32 %v1693_v19, %v1683_v14  ;;  %v1716_v34 = vsel %vm1715_vm5, 1, %v2685_v44  ;;  %v3263_v39 = vsub.s32 %v3183_v46, %v1668_v26 }
 0x119   : > { %v590_v58 = vpop.f32.mrf.mxu2  ;;  %v1059_v31 = vadd.f32 %v1034_v22, %v3136_v54  ;;  %v1718_v36 = vadd.s32 %v1716_v34, %v1710_v28  ;;  %v1714_v23 = vshrl.u32 %v1709_v4, 16  ;;  %v1734_v46 = vshrl.u32 %v3259_v29, 16 }
 0x11a   : > { %v602_v63 = vadd.f32 %v590_v58, %v471_v0  ;;  %v1695_v54 = vadd.s32 %v1694_v15, %v1685_v7  ;;  %vm1719_vm8 = vc.u32 %v1717_v32, %v1713_v18  ;;  %v1733_v0 = vand.u32 65535, %v3259_v29 }
 0x11b   : > { %v1720_v42 = vsel %vm1719_vm8, 1, %v2685_v44  ;;  %vm1849_vm12 = vcmp.ne.s32.totalorder %v3263_v39, 0  ;;  %v1738_v59 = vmul.u32 52429, %v1734_v46  ;;  %vm1859_vm13 = vcmp.lt.s32.totalorder %v3263_v39, 0 }
 0x11c   : > { %v766_v6 = vadd.f32 %v3186_v49, %v602_v63  ;;  %v1877_v49 = vadd.s32 10, %v3220_v10  ;;  %v1722_v51 = vadd.s32 %v1720_v42, %v1718_v36  ;;  %v1696_v12 = vshrl.u32 %v1695_v54, 3  ;;  %vm3304_vm15 = vmand %vm1859_vm13, %vm1849_vm12 }
 0x11d   : > { %v1737_v58 = vmul.u32 52428, %v1733_v0  ;;  %v1739_v14 = vmul.u32 52428, %v1734_v46  ;;  %v1742_v5 = vshll.u32 %v1738_v59, 16  ;;  %v1879_v4 = vadd.s32 10, %v3263_v39 }
 0x11e   : > { %v3266_v48 = vadd.f32 %v926_v33, %v766_v6  ;;  %v1887_v52 = vsel %vm3254_vm7, %v1877_v49, %v3220_v10  ;;  %v1878_v33 = vadd.s32 10, %v3241_v40  ;;  %v1723_v55 = vadd.s32 %v1722_v51, %v1712_v20 }
 0x11f   : > { %vm3293_vm14 = vcmp.lt.s32.totalorder %v1887_v52, 8  ;;  %v1740_v57 = vshll.u32 %v1737_v58, 16  ;;  %v1697_v6 = vmul.u32 10, %v1696_v12  ;;  %v2686_v22 = vmov 0.0  }
 0x120   : > { %v1036_v10 = vpop.f32.mrf.mxu1  ;;  %v1502_v56 = vpop.f32.mrf.mxu0  ;;  %v1724_v9 = vadd.s32 %v1723_v55, %v1714_v23  ;;  %v1888_v8 = vsel %vm3286_vm11, %v1878_v33, %v3241_v40  ;;  %v2547_v40 = vsel %vm3293_vm14, 1.0, %v2686_v22  ;;  %v1889_v53 = vsel %vm3304_vm15, %v1879_v4, %v3263_v39 }
 0x121   : > { %v1198_v37 = vpop.f32.mrf.mxu2  ;;  %v1060_v38 = vadd.f32 %v1036_v10, %v3143_v2  ;;  %vm3315_vm1 = vcmp.lt.s32.totalorder %v1888_v8, 8  ;;  %v3324_v49 = vsub.s32 %v3197_v61, %v1697_v6  ;;  %v3328_v42 = vadd.s32 56, %v3149_v24  ;;  %v1377_v39 = vpop.f32.mrf.mxu3 }
 0x122   : > { %v1223_v50 = vadd.f32 %v1198_v37, %v1059_v31  ;;  %v1725_v19 = vshrl.u32 %v1724_v9, 3  ;;  %v1741_v31 = vshrl.u32 %v1737_v58, 16  ;;  %v1743_v37 = vshrl.u32 %v1738_v59, 16 }
 0x123   : > { %v2548_v61 = vsel %vm3315_vm1, 1.0, %v2686_v22  ;;  %vm3334_vm3 = vcmp.lt.s32.totalorder %v1889_v53, 8  ;;  %v1762_v33 = vand.u32 65535, %v3328_v42  ;;  %v1763_v12 = vshrl.u32 %v3328_v42, 16 }
 0x124   : > { %v1395_v47 = vadd.f32 %v3204_v3, %v1223_v50  ;;  %v1736_v3 = vmul.u32 52429, %v1733_v0  ;;  %v1726_v36 = vmul.u32 10, %v1725_v19  ;;  %vm1850_vm4 = vcmp.ne.s32.totalorder %v3324_v49, 0 }
 0x125   : > { %vm1860_vm5 = vcmp.lt.s32.totalorder %v3324_v49, 0  ;;  %v3349_v59 = vsel %vm3334_vm3, 1.0, %v2686_v22  ;;  %v3352_v9 = vadd.s32 64, %v3149_v24 }
 0x126   : > { %v1525_v60 = vadd.f32 %v1500_v25, %v1395_v47  ;;  %vm1744_vm0 = vc.u32 %v1736_v3, %v1740_v57  ;;  %v1746_v21 = vadd.s32 %v1740_v57, %v1736_v3  ;;  %v2546_v25 = vsel %vm3244_vm6, 1.0, %v2686_v22  ;;  %vm3360_vm6 = vmand %vm1860_vm5, %vm1850_vm4 }
 0x127   : > { %v1745_v28 = vsel %vm1744_vm0, 1, %v2685_v44  ;;  %v1767_v57 = vmul.u32 52429, %v1763_v12 }
 0x128   : > { %1535 = vst [vmem:[%s3282_s19] sm:$0xff] %v1525_v60  ;;  %v1747_v15 = vadd.s32 %v1745_v28, %v1739_v14  ;;  %vm1748_vm2 = vc.u32 %v1746_v21, %v1742_v5  ;;  %v1039_v62 = vpop.f32.mrf.mxu1  ;;  %v1505_v54 = vpop.f32.mrf.mxu0  ;;  %v1952_v50 = vmul.f32 %v1525_v60, %v1525_v60  ;;  %v1926_v52 = vmul.f32 %v2546_v25, %v1525_v60 }
 0x129   : > { %v1200_v7 = vpop.f32.mrf.mxu2  ;;  %v1749_v34 = vsel %vm1748_vm2, 1, %v2685_v44  ;;  %v1061_v51 = vadd.f32 %v1039_v62, %v3145_v13  ;;  %v3344_v13 = vsub.s32 %v3223_v45, %v1726_v36  ;;  %v1765_v60 = vmul.u32 52429, %v1762_v33 }
 0x12a   : > { %v1224_v26 = vadd.f32 %v1200_v7, %v1060_v38  ;;  %v1751_v20 = vadd.s32 %v1749_v34, %v1747_v15  ;;  %v1766_v38 = vmul.u32 52428, %v1762_v33  ;;  %v1880_v45 = vadd.s32 10, %v3324_v49 }
 0x12b   : > { %vm1851_vm7 = vcmp.ne.s32.totalorder %v3344_v13, 0  ;;  %v1768_v7 = vmul.u32 52428, %v1763_v12  ;;  %vm1861_vm8 = vcmp.lt.s32.totalorder %v3344_v13, 0  ;;  %v1771_v21 = vshll.u32 %v1767_v57, 16 }
 0x12c   : > { %v1396_v32 = vadd.f32 %v3235_v1, %v1224_v26  ;;  %v1752_v0 = vadd.s32 %v1751_v20, %v1741_v31  ;;  %v1769_v2 = vshll.u32 %v1766_v38, 16  ;;  %v1791_v26 = vand.u32 65535, %v3352_v9  ;;  %vm3381_vm10 = vmand %vm1861_vm8, %vm1851_vm7 }
 0x12d   : > { %v1890_v31 = vsel %vm3360_vm6, %v1880_v45, %v3324_v49  ;;  %v3375_v53 = vadd.s32 10, %v3344_v13  ;;  %v1770_v62 = vshrl.u32 %v1766_v38, 16 }
 0x12e   : > { %v1526_v1 = vadd.f32 %v1502_v56, %v1396_v32  ;;  %v1753_v10 = vadd.s32 %v1752_v0, %v1743_v37  ;;  %v1962_v56 = vmul.f32 %v2546_v25, %v1952_v50  ;;  %vm1773_vm9 = vc.u32 %v1765_v60, %v1769_v2 }
 0x12f   : > { %v1775_v25 = vadd.s32 %v1769_v2, %v1765_v60  ;;  %v1774_v15 = vsel %vm1773_vm9, 1, %v2685_v44  ;;  %vm3388_vm12 = vcmp.lt.s32.totalorder %v1890_v31, 8 }
 0x130   : > { %1536 = vst [vmem:[%s3282_s19 + $0x8] sm:$0xff] %v1526_v1  ;;  %v1927_v46 = vmul.f32 %v2547_v40, %v1526_v1  ;;  %v1953_v47 = vmul.f32 %v1526_v1, %v1526_v1  ;;  %v1041_v5 = vpop.f32.mrf.mxu1  ;;  %v1507_v8 = vpop.f32.mrf.mxu0  ;;  %v1754_v6 = vshrl.u32 %v1753_v10, 3  ;;  %v1794_v1 = vmul.u32 52429, %v1791_v26 }
 0x131   : > { %v1203_v55 = vpop.f32.mrf.mxu2  ;;  %v1062_v19 = vadd.f32 %v1041_v5, %v3153_v30  ;;  %v1380_v30 = vpop.f32.mrf.mxu3  ;;  %vm1777_vm11 = vc.u32 %v1775_v25, %v1771_v21  ;;  %v2550_v31 = vsel %vm3388_vm12, 1.0, %v2686_v22 }
 0x132   : > { %v1936_v35 = vadd.f32 %v1927_v46, %v1926_v52  ;;  %v1963_v3 = vmul.f32 %v2547_v40, %v1953_v47  ;;  %v1225_v58 = vadd.f32 %v1203_v55, %v1061_v51  ;;  %v1792_v40 = vshrl.u32 %v3352_v9, 16 }
 0x133   : > { %v1755_v34 = vmul.u32 10, %v1754_v6  ;;  %v1778_v49 = vsel %vm1777_vm11, 1, %v2685_v44  ;;  %v1795_v51 = vmul.u32 52428, %v1791_v26  ;;  %v1772_v46 = vshrl.u32 %v1767_v57, 16 }
 0x134   : > { %v1972_v63 = vadd.f32 %v1963_v3, %v1962_v56  ;;  %v1397_v14 = vadd.f32 %v3276_v11, %v1225_v58  ;;  %v3386_v52 = vmul.u32 52429, %v1792_v40  ;;  %v1891_v55 = vsel %vm3381_vm10, %v3375_v53, %v3344_v13 }
 0x135   : > { %v1797_v10 = vmul.u32 52428, %v1792_v40  ;;  %v1798_v56 = vshll.u32 %v1795_v51, 16  ;;  %v3399_v60 = vsub.s32 %v3259_v29, %v1755_v34  ;;  %vm3416_vm15 = vcmp.lt.s32.totalorder %v1891_v55, 8 }
 0x136   : > { %v1527_v11 = vadd.f32 %v1505_v54, %v1397_v14  ;;  %v1776_v54 = vadd.s32 %v1774_v15, %v1768_v7  ;;  %v1800_v58 = vshll.u32 %v3386_v52, 16 }
 0x137   : > { %vm1802_vm13 = vc.u32 %v1794_v1, %v1798_v56  ;;  %v1804_v38 = vadd.s32 %v1798_v56, %v1794_v1  ;;  %vm1852_vm0 = vcmp.ne.s32.totalorder %v3399_v60, 0  ;;  %vm1862_vm2 = vcmp.lt.s32.totalorder %v3399_v60, 0 }
 0x138   : > { %1537 = vst [vmem:[%s3282_s19 + $0x10] sm:$0xff] %v1527_v11  ;;  %v1928_v28 = vmul.f32 %v2548_v61, %v1527_v11  ;;  %v1954_v18 = vmul.f32 %v1527_v11, %v1527_v11  ;;  %v1044_v47 = vpop.f32.mrf.mxu1  ;;  %v1510_v33 = vpop.f32.mrf.mxu0  ;;  %v1803_v57 = vsel %vm1802_vm13, 1, %v2685_v44  ;;  %vm3430_vm4 = vmand %vm1862_vm2, %vm1852_vm0 }
 0x139   : > { %v1205_v32 = vpop.f32.mrf.mxu2  ;;  %v1063_v3 = vadd.f32 %v1044_v47, %v3164_v16  ;;  %v1805_v16 = vadd.s32 %v1803_v57, %v1797_v10  ;;  %vm1806_vm14 = vc.u32 %v1804_v38, %v1800_v58  ;;  %v1382_v2 = vpop.f32.mrf.mxu3 }
 0x13a   : > { %v1937_v36 = vadd.f32 %v1936_v35, %v1928_v28  ;;  %v1964_v37 = vmul.f32 %v2548_v61, %v1954_v18  ;;  %v1226_v20 = vadd.f32 %v1205_v32, %v1062_v19  ;;  %v1780_v61 = vadd.s32 %v1778_v49, %v1776_v54 }
 0x13b   : > { %v1807_v11 = vsel %vm1806_vm14, 1, %v2685_v44 }
 0x13c   : > { %v1973_v23 = vadd.f32 %v1972_v63, %v1964_v37  ;;  %v1398_v0 = vadd.f32 %v1377_v39, %v1226_v20  ;;  %v1781_v39 = vadd.s32 %v1780_v61, %v1770_v62  ;;  %v3402_v63 = vadd.s32 72, %v3149_v24 }
 0x13d   : > { %v1799_v24 = vshrl.u32 %v1795_v51, 16  ;;  %v1809_v18 = vadd.s32 %v1807_v11, %v1805_v16 }
 0x13e   : > { %v1528_v35 = vadd.f32 %v1507_v8, %v1398_v0  ;;  %v1782_v45 = vadd.s32 %v1781_v39, %v1772_v46  ;;  %v1820_v8 = vand.u32 65535, %v3402_v63  ;;  %v1821_v29 = vshrl.u32 %v3402_v63, 16 }
 0x140   : > { %1538 = vst [vmem:[%s3282_s19 + $0x18] sm:$0xff] %v1528_v35  ;;  %v1929_v14 = vmul.f32 %v3349_v59, %v1528_v35  ;;  %v1955_v13 = vmul.f32 %v1528_v35, %v1528_v35  ;;  %v1823_v19 = vmul.u32 52429, %v1820_v8  ;;  %v1824_v21 = vmul.u32 52428, %v1820_v8  ;;  %v1046_v15 = vpop.f32.mrf.mxu1  ;;  %v1512_v32 = vpop.f32.mrf.mxu0 }
 0x141   : > { %v1208_v5 = vpop.f32.mrf.mxu2  ;;  %v1825_v25 = vmul.u32 52429, %v1821_v29  ;;  %v1783_v28 = vshrl.u32 %v1782_v45, 3  ;;  %v1064_v54 = vadd.f32 %v1046_v15, %v3178_v27  ;;  %v1826_v37 = vmul.u32 52428, %v1821_v29  ;;  %v1385_v39 = vpop.f32.mrf.mxu3 }
 0x142   : > { %v1938_v4 = vadd.f32 %v1937_v36, %v1929_v14  ;;  %v1965_v6 = vmul.f32 %v3349_v59, %v1955_v13  ;;  %v1227_v7 = vadd.f32 %v1208_v5, %v1063_v3  ;;  %v1801_v59 = vshrl.u32 %v3386_v52, 16 }
 0x143   : > { %v1827_v53 = vshll.u32 %v1824_v21, 16  ;;  %v1829_v34 = vshll.u32 %v1825_v25, 16  ;;  %v1810_v36 = vadd.s32 %v1809_v18, %v1799_v24  ;;  %v1784_v1 = vmul.u32 10, %v1783_v28 }
 0x144   : > { %v1974_v26 = vadd.f32 %v1973_v23, %v1965_v6  ;;  %v1399_v40 = vadd.f32 %v1380_v30, %v1227_v7  ;;  %v1828_v23 = vshrl.u32 %v1824_v21, 16  ;;  %v2551_v3 = vsel %vm3416_vm15, 1.0, %v2686_v22 }
 0x145   : > { %vm1831_vm1 = vc.u32 %v1823_v19, %v1827_v53  ;;  %v1833_v20 = vadd.s32 %v1827_v53, %v1823_v19  ;;  %v1811_v52 = vadd.s32 %v1810_v36, %v1801_v59  ;;  %v1830_v14 = vshrl.u32 %v1825_v25, 16 }
 0x146   : > { %v1529_v62 = vadd.f32 %v1510_v33, %v1399_v40  ;;  %v1832_v27 = vsel %vm1831_vm1, 1, %v2685_v44  ;;  %v1882_v33 = vadd.s32 10, %v3399_v60 }
 0x147   : > { %vm1835_vm3 = vc.u32 %v1833_v20, %v1829_v34  ;;  %v1834_v47 = vadd.s32 %v1832_v27, %v1826_v37  ;;  %v1812_v38 = vshrl.u32 %v1811_v52, 3 }
 0x148   : > { %1539 = vst [vmem:[%s3282_s19 + $0x20] sm:$0xff] %v1529_v62  ;;  %v1930_v50 = vmul.f32 %v2550_v31, %v1529_v62  ;;  %v1956_v49 = vmul.f32 %v1529_v62, %v1529_v62  ;;  %v1836_v12 = vsel %vm1835_vm3, 1, %v2685_v44  ;;  %v1049_v58 = vpop.f32.mrf.mxu1  ;;  %v1785_v44 = vsub.s32 %v3328_v42, %v1784_v1  ;;  %v1515_v5 = vpop.f32.mrf.mxu0 }
 0x149   : > { %v1210_v51 = vpop.f32.mrf.mxu2  ;;  %v1838_v35 = vadd.s32 %v1836_v12, %v1834_v47  ;;  %v1065_v45 = vadd.f32 %v1049_v58, %v3191_v43  ;;  %v1892_v16 = vsel %vm3430_vm4, %v1882_v33, %v3399_v60  ;;  %v1813_v6 = vmul.u32 10, %v1812_v38 }
 0x14a   : > { %v1939_v0 = vadd.f32 %v1938_v4, %v1930_v50  ;;  %v1966_v46 = vmul.f32 %v2550_v31, %v1956_v49  ;;  %v1228_v61 = vadd.f32 %v1210_v51, %v1064_v54  ;;  %vm1853_vm5 = vcmp.ne.s32.totalorder %v1785_v44, 0  ;;  %v1387_v31 = vpop.f32.mrf.mxu3 }
 0x14b   : > { %v1839_v57 = vadd.s32 %v1838_v35, %v1828_v23  ;;  %vm1863_vm6 = vcmp.lt.s32.totalorder %v1785_v44, 0  ;;  %vm1902_vm7 = vcmp.lt.s32.totalorder %v1892_v16, 8  ;;  %v1883_v43 = vadd.s32 10, %v1785_v44 }
 0x14c   : > { %v1975_v55 = vadd.f32 %v1974_v26, %v1966_v46  ;;  %v1400_v10 = vadd.f32 %v1382_v2, %v1228_v61  ;;  %vm3443_vm8 = vmand %vm1863_vm6, %vm1853_vm5  ;;  %v2552_v60 = vsel %vm1902_vm7, 1.0, %v2686_v22  ;;  %v1814_v26 = vsub.s32 %v3352_v9, %v1813_v6 }
 0x14d   : > { %v1840_v7 = vadd.s32 %v1839_v57, %v1830_v14  ;;  %v1893_v15 = vsel %vm3443_vm8, %v1883_v43, %v1785_v44 }
 0x14e   : > { %v1530_v13 = vadd.f32 %v1512_v32, %v1400_v10  ;;  %vm1854_vm9 = vcmp.ne.s32.totalorder %v1814_v26, 0  ;;  %vm1864_vm10 = vcmp.lt.s32.totalorder %v1814_v26, 0  ;;  %vm1903_vm11 = vcmp.lt.s32.totalorder %v1893_v15, 8 }
 0x14f   : > { %v1841_v40 = vshrl.u32 %v1840_v7, 3  ;;  %v1884_v37 = vadd.s32 10, %v1814_v26  ;;  %vm3453_vm12 = vmand %vm1864_vm10, %vm1854_vm9  ;;  %v2553_v50 = vsel %vm1903_vm11, 1.0, %v2686_v22 }
 0x150   : > { %1540 = vst [vmem:[%s3282_s19 + $0x28] sm:$0xff] %v1530_v13  ;;  %v1931_v8 = vmul.f32 %v2551_v3, %v1530_v13  ;;  %v1957_v29 = vmul.f32 %v1530_v13, %v1530_v13  ;;  %v1051_v25 = vpop.f32.mrf.mxu1  ;;  %v1517_v53 = vpop.f32.mrf.mxu0 }
 0x151   : > { %v1213_v4 = vpop.f32.mrf.mxu2  ;;  %v1066_v18 = vadd.f32 %v1051_v25, %v3210_v41  ;;  %v1842_v62 = vmul.u32 10, %v1841_v40  ;;  %v1894_v23 = vsel %vm3453_vm12, %v1884_v37, %v1814_v26 }
 0x152   : > { %v1940_v42 = vadd.f32 %v1939_v0, %v1931_v8  ;;  %v1967_v24 = vmul.f32 %v2551_v3, %v1957_v29  ;;  %v1229_v2 = vadd.f32 %v1213_v4, %v1065_v45  ;;  %v1390_v46 = vpop.f32.mrf.mxu3  ;;  %vm1904_vm15 = vcmp.lt.s32.totalorder %v1894_v23, 8 }
 0x153   : > { %v1843_v1 = vsub.s32 %v3402_v63, %v1842_v62 }
 0x154   : > { %v1976_v11 = vadd.f32 %v1975_v55, %v1967_v24  ;;  %v1401_v19 = vadd.f32 %v1385_v39, %v1229_v2 }
 0x155   : > { %vm1855_vm13 = vcmp.ne.s32.totalorder %v1843_v1, 0  ;;  %vm1865_vm14 = vcmp.lt.s32.totalorder %v1843_v1, 0  ;;  %v1885_v63 = vadd.s32 10, %v1843_v1 }
 0x156   : > { %v1531_v28 = vadd.f32 %v1515_v5, %v1401_v19  ;;  %vm1875_vm0 = vmand %vm1865_vm14, %vm1855_vm13 }
 0x157   : > { %v1895_v58 = vsel %vm1875_vm0, %v1885_v63, %v1843_v1 }
 0x158   : > { %1541 = vst [vmem:[%s3282_s19 + $0x30] sm:$0xff] %v1531_v28  ;;  %v1932_v32 = vmul.f32 %v2552_v60, %v1531_v28  ;;  %v1958_v59 = vmul.f32 %v1531_v28, %v1531_v28  ;;  %v1054_v49 = vpop.f32.mrf.mxu1  ;;  %v1520_v55 = vpop.f32.mrf.mxu0  ;;  %vm1905_vm1 = vcmp.lt.s32.totalorder %v1895_v58, 8 }
 0x159   : > { %v1215_v34 = vpop.f32.mrf.mxu2  ;;  %v1067_v52 = vadd.f32 %v1054_v49, %v3226_v17  ;;  %v2554_v17 = vsel %vm1904_vm15, 1.0, %v2686_v22  ;;  %v2555_v4 = vsel %vm1905_vm1, 1.0, %v2686_v22 }
 0x15a   : > { %v1941_v54 = vadd.f32 %v1940_v42, %v1932_v32  ;;  %v1968_v36 = vmul.f32 %v2552_v60, %v1958_v59  ;;  %v1230_v9 = vadd.f32 %v1215_v34, %v1066_v18  ;;  %v1392_v5 = vpop.f32.mrf.mxu3 }
 0x15c   : > { %v1977_v30 = vadd.f32 %v1976_v11, %v1968_v36  ;;  %v1402_v41 = vadd.f32 %v1387_v31, %v1230_v9 }
 0x15e   : > { %v1532_v51 = vadd.f32 %v1517_v53, %v1402_v41 }
 0x160   : > { %1542 = vst [vmem:[%s3282_s19 + $0x38] sm:$0xff] %v1532_v51  ;;  %v1933_v27 = vmul.f32 %v2553_v50, %v1532_v51  ;;  %v1959_v0 = vmul.f32 %v1532_v51, %v1532_v51  ;;  %v1056_v35 = vpop.f32.mrf.mxu1  ;;  %v1522_v29 = vpop.f32.mrf.mxu0 }
 0x161   : > { %v1218_v61 = vpop.f32.mrf.mxu2  ;;  %v1068_v39 = vadd.f32 %v1056_v35, %v3266_v48 }
 0x162   : > { %v1942_v47 = vadd.f32 %v1941_v54, %v1933_v27  ;;  %v1969_v33 = vmul.f32 %v2553_v50, %v1959_v0  ;;  %v1231_v12 = vadd.f32 %v1218_v61, %v1067_v52 }
 0x164   : > { %v1978_v10 = vadd.f32 %v1977_v30, %v1969_v33  ;;  %v1403_v56 = vadd.f32 %v1390_v46, %v1231_v12 }
 0x166   : > { %v1533_v3 = vadd.f32 %v1520_v55, %v1403_v56 }
 0x168   : > { %1543 = vst [vmem:[%s3282_s19 + $0x40] sm:$0xff] %v1533_v3  ;;  %v1934_v44 = vmul.f32 %v2554_v17, %v1533_v3  ;;  %v1960_v38 = vmul.f32 %v1533_v3, %v1533_v3 }
 0x169   : > { %v1220_v14 = vpop.f32.mrf.mxu2 }
 0x16a   : > { %v1943_v13 = vadd.f32 %v1942_v47, %v1934_v44  ;;  %v1970_v45 = vmul.f32 %v2554_v17, %v1960_v38  ;;  %v1232_v57 = vadd.f32 %v1220_v14, %v1068_v39 }
 0x16c   : > { %v1979_v16 = vadd.f32 %v1978_v10, %v1970_v45  ;;  %v1404_v8 = vadd.f32 %v1392_v5, %v1232_v57 }
 0x16e   : > { %v1534_v6 = vadd.f32 %v1522_v29, %v1404_v8 }
 0x170   : > { %1544 = vst [vmem:[%s3282_s19 + $0x48] sm:$0xff] %v1534_v6  ;;  %v1935_v48 = vmul.f32 %v2555_v4, %v1534_v6  ;;  %v1961_v7 = vmul.f32 %v1534_v6, %v1534_v6 }
 0x172   : > { %v1944_v42 = vadd.f32 %v1943_v13, %v1935_v48  ;;  %v1971_v24 = vmul.f32 %v2555_v4, %v1961_v7 }
 0x174   : > { %v1945_v2 = vrot.slane %v1944_v42, 4  ;;  %v1980_v43 = vadd.f32 %v1979_v16, %v1971_v24 }
 0x176   : > { %v1946_v11 = vadd.f32 %v1945_v2, %v1944_v42  ;;  %v1981_v19 = vrot.slane %v1980_v43, 4 }
 0x178   : > { %v1947_v21 = vrot.slane %v1946_v11, 2  ;;  %v1982_v60 = vadd.f32 %v1981_v19, %v1980_v43 }
 0x17a   : > { %v1948_v25 = vadd.f32 %v1947_v21, %v1946_v11  ;;  %v1983_v26 = vrot.slane %v1982_v60, 2 }
 0x17c   : > { %v1949_v40 = vrot.slane %v1948_v25, 1  ;;  %v1984_v28 = vadd.f32 %v1983_v26, %v1982_v60 }
 0x17e   : > { %v1950_v22 = vadd.f32 %v1949_v40, %v1948_v25  ;;  %v1985_v18 = vrot.slane %v1984_v28, 1 }
 0x180   : > { %1951 = vst [vmem:[%s181_s23] sm:$0x1] %v1950_v22  ;;  %v1986_v31 = vadd.f32 %v1985_v18, %v1984_v28 }
 0x182   : > { %1987 = vst [vmem:[%s181_s23 + $0x1] sm:$0x1] %v1986_v31 }
 0x183 PF: > { %s14_s12 = sadd.s32 1, %s2683_s12  }
 0x184   : > { %p11_p4 = scmp.ge.s32.totalorder %s14_s12, 4  }
 0x186   :  { %13 = sbr.rel (!%p11_p4) target bundleno = 1 (0x1), region = 78 }

// kernel: _basic_block_impl.9
= control target key start
LH: loop header
LB: loop body
LE: loop exit
PB: predicated region body
PF: predicated region fallthrough
CT: control target
= control target key end

     0   :  { %s542_s0 = inlined_call_operand.vmem [shape: f32[160,128], index: 0, kind: input, shape index: {}]   ;;  %s543_s1 = inlined_call_operand.vmem [shape: f32[160,128], index: 1, kind: input, shape index: {}]   ;;  %s544_s2 = inlined_call_operand.vmem [shape: f32[1,128], index: 2, kind: input, shape index: {}]   ;;  %s545_s3 = inlined_call_operand.vmem [shape: f32[1,128], index: 3, kind: input, shape index: {}]   ;;  %s546_s4 = inlined_call_operand.vmem [shape: f32[1,128], index: 4, kind: input, shape index: {}]   ;;  %s547_s5 = inlined_call_operand.vmem [shape: f32[1,128], index: 5, kind: input, shape index: {}]   ;;  %s548_s6 = inlined_call_operand.vmem [shape: f32[160,128], index: 6, kind: output, shape index: {}]  }
   0x1   :  { %v23_v0 = vld [vmem:[%s542_s0] sm:$0xff]  ;;  %v24_v7 = vld [vmem:[%s542_s0 + $0x8] sm:$0xff]  ;;  %v25_v13 = vld [vmem:[%s542_s0 + $0x10] sm:$0xff] }
   0x2   :  { %v268_v1 = vld [vmem:[%s544_s2] ss:$0 sm:$0xff]  ;;  %v92_v8 = vld [vmem:[%s543_s1 + $0x8] sm:$0xff]  ;;  %v93_v14 = vld [vmem:[%s543_s1 + $0x10] sm:$0xff] }
   0x3   :  { %v273_v2 = vld [vmem:[%s545_s3] ss:$0 sm:$0xff]  ;;  %v47_v4 = vmul.f32 %v268_v1, %v23_v0  ;;  %v48_v11 = vmul.f32 %v268_v1, %v24_v7  ;;  %v26_v15 = vld [vmem:[%s542_s0 + $0x18] sm:$0xff]  ;;  %v49_v16 = vmul.f32 %v268_v1, %v25_v13  ;;  %v28_v26 = vld [vmem:[%s542_s0 + $0x28] sm:$0xff] }
   0x4   :  { %v91_v3 = vld [vmem:[%s543_s1] sm:$0xff]  ;;  %v50_v18 = vmul.f32 %v268_v1, %v26_v15  ;;  %v94_v19 = vld [vmem:[%s543_s1 + $0x18] sm:$0xff]  ;;  %v96_v27 = vld [vmem:[%s543_s1 + $0x28] sm:$0xff]  ;;  %v52_v39 = vmul.f32 %v268_v1, %v28_v26 }
   0x5   :  { %v282_v5 = vld [vmem:[%s546_s4] ss:$0 sm:$0xff]  ;;  %v71_v9 = vadd.f32 %v273_v2, %v47_v4  ;;  %v72_v23 = vadd.f32 %v273_v2, %v48_v11  ;;  %v73_v28 = vadd.f32 %v273_v2, %v49_v16  ;;  %v29_v36 = vld [vmem:[%s542_s0 + $0x30] sm:$0xff]  ;;  %v30_v42 = vld [vmem:[%s542_s0 + $0x38] sm:$0xff] }
   0x6   :  { %v287_v6 = vld [vmem:[%s547_s5] ss:$0 sm:$0xff]  ;;  %v115_v10 = vmul.f32 %v282_v5, %v91_v3  ;;  %v116_v12 = vmul.f32 %v282_v5, %v92_v8  ;;  %v117_v17 = vmul.f32 %v282_v5, %v93_v14  ;;  %v118_v25 = vmul.f32 %v282_v5, %v94_v19  ;;  %v97_v41 = vld [vmem:[%s543_s1 + $0x30] sm:$0xff]  ;;  %v98_v47 = vld [vmem:[%s543_s1 + $0x38] sm:$0xff] }
   0x7   :  { %v27_v20 = vld [vmem:[%s542_s0 + $0x20] sm:$0xff]  ;;  %v74_v30 = vadd.f32 %v273_v2, %v50_v18  ;;  %v120_v40 = vmul.f32 %v282_v5, %v96_v27  ;;  %v76_v50 = vadd.f32 %v273_v2, %v52_v39  ;;  %v53_v52 = vmul.f32 %v268_v1, %v29_v36  ;;  %v32_v58 = vld [vmem:[%s542_s0 + $0x48] sm:$0xff]  ;;  %v33_v0 = vld [vmem:[%s542_s0 + $0x50] sm:$0xff] }
   0x8   :  { %v95_v21 = vld [vmem:[%s543_s1 + $0x20] sm:$0xff]  ;;  %v139_v22 = vadd.f32 %v287_v6, %v115_v10  ;;  %v140_v24 = vadd.f32 %v287_v6, %v116_v12  ;;  %v141_v29 = vadd.f32 %v287_v6, %v117_v17  ;;  %v51_v31 = vmul.f32 %v268_v1, %v27_v20  ;;  %v100_v63 = vld [vmem:[%s543_s1 + $0x48] sm:$0xff]  ;;  %v34_v10 = vld [vmem:[%s542_s0 + $0x58] sm:$0xff] }
   0x9   :  { %v142_v34 = vadd.f32 %v287_v6, %v118_v25  ;;  %v119_v35 = vmul.f32 %v282_v5, %v95_v21  ;;  %v31_v48 = vld [vmem:[%s542_s0 + $0x40] sm:$0xff]  ;;  %v144_v51 = vadd.f32 %v287_v6, %v120_v40  ;;  %v121_v56 = vmul.f32 %v282_v5, %v97_v41  ;;  %v102_v19 = vld [vmem:[%s543_s1 + $0x58] sm:$0xff]  ;;  %v37_v36 = vld [vmem:[%s542_s0 + $0x70] sm:$0xff] }
   0xa   :  { %v159_v32 = vadd.f32 %v139_v22, %v71_v9  ;;  %v160_v33 = vadd.f32 %v140_v24, %v72_v23  ;;  %v161_v37 = vadd.f32 %v141_v29, %v73_v28  ;;  %v75_v38 = vadd.f32 %v273_v2, %v51_v31  ;;  %v99_v53 = vld [vmem:[%s543_s1 + $0x40] sm:$0xff]  ;;  %v101_v9 = vld [vmem:[%s543_s1 + $0x50] sm:$0xff]  ;;  %v104_v31 = vld [vmem:[%s543_s1 + $0x68] sm:$0xff] }
   0xb   :  { %v162_v45 = vadd.f32 %v142_v34, %v74_v30  ;;  %v143_v46 = vadd.f32 %v287_v6, %v119_v35  ;;  %v54_v57 = vmul.f32 %v268_v1, %v30_v42  ;;  %v164_v59 = vadd.f32 %v144_v51, %v76_v50  ;;  %v35_v24 = vld [vmem:[%s542_s0 + $0x60] sm:$0xff]  ;;  %v36_v30 = vld [vmem:[%s542_s0 + $0x68] sm:$0xff]  ;;  %v106_v51 = vld [vmem:[%s543_s1 + $0x78] sm:$0xff] }
   0xc   :  { %v179_v43 = vmax.f32 %v159_v32, 0.0  ;;  %v180_v44 = vmax.f32 %v160_v33, 0.0  ;;  %v181_v49 = vmax.f32 %v161_v37, 0.0  ;;  %v77_v60 = vadd.f32 %v273_v2, %v53_v52  ;;  %v103_v25 = vld [vmem:[%s543_s1 + $0x60] sm:$0xff] }
   0xd   :  { %v182_v54 = vmax.f32 %v162_v45, 0.0  ;;  %v163_v55 = vadd.f32 %v143_v46, %v75_v38  ;;  %v122_v61 = vmul.f32 %v282_v5, %v98_v47  ;;  %v55_v62 = vmul.f32 %v268_v1, %v31_v48  ;;  %v105_v45 = vld [vmem:[%s543_s1 + $0x70] sm:$0xff]  ;;  %v38_v46 = vld [vmem:[%s542_s0 + $0x78] sm:$0xff]  ;;  %v39_v52 = vld [vmem:[%s542_s0 + $0x80] sm:$0xff] }
   0xe   :  { %199 = vst [vmem:[%s548_s6] sm:$0xff] %v179_v43  ;;  %v145_v4 = vadd.f32 %v287_v6, %v121_v56  ;;  %v78_v7 = vadd.f32 %v273_v2, %v54_v57  ;;  %v123_v8 = vmul.f32 %v282_v5, %v99_v53  ;;  %v184_v11 = vmax.f32 %v164_v59, 0.0  ;;  %v107_v57 = vld [vmem:[%s543_s1 + $0x80] sm:$0xff] }
   0xf   :  { %200 = vst [vmem:[%s548_s6 + $0x8] sm:$0xff] %v180_v44  ;;  %v183_v3 = vmax.f32 %v163_v55, 0.0  ;;  %v146_v12 = vadd.f32 %v287_v6, %v122_v61  ;;  %v79_v13 = vadd.f32 %v273_v2, %v55_v62  ;;  %v56_v14 = vmul.f32 %v268_v1, %v32_v58  ;;  %v40_v62 = vld [vmem:[%s542_s0 + $0x88] sm:$0xff] }
  0x10   :  { %201 = vst [vmem:[%s548_s6 + $0x10] sm:$0xff] %v181_v49  ;;  %v165_v15 = vadd.f32 %v145_v4, %v77_v60  ;;  %v147_v16 = vadd.f32 %v287_v6, %v123_v8  ;;  %v124_v17 = vmul.f32 %v282_v5, %v100_v63  ;;  %v57_v18 = vmul.f32 %v268_v1, %v33_v0  ;;  %v41_v8 = vld [vmem:[%s542_s0 + $0x90] sm:$0xff] }
  0x11   :  { %202 = vst [vmem:[%s548_s6 + $0x18] sm:$0xff] %v182_v54  ;;  %v166_v20 = vadd.f32 %v146_v12, %v78_v7  ;;  %v80_v21 = vadd.f32 %v273_v2, %v56_v14  ;;  %v125_v22 = vmul.f32 %v282_v5, %v101_v9  ;;  %v58_v23 = vmul.f32 %v268_v1, %v34_v10  ;;  %v108_v7 = vld [vmem:[%s543_s1 + $0x88] sm:$0xff]  ;;  %v42_v14 = vld [vmem:[%s542_s0 + $0x98] sm:$0xff] }
  0x12   :  { %203 = vst [vmem:[%s548_s6 + $0x20] sm:$0xff] %v183_v3  ;;  %v185_v26 = vmax.f32 %v165_v15, 0.0  ;;  %v167_v27 = vadd.f32 %v147_v16, %v79_v13  ;;  %v148_v28 = vadd.f32 %v287_v6, %v124_v17  ;;  %v81_v29 = vadd.f32 %v273_v2, %v57_v18  ;;  %v109_v13 = vld [vmem:[%s543_s1 + $0x90] sm:$0xff] }
  0x13   :  { %204 = vst [vmem:[%s548_s6 + $0x28] sm:$0xff] %v184_v11  ;;  %v186_v32 = vmax.f32 %v166_v20, 0.0  ;;  %v149_v33 = vadd.f32 %v287_v6, %v125_v22  ;;  %v82_v34 = vadd.f32 %v273_v2, %v58_v23  ;;  %v126_v35 = vmul.f32 %v282_v5, %v102_v19  ;;  %v110_v23 = vld [vmem:[%s543_s1 + $0x98] sm:$0xff] }
  0x14   :  { %205 = vst [vmem:[%s548_s6 + $0x30] sm:$0xff] %v185_v26  ;;  %v187_v37 = vmax.f32 %v167_v27, 0.0  ;;  %v168_v38 = vadd.f32 %v148_v28, %v80_v21  ;;  %v59_v39 = vmul.f32 %v268_v1, %v35_v24  ;;  %v127_v40 = vmul.f32 %v282_v5, %v103_v25 }
  0x15   :  { %206 = vst [vmem:[%s548_s6 + $0x38] sm:$0xff] %v186_v32  ;;  %v169_v41 = vadd.f32 %v149_v33, %v81_v29  ;;  %v150_v42 = vadd.f32 %v287_v6, %v126_v35  ;;  %v60_v43 = vmul.f32 %v268_v1, %v36_v30  ;;  %v128_v44 = vmul.f32 %v282_v5, %v104_v31 }
  0x16   :  { %207 = vst [vmem:[%s548_s6 + $0x40] sm:$0xff] %v187_v37  ;;  %v188_v47 = vmax.f32 %v168_v38, 0.0  ;;  %v83_v48 = vadd.f32 %v273_v2, %v59_v39  ;;  %v151_v49 = vadd.f32 %v287_v6, %v127_v40  ;;  %v61_v50 = vmul.f32 %v268_v1, %v37_v36 }
  0x17   :  { %v189_v53 = vmax.f32 %v169_v41, 0.0  ;;  %v170_v54 = vadd.f32 %v150_v42, %v82_v34  ;;  %v84_v55 = vadd.f32 %v273_v2, %v60_v43  ;;  %v152_v56 = vadd.f32 %v287_v6, %v128_v44 }
  0x18   :  { %208 = vst [vmem:[%s548_s6 + $0x48] sm:$0xff] %v188_v47  ;;  %v171_v58 = vadd.f32 %v151_v49, %v83_v48  ;;  %v85_v59 = vadd.f32 %v273_v2, %v61_v50  ;;  %v129_v60 = vmul.f32 %v282_v5, %v105_v45  ;;  %v62_v61 = vmul.f32 %v268_v1, %v38_v46 }
  0x19   :  { %209 = vst [vmem:[%s548_s6 + $0x50] sm:$0xff] %v189_v53  ;;  %v190_v63 = vmax.f32 %v170_v54, 0.0  ;;  %v172_v0 = vadd.f32 %v152_v56, %v84_v55  ;;  %v130_v3 = vmul.f32 %v282_v5, %v106_v51  ;;  %v63_v4 = vmul.f32 %v268_v1, %v39_v52 }
  0x1a   :  { %v191_v9 = vmax.f32 %v171_v58, 0.0  ;;  %v153_v10 = vadd.f32 %v287_v6, %v129_v60  ;;  %v86_v11 = vadd.f32 %v273_v2, %v62_v61  ;;  %v131_v12 = vmul.f32 %v282_v5, %v107_v57 }
  0x1b   :  { %210 = vst [vmem:[%s548_s6 + $0x58] sm:$0xff] %v190_v63  ;;  %v192_v15 = vmax.f32 %v172_v0, 0.0  ;;  %v154_v16 = vadd.f32 %v287_v6, %v130_v3  ;;  %v87_v17 = vadd.f32 %v273_v2, %v63_v4  ;;  %v64_v18 = vmul.f32 %v268_v1, %v40_v62 }
  0x1c   :  { %211 = vst [vmem:[%s548_s6 + $0x60] sm:$0xff] %v191_v9  ;;  %v173_v19 = vadd.f32 %v153_v10, %v85_v59  ;;  %v155_v20 = vadd.f32 %v287_v6, %v131_v12  ;;  %v132_v21 = vmul.f32 %v282_v5, %v108_v7  ;;  %v65_v22 = vmul.f32 %v268_v1, %v41_v8 }
  0x1d   :  { %212 = vst [vmem:[%s548_s6 + $0x68] sm:$0xff] %v192_v15  ;;  %v174_v24 = vadd.f32 %v154_v16, %v86_v11  ;;  %v88_v25 = vadd.f32 %v273_v2, %v64_v18  ;;  %v133_v26 = vmul.f32 %v282_v5, %v109_v13  ;;  %v66_v27 = vmul.f32 %v268_v1, %v42_v14 }
  0x1e   :  { %v193_v28 = vmax.f32 %v173_v19, 0.0  ;;  %v175_v29 = vadd.f32 %v155_v20, %v87_v17  ;;  %v156_v30 = vadd.f32 %v287_v6, %v132_v21  ;;  %v89_v31 = vadd.f32 %v273_v2, %v65_v22 }
  0x1f   :  { %v194_v32 = vmax.f32 %v174_v24, 0.0  ;;  %v157_v33 = vadd.f32 %v287_v6, %v133_v26  ;;  %v90_v34 = vadd.f32 %v273_v2, %v66_v27  ;;  %v134_v35 = vmul.f32 %v282_v5, %v110_v23 }
  0x20   :  { %213 = vst [vmem:[%s548_s6 + $0x70] sm:$0xff] %v193_v28  ;;  %v195_v36 = vmax.f32 %v175_v29, 0.0  ;;  %v176_v37 = vadd.f32 %v156_v30, %v88_v25 }
  0x21   :  { %214 = vst [vmem:[%s548_s6 + $0x78] sm:$0xff] %v194_v32  ;;  %v177_v1 = vadd.f32 %v157_v33, %v89_v31  ;;  %v158_v38 = vadd.f32 %v287_v6, %v134_v35 }
  0x22   :  { %215 = vst [vmem:[%s548_s6 + $0x80] sm:$0xff] %v195_v36  ;;  %v196_v2 = vmax.f32 %v176_v37, 0.0 }
  0x23   :  { %v197_v39 = vmax.f32 %v177_v1, 0.0  ;;  %v178_v5 = vadd.f32 %v158_v38, %v90_v34 }
  0x24   :  { %216 = vst [vmem:[%s548_s6 + $0x88] sm:$0xff] %v196_v2 }
  0x25   :  { %217 = vst [vmem:[%s548_s6 + $0x90] sm:$0xff] %v197_v39  ;;  %v198_v40 = vmax.f32 %v178_v5, 0.0 }
  0x27   :  { %218 = vst [vmem:[%s548_s6 + $0x98] sm:$0xff] %v198_v40 }

</bundles_post_ra>
